<compile_context>
chip_gen: v7x
topology: tpu7x:2x2x1
jax: 0.10.0
libtpu: 0.0.40
codegen_flags: <defaults>
</compile_context>

<pallas_src>
import functools

import jax
import jax.numpy as jnp
import numpy as np
from jax.experimental import pallas as pl
from jax.experimental.pallas import tpu as pltpu  # noqa: F401  (kept for TPU backend import parity)


def _attn_kernel(xc_ref, xr_ref, wc_ref, wr_ref, out_ref, sim_ref, *,
                 batch, seq, num_heads, head_dim, scale):
    B, N, H, hd = batch, seq, num_heads, head_dim
    C = H * hd

    xc = xc_ref[...]                       # (B*N, C)
    xr = xr_ref[...]                       # (B*N, C)
    wc = wc_ref[...]                       # (C, 3C)
    wr = wr_ref[:, :2 * C]                 # (C, 2C) — v_reg is never used

    # One wide projection matmul per stream covering ALL batches at once.
    qkv_c = jnp.dot(xc, wc, preferred_element_type=jnp.float32)   # (B*N, 3C)
    qk_r = jnp.dot(xr, wr, preferred_element_type=jnp.float32)    # (B*N, 2C)

    q_c_all, k_c_all, v_c_all = qkv_c[:, :C], qkv_c[:, C:2 * C], qkv_c[:, 2 * C:]
    q_r_all, k_r_all = qk_r[:, :C], qk_r[:, C:]

    def l2n(t):
        return t * jax.lax.rsqrt(jnp.sum(t * t, axis=-1, keepdims=True))

    def softmax(logits):
        m = jnp.max(logits, axis=-1, keepdims=True)
        e = jnp.exp(logits - m)
        return e * pl.reciprocal(jnp.sum(e, axis=-1, keepdims=True), approx=True)

    def dot_nt(a, bm):  # a @ bm.T without an explicit transpose
        return jax.lax.dot_general(a, bm, (((1,), (1,)), ((), ())),
                                   preferred_element_type=jnp.float32)

    inv_h = 1.0 / H

    # Static unroll over batch (B is tiny); no grid-step overhead at all.
    for b in range(B):
        rows = slice(b * N, (b + 1) * N)           # sublane-aligned (N == 8)
        q_c, k_c, v_c = q_c_all[rows], k_c_all[rows], v_c_all[rows]
        q_r, k_r = q_r_all[rows], k_r_all[rows]

        x_parts = []
        attn_sum = None
        for h in range(H):
            sl = slice(h * hd, (h + 1) * hd)
            q_ch = l2n(q_c[:, sl]) * scale   # pre-scale q instead of the (N,N) logits
            k_ch = l2n(k_c[:, sl])
            q_rh = l2n(q_r[:, sl]) * scale
            k_rh = l2n(k_r[:, sl])
            v_h = v_c[:, sl]

            attn = (softmax(dot_nt(q_ch, k_ch)) +
                    softmax(dot_nt(q_rh, k_rh))) * 0.5
            x_parts.append(jnp.dot(attn, v_h, preferred_element_type=jnp.float32))
            if b == 0:
                attn_sum = attn if attn_sum is None else attn_sum + attn

        # Lane-dense output: heads folded back into channels + concat in-kernel.
        # v_c is already in the x_ori layout (n, h*hd + d).
        x2d = jnp.concatenate(x_parts, axis=-1)               # (N, C)
        out_ref[b] = jnp.concatenate([x2d, v_c], axis=-1)     # (N, 2C)

        # sim_round2 only uses batch 0; computed once, no pl.when needed.
        if b == 0:
            raw_sum = None
            for h in range(H):
                v_hn = l2n(v_c[:, h * hd:(h + 1) * hd])
                r = dot_nt(v_hn, v_hn)
                raw_sum = r if raw_sum is None else raw_sum + r
            sim_mask = jnp.where(raw_sum * inv_h > 0.75, 1.0, 0.0)
            sim_round2 = softmax(attn_sum * inv_h)
            num = sim_mask * sim_round2
            sim_ref[...] = num * pl.reciprocal(
                jnp.sum(num, axis=-1, keepdims=True), approx=True)


def attention_msa_online(x_cls, x_reg, w_cls, w_reg, *, num_heads=8, scale=25.0):
    B, N, C = x_cls.shape
    H = num_heads
    assert C % H == 0
    hd = C // H

    # Free bitcast reshape: collapse (B, N) so the projection matmul covers all
    # batches in one MXU pass.
    xc2 = x_cls.reshape(B * N, C)
    xr2 = x_reg.reshape(B * N, C)

    kernel = functools.partial(_attn_kernel, batch=B, seq=N, num_heads=H,
                               head_dim=hd, scale=float(scale))

    # Single invocation (no grid): everything fits comfortably in VMEM
    # (~30 KiB total), so default whole-array VMEM placement is optimal.
    x_cat, sim = pl.pallas_call(
        kernel,
        out_shape=(
            jax.ShapeDtypeStruct((B, N, 2 * C), jnp.float32),
            jax.ShapeDtypeStruct((N, N), jnp.float32),
        ),
    )(xc2, xr2, w_cls, w_reg)

    return x_cat, None, sim


def reference(x_cls, x_reg, w_cls, w_reg, *, num_heads=8, scale=25.0):
    """Pure-JAX port of the PyTorch forward (ave=True, scores=None)."""
    B, N, C = x_cls.shape
    H = num_heads
    hd = C // H

    def proj(x, w):
        qkv = (x @ w).reshape(B, N, 3, H, hd).transpose(2, 0, 3, 1, 4)
        return qkv[0], qkv[1], qkv[2]

    q_c, k_c, v_c = proj(x_cls, w_cls)
    q_r, k_r, _ = proj(x_reg, w_reg)

    def l2n(t):
        return t / jnp.linalg.norm(t, axis=-1, keepdims=True)

    q_c, k_c, q_r, k_r = l2n(q_c), l2n(k_c), l2n(q_r), l2n(k_r)
    v_c_n = l2n(v_c)

    attn_cls_raw = v_c_n @ jnp.swapaxes(v_c_n, -2, -1)
    attn_cls = jax.nn.softmax(q_c @ jnp.swapaxes(k_c, -2, -1) * scale, axis=-1)
    attn_reg = jax.nn.softmax(q_r @ jnp.swapaxes(k_r, -2, -1) * scale, axis=-1)
    attn = (attn_cls + attn_reg) / 2

    x = jnp.swapaxes(attn @ v_c, 1, 2).reshape(B, N, C)
    x_ori = jnp.transpose(v_c, (0, 2, 1, 3)).reshape(B, N, C)
    x_cat = jnp.concatenate([x, x_ori], axis=-1)

    raw = jnp.sum(attn_cls_raw, axis=1)[0] / H
    mask = jnp.where(raw > 0.75, 1.0, 0.0)
    sim_attn = jnp.sum(attn, axis=1)[0] / H
    sim = jax.nn.softmax(sim_attn, axis=-1)
    sim = mask * sim / jnp.sum(mask * sim, axis=-1, keepdims=True)
    return x_cat, None, sim


if __name__ == "__main__":
    B, N, C, H = 2, 8, 32, 8
    scale = 25.0

    key = jax.random.PRNGKey(0)
    k1, k2, k3, k4 = jax.random.split(key, 4)
    bound = 1.0 / np.sqrt(C)
    w_cls = jax.random.uniform(k1, (C, 3 * C), jnp.float32, -bound, bound)
    w_reg = jax.random.uniform(k2, (C, 3 * C), jnp.float32, -bound, bound)
    x_cls = jax.random.normal(k3, (B, N, C), jnp.float32)
    x_reg = jax.random.normal(k4, (B, N, C), jnp.float32)

    x_out, _, sim_out = attention_msa_online(
        x_cls, x_reg, w_cls, w_reg, num_heads=H, scale=scale)
    jax.block_until_ready((x_out, sim_out))

    x_ref, _, sim_ref = reference(
        x_cls, x_reg, w_cls, w_reg, num_heads=H, scale=scale)

    assert x_out.shape == (B, N, 2 * C), x_out.shape
    assert sim_out.shape == (N, N), sim_out.shape
    np.testing.assert_allclose(np.asarray(x_out), np.asarray(x_ref),
                               rtol=2e-2, atol=2e-2)
    np.testing.assert_allclose(np.asarray(sim_out), np.asarray(sim_ref),
                               rtol=2e-2, atol=2e-2)
    print("KERNEL_OK")
</pallas_src>

<mosaic_0001>
module attributes {stable_mosaic.version = 11 : i64} {
  func.func @_attn_kernel(%arg0: memref<16x32xf32, #tpu.memory_space<vmem>>, %arg1: memref<16x32xf32, #tpu.memory_space<vmem>>, %arg2: memref<32x96xf32, #tpu.memory_space<vmem>>, %arg3: memref<32x96xf32, #tpu.memory_space<vmem>>, %arg4: memref<2x8x64xf32, #tpu.memory_space<vmem>>, %arg5: memref<8x8xf32, #tpu.memory_space<vmem>>) attributes {dimension_semantics = [], scalar_prefetch = 0 : i64, scratch_operands = 0 : i64, tpu.core_type = #tpu.core_type<tc>} {
    %c0 = arith.constant 0 : index
    %c0_0 = arith.constant 0 : index
    %0 = vector.load %arg0[%c0, %c0_0] : memref<16x32xf32, #tpu.memory_space<vmem>>, vector<16x32xf32>
    %c0_1 = arith.constant 0 : index
    %c0_2 = arith.constant 0 : index
    %1 = vector.load %arg1[%c0_1, %c0_2] : memref<16x32xf32, #tpu.memory_space<vmem>>, vector<16x32xf32>
    %c0_3 = arith.constant 0 : index
    %c0_4 = arith.constant 0 : index
    %2 = vector.load %arg2[%c0_3, %c0_4] : memref<32x96xf32, #tpu.memory_space<vmem>>, vector<32x96xf32>
    %c0_5 = arith.constant 0 : index
    %c0_6 = arith.constant 0 : index
    %3 = vector.load %arg3[%c0_5, %c0_6] : memref<32x96xf32, #tpu.memory_space<vmem>>, vector<32x64xf32>
    %cst = arith.constant dense<0.000000e+00> : vector<16x96xf32>
    %4 = tpu.matmul %0, %2, %cst {dimension_numbers = #tpu.dot_dimension_numbers<[1], [0], [0], [1], [0, 0, 1, 1], [], []>} : vector<16x32xf32>, vector<32x96xf32>, vector<16x96xf32> -> vector<16x96xf32>
    %cst_7 = arith.constant dense<0.000000e+00> : vector<16x64xf32>
    %5 = tpu.matmul %1, %3, %cst_7 {dimension_numbers = #tpu.dot_dimension_numbers<[1], [0], [0], [1], [0, 0, 1, 1], [], []>} : vector<16x32xf32>, vector<32x64xf32>, vector<16x64xf32> -> vector<16x64xf32>
    %6 = vector.extract_strided_slice %4 {offsets = [0, 0], sizes = [16, 32], strides = [1, 1]} : vector<16x96xf32> to vector<16x32xf32>
    %7 = vector.extract_strided_slice %4 {offsets = [0, 32], sizes = [16, 32], strides = [1, 1]} : vector<16x96xf32> to vector<16x32xf32>
    %8 = vector.extract_strided_slice %4 {offsets = [0, 64], sizes = [16, 32], strides = [1, 1]} : vector<16x96xf32> to vector<16x32xf32>
    %9 = vector.extract_strided_slice %5 {offsets = [0, 0], sizes = [16, 32], strides = [1, 1]} : vector<16x64xf32> to vector<16x32xf32>
    %10 = vector.extract_strided_slice %5 {offsets = [0, 32], sizes = [16, 32], strides = [1, 1]} : vector<16x64xf32> to vector<16x32xf32>
    %11 = vector.extract_strided_slice %6 {offsets = [0, 0], sizes = [8, 32], strides = [1, 1]} : vector<16x32xf32> to vector<8x32xf32>
    %12 = vector.extract_strided_slice %7 {offsets = [0, 0], sizes = [8, 32], strides = [1, 1]} : vector<16x32xf32> to vector<8x32xf32>
    %13 = vector.extract_strided_slice %8 {offsets = [0, 0], sizes = [8, 32], strides = [1, 1]} : vector<16x32xf32> to vector<8x32xf32>
    %14 = vector.extract_strided_slice %9 {offsets = [0, 0], sizes = [8, 32], strides = [1, 1]} : vector<16x32xf32> to vector<8x32xf32>
    %15 = vector.extract_strided_slice %10 {offsets = [0, 0], sizes = [8, 32], strides = [1, 1]} : vector<16x32xf32> to vector<8x32xf32>
    %16 = vector.extract_strided_slice %11 {offsets = [0, 0], sizes = [8, 4], strides = [1, 1]} : vector<8x32xf32> to vector<8x4xf32>
    %17 = arith.mulf %16, %16 : vector<8x4xf32>
    %cst_8 = arith.constant dense<0.000000e+00> : vector<8xf32>
    %18 = vector.multi_reduction <add>, %17, %cst_8 [1] : vector<8x4xf32> to vector<8xf32>
    %19 = vector.shape_cast %18 : vector<8xf32> to vector<8x1xf32>
    %20 = math.rsqrt %19 : vector<8x1xf32>
    %21 = vector.broadcast %20 : vector<8x1xf32> to vector<8x4xf32>
    %22 = arith.mulf %16, %21 : vector<8x4xf32>
    %cst_9 = arith.constant 2.500000e+01 : f32
    %23 = vector.broadcast %cst_9 : f32 to vector<8x4xf32>
    %24 = arith.mulf %22, %23 : vector<8x4xf32>
    %25 = vector.extract_strided_slice %12 {offsets = [0, 0], sizes = [8, 4], strides = [1, 1]} : vector<8x32xf32> to vector<8x4xf32>
    %26 = arith.mulf %25, %25 : vector<8x4xf32>
    %cst_10 = arith.constant dense<0.000000e+00> : vector<8xf32>
    %27 = vector.multi_reduction <add>, %26, %cst_10 [1] : vector<8x4xf32> to vector<8xf32>
    %28 = vector.shape_cast %27 : vector<8xf32> to vector<8x1xf32>
    %29 = math.rsqrt %28 : vector<8x1xf32>
    %30 = vector.broadcast %29 : vector<8x1xf32> to vector<8x4xf32>
    %31 = arith.mulf %25, %30 : vector<8x4xf32>
    %32 = vector.extract_strided_slice %14 {offsets = [0, 0], sizes = [8, 4], strides = [1, 1]} : vector<8x32xf32> to vector<8x4xf32>
    %33 = arith.mulf %32, %32 : vector<8x4xf32>
    %cst_11 = arith.constant dense<0.000000e+00> : vector<8xf32>
    %34 = vector.multi_reduction <add>, %33, %cst_11 [1] : vector<8x4xf32> to vector<8xf32>
    %35 = vector.shape_cast %34 : vector<8xf32> to vector<8x1xf32>
    %36 = math.rsqrt %35 : vector<8x1xf32>
    %37 = vector.broadcast %36 : vector<8x1xf32> to vector<8x4xf32>
    %38 = arith.mulf %32, %37 : vector<8x4xf32>
    %cst_12 = arith.constant 2.500000e+01 : f32
    %39 = vector.broadcast %cst_12 : f32 to vector<8x4xf32>
    %40 = arith.mulf %38, %39 : vector<8x4xf32>
    %41 = vector.extract_strided_slice %15 {offsets = [0, 0], sizes = [8, 4], strides = [1, 1]} : vector<8x32xf32> to vector<8x4xf32>
    %42 = arith.mulf %41, %41 : vector<8x4xf32>
    %cst_13 = arith.constant dense<0.000000e+00> : vector<8xf32>
    %43 = vector.multi_reduction <add>, %42, %cst_13 [1] : vector<8x4xf32> to vector<8xf32>
    %44 = vector.shape_cast %43 : vector<8xf32> to vector<8x1xf32>
    %45 = math.rsqrt %44 : vector<8x1xf32>
    %46 = vector.broadcast %45 : vector<8x1xf32> to vector<8x4xf32>
    %47 = arith.mulf %41, %46 : vector<8x4xf32>
    %48 = vector.extract_strided_slice %13 {offsets = [0, 0], sizes = [8, 4], strides = [1, 1]} : vector<8x32xf32> to vector<8x4xf32>
    %cst_14 = arith.constant dense<0.000000e+00> : vector<8x8xf32>
    %49 = tpu.matmul %24, %31, %cst_14 {dimension_numbers = #tpu.dot_dimension_numbers<[1], [1], [0], [0], [0, 0, 1, 0], [], []>} : vector<8x4xf32>, vector<8x4xf32>, vector<8x8xf32> -> vector<8x8xf32>
    %cst_15 = arith.constant dense<0xFF800000> : vector<8xf32>
    %50 = vector.multi_reduction <maximumf>, %49, %cst_15 [1] : vector<8x8xf32> to vector<8xf32>
    %51 = vector.shape_cast %50 : vector<8xf32> to vector<8x1xf32>
    %52 = vector.broadcast %51 : vector<8x1xf32> to vector<8x8xf32>
    %53 = arith.subf %49, %52 : vector<8x8xf32>
    %54 = math.exp %53 : vector<8x8xf32>
    %cst_16 = arith.constant dense<0.000000e+00> : vector<8xf32>
    %55 = vector.multi_reduction <add>, %54, %cst_16 [1] : vector<8x8xf32> to vector<8xf32>
    %56 = vector.shape_cast %55 : vector<8xf32> to vector<8x1xf32>
    %57 = tpu.reciprocal %56 {approx = true} : vector<8x1xf32> -> vector<8x1xf32>
    %58 = vector.broadcast %57 : vector<8x1xf32> to vector<8x8xf32>
    %59 = arith.mulf %54, %58 : vector<8x8xf32>
    %cst_17 = arith.constant dense<0.000000e+00> : vector<8x8xf32>
    %60 = tpu.matmul %40, %47, %cst_17 {dimension_numbers = #tpu.dot_dimension_numbers<[1], [1], [0], [0], [0, 0, 1, 0], [], []>} : vector<8x4xf32>, vector<8x4xf32>, vector<8x8xf32> -> vector<8x8xf32>
    %cst_18 = arith.constant dense<0xFF800000> : vector<8xf32>
    %61 = vector.multi_reduction <maximumf>, %60, %cst_18 [1] : vector<8x8xf32> to vector<8xf32>
    %62 = vector.shape_cast %61 : vector<8xf32> to vector<8x1xf32>
    %63 = vector.broadcast %62 : vector<8x1xf32> to vector<8x8xf32>
    %64 = arith.subf %60, %63 : vector<8x8xf32>
    %65 = math.exp %64 : vector<8x8xf32>
    %cst_19 = arith.constant dense<0.000000e+00> : vector<8xf32>
    %66 = vector.multi_reduction <add>, %65, %cst_19 [1] : vector<8x8xf32> to vector<8xf32>
    %67 = vector.shape_cast %66 : vector<8xf32> to vector<8x1xf32>
    %68 = tpu.reciprocal %67 {approx = true} : vector<8x1xf32> -> vector<8x1xf32>
    %69 = vector.broadcast %68 : vector<8x1xf32> to vector<8x8xf32>
    %70 = arith.mulf %65, %69 : vector<8x8xf32>
    %71 = arith.addf %59, %70 : vector<8x8xf32>
    %cst_20 = arith.constant 5.000000e-01 : f32
    %72 = vector.broadcast %cst_20 : f32 to vector<8x8xf32>
    %73 = arith.mulf %71, %72 : vector<8x8xf32>
    %cst_21 = arith.constant dense<0.000000e+00> : vector<8x4xf32>
    %74 = tpu.matmul %73, %48, %cst_21 {dimension_numbers = #tpu.dot_dimension_numbers<[1], [0], [0], [1], [0, 0, 1, 1], [], []>} : vector<8x8xf32>, vector<8x4xf32>, vector<8x4xf32> -> vector<8x4xf32>
    %75 = vector.extract_strided_slice %11 {offsets = [0, 4], sizes = [8, 4], strides = [1, 1]} : vector<8x32xf32> to vector<8x4xf32>
    %76 = arith.mulf %75, %75 : vector<8x4xf32>
    %cst_22 = arith.constant dense<0.000000e+00> : vector<8xf32>
    %77 = vector.multi_reduction <add>, %76, %cst_22 [1] : vector<8x4xf32> to vector<8xf32>
    %78 = vector.shape_cast %77 : vector<8xf32> to vector<8x1xf32>
    %79 = math.rsqrt %78 : vector<8x1xf32>
    %80 = vector.broadcast %79 : vector<8x1xf32> to vector<8x4xf32>
    %81 = arith.mulf %75, %80 : vector<8x4xf32>
    %cst_23 = arith.constant 2.500000e+01 : f32
    %82 = vector.broadcast %cst_23 : f32 to vector<8x4xf32>
    %83 = arith.mulf %81, %82 : vector<8x4xf32>
    %84 = vector.extract_strided_slice %12 {offsets = [0, 4], sizes = [8, 4], strides = [1, 1]} : vector<8x32xf32> to vector<8x4xf32>
    %85 = arith.mulf %84, %84 : vector<8x4xf32>
    %cst_24 = arith.constant dense<0.000000e+00> : vector<8xf32>
    %86 = vector.multi_reduction <add>, %85, %cst_24 [1] : vector<8x4xf32> to vector<8xf32>
    %87 = vector.shape_cast %86 : vector<8xf32> to vector<8x1xf32>
    %88 = math.rsqrt %87 : vector<8x1xf32>
    %89 = vector.broadcast %88 : vector<8x1xf32> to vector<8x4xf32>
    %90 = arith.mulf %84, %89 : vector<8x4xf32>
    %91 = vector.extract_strided_slice %14 {offsets = [0, 4], sizes = [8, 4], strides = [1, 1]} : vector<8x32xf32> to vector<8x4xf32>
    %92 = arith.mulf %91, %91 : vector<8x4xf32>
    %cst_25 = arith.constant dense<0.000000e+00> : vector<8xf32>
    %93 = vector.multi_reduction <add>, %92, %cst_25 [1] : vector<8x4xf32> to vector<8xf32>
    %94 = vector.shape_cast %93 : vector<8xf32> to vector<8x1xf32>
    %95 = math.rsqrt %94 : vector<8x1xf32>
    %96 = vector.broadcast %95 : vector<8x1xf32> to vector<8x4xf32>
    %97 = arith.mulf %91, %96 : vector<8x4xf32>
    %cst_26 = arith.constant 2.500000e+01 : f32
    %98 = vector.broadcast %cst_26 : f32 to vector<8x4xf32>
    %99 = arith.mulf %97, %98 : vector<8x4xf32>
    %100 = vector.extract_strided_slice %15 {offsets = [0, 4], sizes = [8, 4], strides = [1, 1]} : vector<8x32xf32> to vector<8x4xf32>
    %101 = arith.mulf %100, %100 : vector<8x4xf32>
    %cst_27 = arith.constant dense<0.000000e+00> : vector<8xf32>
    %102 = vector.multi_reduction <add>, %101, %cst_27 [1] : vector<8x4xf32> to vector<8xf32>
    %103 = vector.shape_cast %102 : vector<8xf32> to vector<8x1xf32>
    %104 = math.rsqrt %103 : vector<8x1xf32>
    %105 = vector.broadcast %104 : vector<8x1xf32> to vector<8x4xf32>
    %106 = arith.mulf %100, %105 : vector<8x4xf32>
    %107 = vector.extract_strided_slice %13 {offsets = [0, 4], sizes = [8, 4], strides = [1, 1]} : vector<8x32xf32> to vector<8x4xf32>
    %cst_28 = arith.constant dense<0.000000e+00> : vector<8x8xf32>
    %108 = tpu.matmul %83, %90, %cst_28 {dimension_numbers = #tpu.dot_dimension_numbers<[1], [1], [0], [0], [0, 0, 1, 0], [], []>} : vector<8x4xf32>, vector<8x4xf32>, vector<8x8xf32> -> vector<8x8xf32>
    %cst_29 = arith.constant dense<0xFF800000> : vector<8xf32>
    %109 = vector.multi_reduction <maximumf>, %108, %cst_29 [1] : vector<8x8xf32> to vector<8xf32>
    %110 = vector.shape_cast %109 : vector<8xf32> to vector<8x1xf32>
    %111 = vector.broadcast %110 : vector<8x1xf32> to vector<8x8xf32>
    %112 = arith.subf %108, %111 : vector<8x8xf32>
    %113 = math.exp %112 : vector<8x8xf32>
    %cst_30 = arith.constant dense<0.000000e+00> : vector<8xf32>
    %114 = vector.multi_reduction <add>, %113, %cst_30 [1] : vector<8x8xf32> to vector<8xf32>
    %115 = vector.shape_cast %114 : vector<8xf32> to vector<8x1xf32>
    %116 = tpu.reciprocal %115 {approx = true} : vector<8x1xf32> -> vector<8x1xf32>
    %117 = vector.broadcast %116 : vector<8x1xf32> to vector<8x8xf32>
    %118 = arith.mulf %113, %117 : vector<8x8xf32>
    %cst_31 = arith.constant dense<0.000000e+00> : vector<8x8xf32>
    %119 = tpu.matmul %99, %106, %cst_31 {dimension_numbers = #tpu.dot_dimension_numbers<[1], [1], [0], [0], [0, 0, 1, 0], [], []>} : vector<8x4xf32>, vector<8x4xf32>, vector<8x8xf32> -> vector<8x8xf32>
    %cst_32 = arith.constant dense<0xFF800000> : vector<8xf32>
    %120 = vector.multi_reduction <maximumf>, %119, %cst_32 [1] : vector<8x8xf32> to vector<8xf32>
    %121 = vector.shape_cast %120 : vector<8xf32> to vector<8x1xf32>
    %122 = vector.broadcast %121 : vector<8x1xf32> to vector<8x8xf32>
    %123 = arith.subf %119, %122 : vector<8x8xf32>
    %124 = math.exp %123 : vector<8x8xf32>
    %cst_33 = arith.constant dense<0.000000e+00> : vector<8xf32>
    %125 = vector.multi_reduction <add>, %124, %cst_33 [1] : vector<8x8xf32> to vector<8xf32>
    %126 = vector.shape_cast %125 : vector<8xf32> to vector<8x1xf32>
    %127 = tpu.reciprocal %126 {approx = true} : vector<8x1xf32> -> vector<8x1xf32>
    %128 = vector.broadcast %127 : vector<8x1xf32> to vector<8x8xf32>
    %129 = arith.mulf %124, %128 : vector<8x8xf32>
    %130 = arith.addf %118, %129 : vector<8x8xf32>
    %cst_34 = arith.constant 5.000000e-01 : f32
    %131 = vector.broadcast %cst_34 : f32 to vector<8x8xf32>
    %132 = arith.mulf %130, %131 : vector<8x8xf32>
    %cst_35 = arith.constant dense<0.000000e+00> : vector<8x4xf32>
    %133 = tpu.matmul %132, %107, %cst_35 {dimension_numbers = #tpu.dot_dimension_numbers<[1], [0], [0], [1], [0, 0, 1, 1], [], []>} : vector<8x8xf32>, vector<8x4xf32>, vector<8x4xf32> -> vector<8x4xf32>
    %134 = arith.addf %73, %132 : vector<8x8xf32>
    %135 = vector.extract_strided_slice %11 {offsets = [0, 8], sizes = [8, 4], strides = [1, 1]} : vector<8x32xf32> to vector<8x4xf32>
    %136 = arith.mulf %135, %135 : vector<8x4xf32>
    %cst_36 = arith.constant dense<0.000000e+00> : vector<8xf32>
    %137 = vector.multi_reduction <add>, %136, %cst_36 [1] : vector<8x4xf32> to vector<8xf32>
    %138 = vector.shape_cast %137 : vector<8xf32> to vector<8x1xf32>
    %139 = math.rsqrt %138 : vector<8x1xf32>
    %140 = vector.broadcast %139 : vector<8x1xf32> to vector<8x4xf32>
    %141 = arith.mulf %135, %140 : vector<8x4xf32>
    %cst_37 = arith.constant 2.500000e+01 : f32
    %142 = vector.broadcast %cst_37 : f32 to vector<8x4xf32>
    %143 = arith.mulf %141, %142 : vector<8x4xf32>
    %144 = vector.extract_strided_slice %12 {offsets = [0, 8], sizes = [8, 4], strides = [1, 1]} : vector<8x32xf32> to vector<8x4xf32>
    %145 = arith.mulf %144, %144 : vector<8x4xf32>
    %cst_38 = arith.constant dense<0.000000e+00> : vector<8xf32>
    %146 = vector.multi_reduction <add>, %145, %cst_38 [1] : vector<8x4xf32> to vector<8xf32>
    %147 = vector.shape_cast %146 : vector<8xf32> to vector<8x1xf32>
    %148 = math.rsqrt %147 : vector<8x1xf32>
    %149 = vector.broadcast %148 : vector<8x1xf32> to vector<8x4xf32>
    %150 = arith.mulf %144, %149 : vector<8x4xf32>
    %151 = vector.extract_strided_slice %14 {offsets = [0, 8], sizes = [8, 4], strides = [1, 1]} : vector<8x32xf32> to vector<8x4xf32>
    %152 = arith.mulf %151, %151 : vector<8x4xf32>
    %cst_39 = arith.constant dense<0.000000e+00> : vector<8xf32>
    %153 = vector.multi_reduction <add>, %152, %cst_39 [1] : vector<8x4xf32> to vector<8xf32>
    %154 = vector.shape_cast %153 : vector<8xf32> to vector<8x1xf32>
    %155 = math.rsqrt %154 : vector<8x1xf32>
    %156 = vector.broadcast %155 : vector<8x1xf32> to vector<8x4xf32>
    %157 = arith.mulf %151, %156 : vector<8x4xf32>
    %cst_40 = arith.constant 2.500000e+01 : f32
    %158 = vector.broadcast %cst_40 : f32 to vector<8x4xf32>
    %159 = arith.mulf %157, %158 : vector<8x4xf32>
    %160 = vector.extract_strided_slice %15 {offsets = [0, 8], sizes = [8, 4], strides = [1, 1]} : vector<8x32xf32> to vector<8x4xf32>
    %161 = arith.mulf %160, %160 : vector<8x4xf32>
    %cst_41 = arith.constant dense<0.000000e+00> : vector<8xf32>
    %162 = vector.multi_reduction <add>, %161, %cst_41 [1] : vector<8x4xf32> to vector<8xf32>
    %163 = vector.shape_cast %162 : vector<8xf32> to vector<8x1xf32>
    %164 = math.rsqrt %163 : vector<8x1xf32>
    %165 = vector.broadcast %164 : vector<8x1xf32> to vector<8x4xf32>
    %166 = arith.mulf %160, %165 : vector<8x4xf32>
    %167 = vector.extract_strided_slice %13 {offsets = [0, 8], sizes = [8, 4], strides = [1, 1]} : vector<8x32xf32> to vector<8x4xf32>
    %cst_42 = arith.constant dense<0.000000e+00> : vector<8x8xf32>
    %168 = tpu.matmul %143, %150, %cst_42 {dimension_numbers = #tpu.dot_dimension_numbers<[1], [1], [0], [0], [0, 0, 1, 0], [], []>} : vector<8x4xf32>, vector<8x4xf32>, vector<8x8xf32> -> vector<8x8xf32>
    %cst_43 = arith.constant dense<0xFF800000> : vector<8xf32>
    %169 = vector.multi_reduction <maximumf>, %168, %cst_43 [1] : vector<8x8xf32> to vector<8xf32>
    %170 = vector.shape_cast %169 : vector<8xf32> to vector<8x1xf32>
    %171 = vector.broadcast %170 : vector<8x1xf32> to vector<8x8xf32>
    %172 = arith.subf %168, %171 : vector<8x8xf32>
    %173 = math.exp %172 : vector<8x8xf32>
    %cst_44 = arith.constant dense<0.000000e+00> : vector<8xf32>
    %174 = vector.multi_reduction <add>, %173, %cst_44 [1] : vector<8x8xf32> to vector<8xf32>
    %175 = vector.shape_cast %174 : vector<8xf32> to vector<8x1xf32>
    %176 = tpu.reciprocal %175 {approx = true} : vector<8x1xf32> -> vector<8x1xf32>
    %177 = vector.broadcast %176 : vector<8x1xf32> to vector<8x8xf32>
    %178 = arith.mulf %173, %177 : vector<8x8xf32>
    %cst_45 = arith.constant dense<0.000000e+00> : vector<8x8xf32>
    %179 = tpu.matmul %159, %166, %cst_45 {dimension_numbers = #tpu.dot_dimension_numbers<[1], [1], [0], [0], [0, 0, 1, 0], [], []>} : vector<8x4xf32>, vector<8x4xf32>, vector<8x8xf32> -> vector<8x8xf32>
    %cst_46 = arith.constant dense<0xFF800000> : vector<8xf32>
    %180 = vector.multi_reduction <maximumf>, %179, %cst_46 [1] : vector<8x8xf32> to vector<8xf32>
    %181 = vector.shape_cast %180 : vector<8xf32> to vector<8x1xf32>
    %182 = vector.broadcast %181 : vector<8x1xf32> to vector<8x8xf32>
    %183 = arith.subf %179, %182 : vector<8x8xf32>
    %184 = math.exp %183 : vector<8x8xf32>
    %cst_47 = arith.constant dense<0.000000e+00> : vector<8xf32>
    %185 = vector.multi_reduction <add>, %184, %cst_47 [1] : vector<8x8xf32> to vector<8xf32>
    %186 = vector.shape_cast %185 : vector<8xf32> to vector<8x1xf32>
    %187 = tpu.reciprocal %186 {approx = true} : vector<8x1xf32> -> vector<8x1xf32>
    %188 = vector.broadcast %187 : vector<8x1xf32> to vector<8x8xf32>
    %189 = arith.mulf %184, %188 : vector<8x8xf32>
    %190 = arith.addf %178, %189 : vector<8x8xf32>
    %cst_48 = arith.constant 5.000000e-01 : f32
    %191 = vector.broadcast %cst_48 : f32 to vector<8x8xf32>
    %192 = arith.mulf %190, %191 : vector<8x8xf32>
    %cst_49 = arith.constant dense<0.000000e+00> : vector<8x4xf32>
    %193 = tpu.matmul %192, %167, %cst_49 {dimension_numbers = #tpu.dot_dimension_numbers<[1], [0], [0], [1], [0, 0, 1, 1], [], []>} : vector<8x8xf32>, vector<8x4xf32>, vector<8x4xf32> -> vector<8x4xf32>
    %194 = arith.addf %134, %192 : vector<8x8xf32>
    %195 = vector.extract_strided_slice %11 {offsets = [0, 12], sizes = [8, 4], strides = [1, 1]} : vector<8x32xf32> to vector<8x4xf32>
    %196 = arith.mulf %195, %195 : vector<8x4xf32>
    %cst_50 = arith.constant dense<0.000000e+00> : vector<8xf32>
    %197 = vector.multi_reduction <add>, %196, %cst_50 [1] : vector<8x4xf32> to vector<8xf32>
    %198 = vector.shape_cast %197 : vector<8xf32> to vector<8x1xf32>
    %199 = math.rsqrt %198 : vector<8x1xf32>
    %200 = vector.broadcast %199 : vector<8x1xf32> to vector<8x4xf32>
    %201 = arith.mulf %195, %200 : vector<8x4xf32>
    %cst_51 = arith.constant 2.500000e+01 : f32
    %202 = vector.broadcast %cst_51 : f32 to vector<8x4xf32>
    %203 = arith.mulf %201, %202 : vector<8x4xf32>
    %204 = vector.extract_strided_slice %12 {offsets = [0, 12], sizes = [8, 4], strides = [1, 1]} : vector<8x32xf32> to vector<8x4xf32>
    %205 = arith.mulf %204, %204 : vector<8x4xf32>
    %cst_52 = arith.constant dense<0.000000e+00> : vector<8xf32>
    %206 = vector.multi_reduction <add>, %205, %cst_52 [1] : vector<8x4xf32> to vector<8xf32>
    %207 = vector.shape_cast %206 : vector<8xf32> to vector<8x1xf32>
    %208 = math.rsqrt %207 : vector<8x1xf32>
    %209 = vector.broadcast %208 : vector<8x1xf32> to vector<8x4xf32>
    %210 = arith.mulf %204, %209 : vector<8x4xf32>
    %211 = vector.extract_strided_slice %14 {offsets = [0, 12], sizes = [8, 4], strides = [1, 1]} : vector<8x32xf32> to vector<8x4xf32>
    %212 = arith.mulf %211, %211 : vector<8x4xf32>
    %cst_53 = arith.constant dense<0.000000e+00> : vector<8xf32>
    %213 = vector.multi_reduction <add>, %212, %cst_53 [1] : vector<8x4xf32> to vector<8xf32>
    %214 = vector.shape_cast %213 : vector<8xf32> to vector<8x1xf32>
    %215 = math.rsqrt %214 : vector<8x1xf32>
    %216 = vector.broadcast %215 : vector<8x1xf32> to vector<8x4xf32>
    %217 = arith.mulf %211, %216 : vector<8x4xf32>
    %cst_54 = arith.constant 2.500000e+01 : f32
    %218 = vector.broadcast %cst_54 : f32 to vector<8x4xf32>
    %219 = arith.mulf %217, %218 : vector<8x4xf32>
    %220 = vector.extract_strided_slice %15 {offsets = [0, 12], sizes = [8, 4], strides = [1, 1]} : vector<8x32xf32> to vector<8x4xf32>
    %221 = arith.mulf %220, %220 : vector<8x4xf32>
    %cst_55 = arith.constant dense<0.000000e+00> : vector<8xf32>
    %222 = vector.multi_reduction <add>, %221, %cst_55 [1] : vector<8x4xf32> to vector<8xf32>
    %223 = vector.shape_cast %222 : vector<8xf32> to vector<8x1xf32>
    %224 = math.rsqrt %223 : vector<8x1xf32>
    %225 = vector.broadcast %224 : vector<8x1xf32> to vector<8x4xf32>
    %226 = arith.mulf %220, %225 : vector<8x4xf32>
    %227 = vector.extract_strided_slice %13 {offsets = [0, 12], sizes = [8, 4], strides = [1, 1]} : vector<8x32xf32> to vector<8x4xf32>
    %cst_56 = arith.constant dense<0.000000e+00> : vector<8x8xf32>
    %228 = tpu.matmul %203, %210, %cst_56 {dimension_numbers = #tpu.dot_dimension_numbers<[1], [1], [0], [0], [0, 0, 1, 0], [], []>} : vector<8x4xf32>, vector<8x4xf32>, vector<8x8xf32> -> vector<8x8xf32>
    %cst_57 = arith.constant dense<0xFF800000> : vector<8xf32>
    %229 = vector.multi_reduction <maximumf>, %228, %cst_57 [1] : vector<8x8xf32> to vector<8xf32>
    %230 = vector.shape_cast %229 : vector<8xf32> to vector<8x1xf32>
    %231 = vector.broadcast %230 : vector<8x1xf32> to vector<8x8xf32>
    %232 = arith.subf %228, %231 : vector<8x8xf32>
    %233 = math.exp %232 : vector<8x8xf32>
    %cst_58 = arith.constant dense<0.000000e+00> : vector<8xf32>
    %234 = vector.multi_reduction <add>, %233, %cst_58 [1] : vector<8x8xf32> to vector<8xf32>
    %235 = vector.shape_cast %234 : vector<8xf32> to vector<8x1xf32>
    %236 = tpu.reciprocal %235 {approx = true} : vector<8x1xf32> -> vector<8x1xf32>
    %237 = vector.broadcast %236 : vector<8x1xf32> to vector<8x8xf32>
    %238 = arith.mulf %233, %237 : vector<8x8xf32>
    %cst_59 = arith.constant dense<0.000000e+00> : vector<8x8xf32>
    %239 = tpu.matmul %219, %226, %cst_59 {dimension_numbers = #tpu.dot_dimension_numbers<[1], [1], [0], [0], [0, 0, 1, 0], [], []>} : vector<8x4xf32>, vector<8x4xf32>, vector<8x8xf32> -> vector<8x8xf32>
    %cst_60 = arith.constant dense<0xFF800000> : vector<8xf32>
    %240 = vector.multi_reduction <maximumf>, %239, %cst_60 [1] : vector<8x8xf32> to vector<8xf32>
    %241 = vector.shape_cast %240 : vector<8xf32> to vector<8x1xf32>
    %242 = vector.broadcast %241 : vector<8x1xf32> to vector<8x8xf32>
    %243 = arith.subf %239, %242 : vector<8x8xf32>
    %244 = math.exp %243 : vector<8x8xf32>
    %cst_61 = arith.constant dense<0.000000e+00> : vector<8xf32>
    %245 = vector.multi_reduction <add>, %244, %cst_61 [1] : vector<8x8xf32> to vector<8xf32>
    %246 = vector.shape_cast %245 : vector<8xf32> to vector<8x1xf32>
    %247 = tpu.reciprocal %246 {approx = true} : vector<8x1xf32> -> vector<8x1xf32>
    %248 = vector.broadcast %247 : vector<8x1xf32> to vector<8x8xf32>
    %249 = arith.mulf %244, %248 : vector<8x8xf32>
    %250 = arith.addf %238, %249 : vector<8x8xf32>
    %cst_62 = arith.constant 5.000000e-01 : f32
    %251 = vector.broadcast %cst_62 : f32 to vector<8x8xf32>
    %252 = arith.mulf %250, %251 : vector<8x8xf32>
    %cst_63 = arith.constant dense<0.000000e+00> : vector<8x4xf32>
    %253 = tpu.matmul %252, %227, %cst_63 {dimension_numbers = #tpu.dot_dimension_numbers<[1], [0], [0], [1], [0, 0, 1, 1], [], []>} : vector<8x8xf32>, vector<8x4xf32>, vector<8x4xf32> -> vector<8x4xf32>
    %254 = arith.addf %194, %252 : vector<8x8xf32>
    %255 = vector.extract_strided_slice %11 {offsets = [0, 16], sizes = [8, 4], strides = [1, 1]} : vector<8x32xf32> to vector<8x4xf32>
    %256 = arith.mulf %255, %255 : vector<8x4xf32>
    %cst_64 = arith.constant dense<0.000000e+00> : vector<8xf32>
    %257 = vector.multi_reduction <add>, %256, %cst_64 [1] : vector<8x4xf32> to vector<8xf32>
    %258 = vector.shape_cast %257 : vector<8xf32> to vector<8x1xf32>
    %259 = math.rsqrt %258 : vector<8x1xf32>
    %260 = vector.broadcast %259 : vector<8x1xf32> to vector<8x4xf32>
    %261 = arith.mulf %255, %260 : vector<8x4xf32>
    %cst_65 = arith.constant 2.500000e+01 : f32
    %262 = vector.broadcast %cst_65 : f32 to vector<8x4xf32>
    %263 = arith.mulf %261, %262 : vector<8x4xf32>
    %264 = vector.extract_strided_slice %12 {offsets = [0, 16], sizes = [8, 4], strides = [1, 1]} : vector<8x32xf32> to vector<8x4xf32>
    %265 = arith.mulf %264, %264 : vector<8x4xf32>
    %cst_66 = arith.constant dense<0.000000e+00> : vector<8xf32>
    %266 = vector.multi_reduction <add>, %265, %cst_66 [1] : vector<8x4xf32> to vector<8xf32>
    %267 = vector.shape_cast %266 : vector<8xf32> to vector<8x1xf32>
    %268 = math.rsqrt %267 : vector<8x1xf32>
    %269 = vector.broadcast %268 : vector<8x1xf32> to vector<8x4xf32>
    %270 = arith.mulf %264, %269 : vector<8x4xf32>
    %271 = vector.extract_strided_slice %14 {offsets = [0, 16], sizes = [8, 4], strides = [1, 1]} : vector<8x32xf32> to vector<8x4xf32>
    %272 = arith.mulf %271, %271 : vector<8x4xf32>
    %cst_67 = arith.constant dense<0.000000e+00> : vector<8xf32>
    %273 = vector.multi_reduction <add>, %272, %cst_67 [1] : vector<8x4xf32> to vector<8xf32>
    %274 = vector.shape_cast %273 : vector<8xf32> to vector<8x1xf32>
    %275 = math.rsqrt %274 : vector<8x1xf32>
    %276 = vector.broadcast %275 : vector<8x1xf32> to vector<8x4xf32>
    %277 = arith.mulf %271, %276 : vector<8x4xf32>
    %cst_68 = arith.constant 2.500000e+01 : f32
    %278 = vector.broadcast %cst_68 : f32 to vector<8x4xf32>
    %279 = arith.mulf %277, %278 : vector<8x4xf32>
    %280 = vector.extract_strided_slice %15 {offsets = [0, 16], sizes = [8, 4], strides = [1, 1]} : vector<8x32xf32> to vector<8x4xf32>
    %281 = arith.mulf %280, %280 : vector<8x4xf32>
    %cst_69 = arith.constant dense<0.000000e+00> : vector<8xf32>
    %282 = vector.multi_reduction <add>, %281, %cst_69 [1] : vector<8x4xf32> to vector<8xf32>
    %283 = vector.shape_cast %282 : vector<8xf32> to vector<8x1xf32>
    %284 = math.rsqrt %283 : vector<8x1xf32>
    %285 = vector.broadcast %284 : vector<8x1xf32> to vector<8x4xf32>
    %286 = arith.mulf %280, %285 : vector<8x4xf32>
    %287 = vector.extract_strided_slice %13 {offsets = [0, 16], sizes = [8, 4], strides = [1, 1]} : vector<8x32xf32> to vector<8x4xf32>
    %cst_70 = arith.constant dense<0.000000e+00> : vector<8x8xf32>
    %288 = tpu.matmul %263, %270, %cst_70 {dimension_numbers = #tpu.dot_dimension_numbers<[1], [1], [0], [0], [0, 0, 1, 0], [], []>} : vector<8x4xf32>, vector<8x4xf32>, vector<8x8xf32> -> vector<8x8xf32>
    %cst_71 = arith.constant dense<0xFF800000> : vector<8xf32>
    %289 = vector.multi_reduction <maximumf>, %288, %cst_71 [1] : vector<8x8xf32> to vector<8xf32>
    %290 = vector.shape_cast %289 : vector<8xf32> to vector<8x1xf32>
    %291 = vector.broadcast %290 : vector<8x1xf32> to vector<8x8xf32>
    %292 = arith.subf %288, %291 : vector<8x8xf32>
    %293 = math.exp %292 : vector<8x8xf32>
    %cst_72 = arith.constant dense<0.000000e+00> : vector<8xf32>
    %294 = vector.multi_reduction <add>, %293, %cst_72 [1] : vector<8x8xf32> to vector<8xf32>
    %295 = vector.shape_cast %294 : vector<8xf32> to vector<8x1xf32>
    %296 = tpu.reciprocal %295 {approx = true} : vector<8x1xf32> -> vector<8x1xf32>
    %297 = vector.broadcast %296 : vector<8x1xf32> to vector<8x8xf32>
    %298 = arith.mulf %293, %297 : vector<8x8xf32>
    %cst_73 = arith.constant dense<0.000000e+00> : vector<8x8xf32>
    %299 = tpu.matmul %279, %286, %cst_73 {dimension_numbers = #tpu.dot_dimension_numbers<[1], [1], [0], [0], [0, 0, 1, 0], [], []>} : vector<8x4xf32>, vector<8x4xf32>, vector<8x8xf32> -> vector<8x8xf32>
    %cst_74 = arith.constant dense<0xFF800000> : vector<8xf32>
    %300 = vector.multi_reduction <maximumf>, %299, %cst_74 [1] : vector<8x8xf32> to vector<8xf32>
    %301 = vector.shape_cast %300 : vector<8xf32> to vector<8x1xf32>
    %302 = vector.broadcast %301 : vector<8x1xf32> to vector<8x8xf32>
    %303 = arith.subf %299, %302 : vector<8x8xf32>
    %304 = math.exp %303 : vector<8x8xf32>
    %cst_75 = arith.constant dense<0.000000e+00> : vector<8xf32>
    %305 = vector.multi_reduction <add>, %304, %cst_75 [1] : vector<8x8xf32> to vector<8xf32>
    %306 = vector.shape_cast %305 : vector<8xf32> to vector<8x1xf32>
    %307 = tpu.reciprocal %306 {approx = true} : vector<8x1xf32> -> vector<8x1xf32>
    %308 = vector.broadcast %307 : vector<8x1xf32> to vector<8x8xf32>
    %309 = arith.mulf %304, %308 : vector<8x8xf32>
    %310 = arith.addf %298, %309 : vector<8x8xf32>
    %cst_76 = arith.constant 5.000000e-01 : f32
    %311 = vector.broadcast %cst_76 : f32 to vector<8x8xf32>
    %312 = arith.mulf %310, %311 : vector<8x8xf32>
    %cst_77 = arith.constant dense<0.000000e+00> : vector<8x4xf32>
    %313 = tpu.matmul %312, %287, %cst_77 {dimension_numbers = #tpu.dot_dimension_numbers<[1], [0], [0], [1], [0, 0, 1, 1], [], []>} : vector<8x8xf32>, vector<8x4xf32>, vector<8x4xf32> -> vector<8x4xf32>
    %314 = arith.addf %254, %312 : vector<8x8xf32>
    %315 = vector.extract_strided_slice %11 {offsets = [0, 20], sizes = [8, 4], strides = [1, 1]} : vector<8x32xf32> to vector<8x4xf32>
    %316 = arith.mulf %315, %315 : vector<8x4xf32>
    %cst_78 = arith.constant dense<0.000000e+00> : vector<8xf32>
    %317 = vector.multi_reduction <add>, %316, %cst_78 [1] : vector<8x4xf32> to vector<8xf32>
    %318 = vector.shape_cast %317 : vector<8xf32> to vector<8x1xf32>
    %319 = math.rsqrt %318 : vector<8x1xf32>
    %320 = vector.broadcast %319 : vector<8x1xf32> to vector<8x4xf32>
    %321 = arith.mulf %315, %320 : vector<8x4xf32>
    %cst_79 = arith.constant 2.500000e+01 : f32
    %322 = vector.broadcast %cst_79 : f32 to vector<8x4xf32>
    %323 = arith.mulf %321, %322 : vector<8x4xf32>
    %324 = vector.extract_strided_slice %12 {offsets = [0, 20], sizes = [8, 4], strides = [1, 1]} : vector<8x32xf32> to vector<8x4xf32>
    %325 = arith.mulf %324, %324 : vector<8x4xf32>
    %cst_80 = arith.constant dense<0.000000e+00> : vector<8xf32>
    %326 = vector.multi_reduction <add>, %325, %cst_80 [1] : vector<8x4xf32> to vector<8xf32>
    %327 = vector.shape_cast %326 : vector<8xf32> to vector<8x1xf32>
    %328 = math.rsqrt %327 : vector<8x1xf32>
    %329 = vector.broadcast %328 : vector<8x1xf32> to vector<8x4xf32>
    %330 = arith.mulf %324, %329 : vector<8x4xf32>
    %331 = vector.extract_strided_slice %14 {offsets = [0, 20], sizes = [8, 4], strides = [1, 1]} : vector<8x32xf32> to vector<8x4xf32>
    %332 = arith.mulf %331, %331 : vector<8x4xf32>
    %cst_81 = arith.constant dense<0.000000e+00> : vector<8xf32>
    %333 = vector.multi_reduction <add>, %332, %cst_81 [1] : vector<8x4xf32> to vector<8xf32>
    %334 = vector.shape_cast %333 : vector<8xf32> to vector<8x1xf32>
    %335 = math.rsqrt %334 : vector<8x1xf32>
    %336 = vector.broadcast %335 : vector<8x1xf32> to vector<8x4xf32>
    %337 = arith.mulf %331, %336 : vector<8x4xf32>
    %cst_82 = arith.constant 2.500000e+01 : f32
    %338 = vector.broadcast %cst_82 : f32 to vector<8x4xf32>
    %339 = arith.mulf %337, %338 : vector<8x4xf32>
    %340 = vector.extract_strided_slice %15 {offsets = [0, 20], sizes = [8, 4], strides = [1, 1]} : vector<8x32xf32> to vector<8x4xf32>
    %341 = arith.mulf %340, %340 : vector<8x4xf32>
    %cst_83 = arith.constant dense<0.000000e+00> : vector<8xf32>
    %342 = vector.multi_reduction <add>, %341, %cst_83 [1] : vector<8x4xf32> to vector<8xf32>
    %343 = vector.shape_cast %342 : vector<8xf32> to vector<8x1xf32>
    %344 = math.rsqrt %343 : vector<8x1xf32>
    %345 = vector.broadcast %344 : vector<8x1xf32> to vector<8x4xf32>
    %346 = arith.mulf %340, %345 : vector<8x4xf32>
    %347 = vector.extract_strided_slice %13 {offsets = [0, 20], sizes = [8, 4], strides = [1, 1]} : vector<8x32xf32> to vector<8x4xf32>
    %cst_84 = arith.constant dense<0.000000e+00> : vector<8x8xf32>
    %348 = tpu.matmul %323, %330, %cst_84 {dimension_numbers = #tpu.dot_dimension_numbers<[1], [1], [0], [0], [0, 0, 1, 0], [], []>} : vector<8x4xf32>, vector<8x4xf32>, vector<8x8xf32> -> vector<8x8xf32>
    %cst_85 = arith.constant dense<0xFF800000> : vector<8xf32>
    %349 = vector.multi_reduction <maximumf>, %348, %cst_85 [1] : vector<8x8xf32> to vector<8xf32>
    %350 = vector.shape_cast %349 : vector<8xf32> to vector<8x1xf32>
    %351 = vector.broadcast %350 : vector<8x1xf32> to vector<8x8xf32>
    %352 = arith.subf %348, %351 : vector<8x8xf32>
    %353 = math.exp %352 : vector<8x8xf32>
    %cst_86 = arith.constant dense<0.000000e+00> : vector<8xf32>
    %354 = vector.multi_reduction <add>, %353, %cst_86 [1] : vector<8x8xf32> to vector<8xf32>
    %355 = vector.shape_cast %354 : vector<8xf32> to vector<8x1xf32>
    %356 = tpu.reciprocal %355 {approx = true} : vector<8x1xf32> -> vector<8x1xf32>
    %357 = vector.broadcast %356 : vector<8x1xf32> to vector<8x8xf32>
    %358 = arith.mulf %353, %357 : vector<8x8xf32>
    %cst_87 = arith.constant dense<0.000000e+00> : vector<8x8xf32>
    %359 = tpu.matmul %339, %346, %cst_87 {dimension_numbers = #tpu.dot_dimension_numbers<[1], [1], [0], [0], [0, 0, 1, 0], [], []>} : vector<8x4xf32>, vector<8x4xf32>, vector<8x8xf32> -> vector<8x8xf32>
    %cst_88 = arith.constant dense<0xFF800000> : vector<8xf32>
    %360 = vector.multi_reduction <maximumf>, %359, %cst_88 [1] : vector<8x8xf32> to vector<8xf32>
    %361 = vector.shape_cast %360 : vector<8xf32> to vector<8x1xf32>
    %362 = vector.broadcast %361 : vector<8x1xf32> to vector<8x8xf32>
    %363 = arith.subf %359, %362 : vector<8x8xf32>
    %364 = math.exp %363 : vector<8x8xf32>
    %cst_89 = arith.constant dense<0.000000e+00> : vector<8xf32>
    %365 = vector.multi_reduction <add>, %364, %cst_89 [1] : vector<8x8xf32> to vector<8xf32>
    %366 = vector.shape_cast %365 : vector<8xf32> to vector<8x1xf32>
    %367 = tpu.reciprocal %366 {approx = true} : vector<8x1xf32> -> vector<8x1xf32>
    %368 = vector.broadcast %367 : vector<8x1xf32> to vector<8x8xf32>
    %369 = arith.mulf %364, %368 : vector<8x8xf32>
    %370 = arith.addf %358, %369 : vector<8x8xf32>
    %cst_90 = arith.constant 5.000000e-01 : f32
    %371 = vector.broadcast %cst_90 : f32 to vector<8x8xf32>
    %372 = arith.mulf %370, %371 : vector<8x8xf32>
    %cst_91 = arith.constant dense<0.000000e+00> : vector<8x4xf32>
    %373 = tpu.matmul %372, %347, %cst_91 {dimension_numbers = #tpu.dot_dimension_numbers<[1], [0], [0], [1], [0, 0, 1, 1], [], []>} : vector<8x8xf32>, vector<8x4xf32>, vector<8x4xf32> -> vector<8x4xf32>
    %374 = arith.addf %314, %372 : vector<8x8xf32>
    %375 = vector.extract_strided_slice %11 {offsets = [0, 24], sizes = [8, 4], strides = [1, 1]} : vector<8x32xf32> to vector<8x4xf32>
    %376 = arith.mulf %375, %375 : vector<8x4xf32>
    %cst_92 = arith.constant dense<0.000000e+00> : vector<8xf32>
    %377 = vector.multi_reduction <add>, %376, %cst_92 [1] : vector<8x4xf32> to vector<8xf32>
    %378 = vector.shape_cast %377 : vector<8xf32> to vector<8x1xf32>
    %379 = math.rsqrt %378 : vector<8x1xf32>
    %380 = vector.broadcast %379 : vector<8x1xf32> to vector<8x4xf32>
    %381 = arith.mulf %375, %380 : vector<8x4xf32>
    %cst_93 = arith.constant 2.500000e+01 : f32
    %382 = vector.broadcast %cst_93 : f32 to vector<8x4xf32>
    %383 = arith.mulf %381, %382 : vector<8x4xf32>
    %384 = vector.extract_strided_slice %12 {offsets = [0, 24], sizes = [8, 4], strides = [1, 1]} : vector<8x32xf32> to vector<8x4xf32>
    %385 = arith.mulf %384, %384 : vector<8x4xf32>
    %cst_94 = arith.constant dense<0.000000e+00> : vector<8xf32>
    %386 = vector.multi_reduction <add>, %385, %cst_94 [1] : vector<8x4xf32> to vector<8xf32>
    %387 = vector.shape_cast %386 : vector<8xf32> to vector<8x1xf32>
    %388 = math.rsqrt %387 : vector<8x1xf32>
    %389 = vector.broadcast %388 : vector<8x1xf32> to vector<8x4xf32>
    %390 = arith.mulf %384, %389 : vector<8x4xf32>
    %391 = vector.extract_strided_slice %14 {offsets = [0, 24], sizes = [8, 4], strides = [1, 1]} : vector<8x32xf32> to vector<8x4xf32>
    %392 = arith.mulf %391, %391 : vector<8x4xf32>
    %cst_95 = arith.constant dense<0.000000e+00> : vector<8xf32>
    %393 = vector.multi_reduction <add>, %392, %cst_95 [1] : vector<8x4xf32> to vector<8xf32>
    %394 = vector.shape_cast %393 : vector<8xf32> to vector<8x1xf32>
    %395 = math.rsqrt %394 : vector<8x1xf32>
    %396 = vector.broadcast %395 : vector<8x1xf32> to vector<8x4xf32>
    %397 = arith.mulf %391, %396 : vector<8x4xf32>
    %cst_96 = arith.constant 2.500000e+01 : f32
    %398 = vector.broadcast %cst_96 : f32 to vector<8x4xf32>
    %399 = arith.mulf %397, %398 : vector<8x4xf32>
    %400 = vector.extract_strided_slice %15 {offsets = [0, 24], sizes = [8, 4], strides = [1, 1]} : vector<8x32xf32> to vector<8x4xf32>
    %401 = arith.mulf %400, %400 : vector<8x4xf32>
    %cst_97 = arith.constant dense<0.000000e+00> : vector<8xf32>
    %402 = vector.multi_reduction <add>, %401, %cst_97 [1] : vector<8x4xf32> to vector<8xf32>
    %403 = vector.shape_cast %402 : vector<8xf32> to vector<8x1xf32>
    %404 = math.rsqrt %403 : vector<8x1xf32>
    %405 = vector.broadcast %404 : vector<8x1xf32> to vector<8x4xf32>
    %406 = arith.mulf %400, %405 : vector<8x4xf32>
    %407 = vector.extract_strided_slice %13 {offsets = [0, 24], sizes = [8, 4], strides = [1, 1]} : vector<8x32xf32> to vector<8x4xf32>
    %cst_98 = arith.constant dense<0.000000e+00> : vector<8x8xf32>
    %408 = tpu.matmul %383, %390, %cst_98 {dimension_numbers = #tpu.dot_dimension_numbers<[1], [1], [0], [0], [0, 0, 1, 0], [], []>} : vector<8x4xf32>, vector<8x4xf32>, vector<8x8xf32> -> vector<8x8xf32>
    %cst_99 = arith.constant dense<0xFF800000> : vector<8xf32>
    %409 = vector.multi_reduction <maximumf>, %408, %cst_99 [1] : vector<8x8xf32> to vector<8xf32>
    %410 = vector.shape_cast %409 : vector<8xf32> to vector<8x1xf32>
    %411 = vector.broadcast %410 : vector<8x1xf32> to vector<8x8xf32>
    %412 = arith.subf %408, %411 : vector<8x8xf32>
    %413 = math.exp %412 : vector<8x8xf32>
    %cst_100 = arith.constant dense<0.000000e+00> : vector<8xf32>
    %414 = vector.multi_reduction <add>, %413, %cst_100 [1] : vector<8x8xf32> to vector<8xf32>
    %415 = vector.shape_cast %414 : vector<8xf32> to vector<8x1xf32>
    %416 = tpu.reciprocal %415 {approx = true} : vector<8x1xf32> -> vector<8x1xf32>
    %417 = vector.broadcast %416 : vector<8x1xf32> to vector<8x8xf32>
    %418 = arith.mulf %413, %417 : vector<8x8xf32>
    %cst_101 = arith.constant dense<0.000000e+00> : vector<8x8xf32>
    %419 = tpu.matmul %399, %406, %cst_101 {dimension_numbers = #tpu.dot_dimension_numbers<[1], [1], [0], [0], [0, 0, 1, 0], [], []>} : vector<8x4xf32>, vector<8x4xf32>, vector<8x8xf32> -> vector<8x8xf32>
    %cst_102 = arith.constant dense<0xFF800000> : vector<8xf32>
    %420 = vector.multi_reduction <maximumf>, %419, %cst_102 [1] : vector<8x8xf32> to vector<8xf32>
    %421 = vector.shape_cast %420 : vector<8xf32> to vector<8x1xf32>
    %422 = vector.broadcast %421 : vector<8x1xf32> to vector<8x8xf32>
    %423 = arith.subf %419, %422 : vector<8x8xf32>
    %424 = math.exp %423 : vector<8x8xf32>
    %cst_103 = arith.constant dense<0.000000e+00> : vector<8xf32>
    %425 = vector.multi_reduction <add>, %424, %cst_103 [1] : vector<8x8xf32> to vector<8xf32>
    %426 = vector.shape_cast %425 : vector<8xf32> to vector<8x1xf32>
    %427 = tpu.reciprocal %426 {approx = true} : vector<8x1xf32> -> vector<8x1xf32>
    %428 = vector.broadcast %427 : vector<8x1xf32> to vector<8x8xf32>
    %429 = arith.mulf %424, %428 : vector<8x8xf32>
    %430 = arith.addf %418, %429 : vector<8x8xf32>
    %cst_104 = arith.constant 5.000000e-01 : f32
    %431 = vector.broadcast %cst_104 : f32 to vector<8x8xf32>
    %432 = arith.mulf %430, %431 : vector<8x8xf32>
    %cst_105 = arith.constant dense<0.000000e+00> : vector<8x4xf32>
    %433 = tpu.matmul %432, %407, %cst_105 {dimension_numbers = #tpu.dot_dimension_numbers<[1], [0], [0], [1], [0, 0, 1, 1], [], []>} : vector<8x8xf32>, vector<8x4xf32>, vector<8x4xf32> -> vector<8x4xf32>
    %434 = arith.addf %374, %432 : vector<8x8xf32>
    %435 = vector.extract_strided_slice %11 {offsets = [0, 28], sizes = [8, 4], strides = [1, 1]} : vector<8x32xf32> to vector<8x4xf32>
    %436 = arith.mulf %435, %435 : vector<8x4xf32>
    %cst_106 = arith.constant dense<0.000000e+00> : vector<8xf32>
    %437 = vector.multi_reduction <add>, %436, %cst_106 [1] : vector<8x4xf32> to vector<8xf32>
    %438 = vector.shape_cast %437 : vector<8xf32> to vector<8x1xf32>
    %439 = math.rsqrt %438 : vector<8x1xf32>
    %440 = vector.broadcast %439 : vector<8x1xf32> to vector<8x4xf32>
    %441 = arith.mulf %435, %440 : vector<8x4xf32>
    %cst_107 = arith.constant 2.500000e+01 : f32
    %442 = vector.broadcast %cst_107 : f32 to vector<8x4xf32>
    %443 = arith.mulf %441, %442 : vector<8x4xf32>
    %444 = vector.extract_strided_slice %12 {offsets = [0, 28], sizes = [8, 4], strides = [1, 1]} : vector<8x32xf32> to vector<8x4xf32>
    %445 = arith.mulf %444, %444 : vector<8x4xf32>
    %cst_108 = arith.constant dense<0.000000e+00> : vector<8xf32>
    %446 = vector.multi_reduction <add>, %445, %cst_108 [1] : vector<8x4xf32> to vector<8xf32>
    %447 = vector.shape_cast %446 : vector<8xf32> to vector<8x1xf32>
    %448 = math.rsqrt %447 : vector<8x1xf32>
    %449 = vector.broadcast %448 : vector<8x1xf32> to vector<8x4xf32>
    %450 = arith.mulf %444, %449 : vector<8x4xf32>
    %451 = vector.extract_strided_slice %14 {offsets = [0, 28], sizes = [8, 4], strides = [1, 1]} : vector<8x32xf32> to vector<8x4xf32>
    %452 = arith.mulf %451, %451 : vector<8x4xf32>
    %cst_109 = arith.constant dense<0.000000e+00> : vector<8xf32>
    %453 = vector.multi_reduction <add>, %452, %cst_109 [1] : vector<8x4xf32> to vector<8xf32>
    %454 = vector.shape_cast %453 : vector<8xf32> to vector<8x1xf32>
    %455 = math.rsqrt %454 : vector<8x1xf32>
    %456 = vector.broadcast %455 : vector<8x1xf32> to vector<8x4xf32>
    %457 = arith.mulf %451, %456 : vector<8x4xf32>
    %cst_110 = arith.constant 2.500000e+01 : f32
    %458 = vector.broadcast %cst_110 : f32 to vector<8x4xf32>
    %459 = arith.mulf %457, %458 : vector<8x4xf32>
    %460 = vector.extract_strided_slice %15 {offsets = [0, 28], sizes = [8, 4], strides = [1, 1]} : vector<8x32xf32> to vector<8x4xf32>
    %461 = arith.mulf %460, %460 : vector<8x4xf32>
    %cst_111 = arith.constant dense<0.000000e+00> : vector<8xf32>
    %462 = vector.multi_reduction <add>, %461, %cst_111 [1] : vector<8x4xf32> to vector<8xf32>
    %463 = vector.shape_cast %462 : vector<8xf32> to vector<8x1xf32>
    %464 = math.rsqrt %463 : vector<8x1xf32>
    %465 = vector.broadcast %464 : vector<8x1xf32> to vector<8x4xf32>
    %466 = arith.mulf %460, %465 : vector<8x4xf32>
    %467 = vector.extract_strided_slice %13 {offsets = [0, 28], sizes = [8, 4], strides = [1, 1]} : vector<8x32xf32> to vector<8x4xf32>
    %cst_112 = arith.constant dense<0.000000e+00> : vector<8x8xf32>
    %468 = tpu.matmul %443, %450, %cst_112 {dimension_numbers = #tpu.dot_dimension_numbers<[1], [1], [0], [0], [0, 0, 1, 0], [], []>} : vector<8x4xf32>, vector<8x4xf32>, vector<8x8xf32> -> vector<8x8xf32>
    %cst_113 = arith.constant dense<0xFF800000> : vector<8xf32>
    %469 = vector.multi_reduction <maximumf>, %468, %cst_113 [1] : vector<8x8xf32> to vector<8xf32>
    %470 = vector.shape_cast %469 : vector<8xf32> to vector<8x1xf32>
    %471 = vector.broadcast %470 : vector<8x1xf32> to vector<8x8xf32>
    %472 = arith.subf %468, %471 : vector<8x8xf32>
    %473 = math.exp %472 : vector<8x8xf32>
    %cst_114 = arith.constant dense<0.000000e+00> : vector<8xf32>
    %474 = vector.multi_reduction <add>, %473, %cst_114 [1] : vector<8x8xf32> to vector<8xf32>
    %475 = vector.shape_cast %474 : vector<8xf32> to vector<8x1xf32>
    %476 = tpu.reciprocal %475 {approx = true} : vector<8x1xf32> -> vector<8x1xf32>
    %477 = vector.broadcast %476 : vector<8x1xf32> to vector<8x8xf32>
    %478 = arith.mulf %473, %477 : vector<8x8xf32>
    %cst_115 = arith.constant dense<0.000000e+00> : vector<8x8xf32>
    %479 = tpu.matmul %459, %466, %cst_115 {dimension_numbers = #tpu.dot_dimension_numbers<[1], [1], [0], [0], [0, 0, 1, 0], [], []>} : vector<8x4xf32>, vector<8x4xf32>, vector<8x8xf32> -> vector<8x8xf32>
    %cst_116 = arith.constant dense<0xFF800000> : vector<8xf32>
    %480 = vector.multi_reduction <maximumf>, %479, %cst_116 [1] : vector<8x8xf32> to vector<8xf32>
    %481 = vector.shape_cast %480 : vector<8xf32> to vector<8x1xf32>
    %482 = vector.broadcast %481 : vector<8x1xf32> to vector<8x8xf32>
    %483 = arith.subf %479, %482 : vector<8x8xf32>
    %484 = math.exp %483 : vector<8x8xf32>
    %cst_117 = arith.constant dense<0.000000e+00> : vector<8xf32>
    %485 = vector.multi_reduction <add>, %484, %cst_117 [1] : vector<8x8xf32> to vector<8xf32>
    %486 = vector.shape_cast %485 : vector<8xf32> to vector<8x1xf32>
    %487 = tpu.reciprocal %486 {approx = true} : vector<8x1xf32> -> vector<8x1xf32>
    %488 = vector.broadcast %487 : vector<8x1xf32> to vector<8x8xf32>
    %489 = arith.mulf %484, %488 : vector<8x8xf32>
    %490 = arith.addf %478, %489 : vector<8x8xf32>
    %cst_118 = arith.constant 5.000000e-01 : f32
    %491 = vector.broadcast %cst_118 : f32 to vector<8x8xf32>
    %492 = arith.mulf %490, %491 : vector<8x8xf32>
    %cst_119 = arith.constant dense<0.000000e+00> : vector<8x4xf32>
    %493 = tpu.matmul %492, %467, %cst_119 {dimension_numbers = #tpu.dot_dimension_numbers<[1], [0], [0], [1], [0, 0, 1, 1], [], []>} : vector<8x8xf32>, vector<8x4xf32>, vector<8x4xf32> -> vector<8x4xf32>
    %494 = arith.addf %434, %492 : vector<8x8xf32>
    %495 = tpu.concatenate %74, %133, %193, %253, %313, %373, %433, %493 in 1 : vector<8x4xf32>, vector<8x4xf32>, vector<8x4xf32>, vector<8x4xf32>, vector<8x4xf32>, vector<8x4xf32>, vector<8x4xf32>, vector<8x4xf32> -> vector<8x32xf32>
    %496 = tpu.concatenate %495, %13 in 1 : vector<8x32xf32>, vector<8x32xf32> -> vector<8x64xf32>
    %c0_120 = arith.constant 0 : index
    %c0_121 = arith.constant 0 : index
    %c0_122 = arith.constant 0 : index
    %497 = vector.load %arg4[%c0_120, %c0_121, %c0_122] : memref<2x8x64xf32, #tpu.memory_space<vmem>>, vector<1x8x64xf32>
    %498 = vector.shape_cast %497 : vector<1x8x64xf32> to vector<8x64xf32>
    %499 = vector.shape_cast %496 : vector<8x64xf32> to vector<1x8x64xf32>
    tpu.vector_store %arg4[%c0_120, %c0_121, %c0_122], %499 {strides = array<i32>} : memref<2x8x64xf32, #tpu.memory_space<vmem>>, vector<1x8x64xf32>,
    %500 = vector.extract_strided_slice %13 {offsets = [0, 0], sizes = [8, 4], strides = [1, 1]} : vector<8x32xf32> to vector<8x4xf32>
    %501 = arith.mulf %500, %500 : vector<8x4xf32>
    %cst_123 = arith.constant dense<0.000000e+00> : vector<8xf32>
    %502 = vector.multi_reduction <add>, %501, %cst_123 [1] : vector<8x4xf32> to vector<8xf32>
    %503 = vector.shape_cast %502 : vector<8xf32> to vector<8x1xf32>
    %504 = math.rsqrt %503 : vector<8x1xf32>
    %505 = vector.broadcast %504 : vector<8x1xf32> to vector<8x4xf32>
    %506 = arith.mulf %500, %505 : vector<8x4xf32>
    %cst_124 = arith.constant dense<0.000000e+00> : vector<8x8xf32>
    %507 = tpu.matmul %506, %506, %cst_124 {dimension_numbers = #tpu.dot_dimension_numbers<[1], [1], [0], [0], [0, 0, 1, 0], [], []>} : vector<8x4xf32>, vector<8x4xf32>, vector<8x8xf32> -> vector<8x8xf32>
    %508 = vector.extract_strided_slice %13 {offsets = [0, 4], sizes = [8, 4], strides = [1, 1]} : vector<8x32xf32> to vector<8x4xf32>
    %509 = arith.mulf %508, %508 : vector<8x4xf32>
    %cst_125 = arith.constant dense<0.000000e+00> : vector<8xf32>
    %510 = vector.multi_reduction <add>, %509, %cst_125 [1] : vector<8x4xf32> to vector<8xf32>
    %511 = vector.shape_cast %510 : vector<8xf32> to vector<8x1xf32>
    %512 = math.rsqrt %511 : vector<8x1xf32>
    %513 = vector.broadcast %512 : vector<8x1xf32> to vector<8x4xf32>
    %514 = arith.mulf %508, %513 : vector<8x4xf32>
    %cst_126 = arith.constant dense<0.000000e+00> : vector<8x8xf32>
    %515 = tpu.matmul %514, %514, %cst_126 {dimension_numbers = #tpu.dot_dimension_numbers<[1], [1], [0], [0], [0, 0, 1, 0], [], []>} : vector<8x4xf32>, vector<8x4xf32>, vector<8x8xf32> -> vector<8x8xf32>
    %516 = arith.addf %507, %515 : vector<8x8xf32>
    %517 = vector.extract_strided_slice %13 {offsets = [0, 8], sizes = [8, 4], strides = [1, 1]} : vector<8x32xf32> to vector<8x4xf32>
    %518 = arith.mulf %517, %517 : vector<8x4xf32>
    %cst_127 = arith.constant dense<0.000000e+00> : vector<8xf32>
    %519 = vector.multi_reduction <add>, %518, %cst_127 [1] : vector<8x4xf32> to vector<8xf32>
    %520 = vector.shape_cast %519 : vector<8xf32> to vector<8x1xf32>
    %521 = math.rsqrt %520 : vector<8x1xf32>
    %522 = vector.broadcast %521 : vector<8x1xf32> to vector<8x4xf32>
    %523 = arith.mulf %517, %522 : vector<8x4xf32>
    %cst_128 = arith.constant dense<0.000000e+00> : vector<8x8xf32>
    %524 = tpu.matmul %523, %523, %cst_128 {dimension_numbers = #tpu.dot_dimension_numbers<[1], [1], [0], [0], [0, 0, 1, 0], [], []>} : vector<8x4xf32>, vector<8x4xf32>, vector<8x8xf32> -> vector<8x8xf32>
    %525 = arith.addf %516, %524 : vector<8x8xf32>
    %526 = vector.extract_strided_slice %13 {offsets = [0, 12], sizes = [8, 4], strides = [1, 1]} : vector<8x32xf32> to vector<8x4xf32>
    %527 = arith.mulf %526, %526 : vector<8x4xf32>
    %cst_129 = arith.constant dense<0.000000e+00> : vector<8xf32>
    %528 = vector.multi_reduction <add>, %527, %cst_129 [1] : vector<8x4xf32> to vector<8xf32>
    %529 = vector.shape_cast %528 : vector<8xf32> to vector<8x1xf32>
    %530 = math.rsqrt %529 : vector<8x1xf32>
    %531 = vector.broadcast %530 : vector<8x1xf32> to vector<8x4xf32>
    %532 = arith.mulf %526, %531 : vector<8x4xf32>
    %cst_130 = arith.constant dense<0.000000e+00> : vector<8x8xf32>
    %533 = tpu.matmul %532, %532, %cst_130 {dimension_numbers = #tpu.dot_dimension_numbers<[1], [1], [0], [0], [0, 0, 1, 0], [], []>} : vector<8x4xf32>, vector<8x4xf32>, vector<8x8xf32> -> vector<8x8xf32>
    %534 = arith.addf %525, %533 : vector<8x8xf32>
    %535 = vector.extract_strided_slice %13 {offsets = [0, 16], sizes = [8, 4], strides = [1, 1]} : vector<8x32xf32> to vector<8x4xf32>
    %536 = arith.mulf %535, %535 : vector<8x4xf32>
    %cst_131 = arith.constant dense<0.000000e+00> : vector<8xf32>
    %537 = vector.multi_reduction <add>, %536, %cst_131 [1] : vector<8x4xf32> to vector<8xf32>
    %538 = vector.shape_cast %537 : vector<8xf32> to vector<8x1xf32>
    %539 = math.rsqrt %538 : vector<8x1xf32>
    %540 = vector.broadcast %539 : vector<8x1xf32> to vector<8x4xf32>
    %541 = arith.mulf %535, %540 : vector<8x4xf32>
    %cst_132 = arith.constant dense<0.000000e+00> : vector<8x8xf32>
    %542 = tpu.matmul %541, %541, %cst_132 {dimension_numbers = #tpu.dot_dimension_numbers<[1], [1], [0], [0], [0, 0, 1, 0], [], []>} : vector<8x4xf32>, vector<8x4xf32>, vector<8x8xf32> -> vector<8x8xf32>
    %543 = arith.addf %534, %542 : vector<8x8xf32>
    %544 = vector.extract_strided_slice %13 {offsets = [0, 20], sizes = [8, 4], strides = [1, 1]} : vector<8x32xf32> to vector<8x4xf32>
    %545 = arith.mulf %544, %544 : vector<8x4xf32>
    %cst_133 = arith.constant dense<0.000000e+00> : vector<8xf32>
    %546 = vector.multi_reduction <add>, %545, %cst_133 [1] : vector<8x4xf32> to vector<8xf32>
    %547 = vector.shape_cast %546 : vector<8xf32> to vector<8x1xf32>
    %548 = math.rsqrt %547 : vector<8x1xf32>
    %549 = vector.broadcast %548 : vector<8x1xf32> to vector<8x4xf32>
    %550 = arith.mulf %544, %549 : vector<8x4xf32>
    %cst_134 = arith.constant dense<0.000000e+00> : vector<8x8xf32>
    %551 = tpu.matmul %550, %550, %cst_134 {dimension_numbers = #tpu.dot_dimension_numbers<[1], [1], [0], [0], [0, 0, 1, 0], [], []>} : vector<8x4xf32>, vector<8x4xf32>, vector<8x8xf32> -> vector<8x8xf32>
    %552 = arith.addf %543, %551 : vector<8x8xf32>
    %553 = vector.extract_strided_slice %13 {offsets = [0, 24], sizes = [8, 4], strides = [1, 1]} : vector<8x32xf32> to vector<8x4xf32>
    %554 = arith.mulf %553, %553 : vector<8x4xf32>
    %cst_135 = arith.constant dense<0.000000e+00> : vector<8xf32>
    %555 = vector.multi_reduction <add>, %554, %cst_135 [1] : vector<8x4xf32> to vector<8xf32>
    %556 = vector.shape_cast %555 : vector<8xf32> to vector<8x1xf32>
    %557 = math.rsqrt %556 : vector<8x1xf32>
    %558 = vector.broadcast %557 : vector<8x1xf32> to vector<8x4xf32>
    %559 = arith.mulf %553, %558 : vector<8x4xf32>
    %cst_136 = arith.constant dense<0.000000e+00> : vector<8x8xf32>
    %560 = tpu.matmul %559, %559, %cst_136 {dimension_numbers = #tpu.dot_dimension_numbers<[1], [1], [0], [0], [0, 0, 1, 0], [], []>} : vector<8x4xf32>, vector<8x4xf32>, vector<8x8xf32> -> vector<8x8xf32>
    %561 = arith.addf %552, %560 : vector<8x8xf32>
    %562 = vector.extract_strided_slice %13 {offsets = [0, 28], sizes = [8, 4], strides = [1, 1]} : vector<8x32xf32> to vector<8x4xf32>
    %563 = arith.mulf %562, %562 : vector<8x4xf32>
    %cst_137 = arith.constant dense<0.000000e+00> : vector<8xf32>
    %564 = vector.multi_reduction <add>, %563, %cst_137 [1] : vector<8x4xf32> to vector<8xf32>
    %565 = vector.shape_cast %564 : vector<8xf32> to vector<8x1xf32>
    %566 = math.rsqrt %565 : vector<8x1xf32>
    %567 = vector.broadcast %566 : vector<8x1xf32> to vector<8x4xf32>
    %568 = arith.mulf %562, %567 : vector<8x4xf32>
    %cst_138 = arith.constant dense<0.000000e+00> : vector<8x8xf32>
    %569 = tpu.matmul %568, %568, %cst_138 {dimension_numbers = #tpu.dot_dimension_numbers<[1], [1], [0], [0], [0, 0, 1, 0], [], []>} : vector<8x4xf32>, vector<8x4xf32>, vector<8x8xf32> -> vector<8x8xf32>
    %570 = arith.addf %561, %569 : vector<8x8xf32>
    %cst_139 = arith.constant 1.250000e-01 : f32
    %571 = vector.broadcast %cst_139 : f32 to vector<8x8xf32>
    %572 = arith.mulf %570, %571 : vector<8x8xf32>
    %cst_140 = arith.constant 7.500000e-01 : f32
    %573 = vector.broadcast %cst_140 : f32 to vector<8x8xf32>
    %574 = arith.cmpf ogt, %572, %573 : vector<8x8xf32>
    %cst_141 = arith.constant 1.000000e+00 : f32
    %cst_142 = arith.constant 0.000000e+00 : f32
    %575 = vector.broadcast %cst_141 : f32 to vector<8x8xf32>
    %576 = vector.broadcast %cst_142 : f32 to vector<8x8xf32>
    %577 = arith.select %574, %575, %576 : vector<8x8xi1>, vector<8x8xf32>
    %cst_143 = arith.constant 1.250000e-01 : f32
    %578 = vector.broadcast %cst_143 : f32 to vector<8x8xf32>
    %579 = arith.mulf %494, %578 : vector<8x8xf32>
    %cst_144 = arith.constant dense<0xFF800000> : vector<8xf32>
    %580 = vector.multi_reduction <maximumf>, %579, %cst_144 [1] : vector<8x8xf32> to vector<8xf32>
    %581 = vector.shape_cast %580 : vector<8xf32> to vector<8x1xf32>
    %582 = vector.broadcast %581 : vector<8x1xf32> to vector<8x8xf32>
    %583 = arith.subf %579, %582 : vector<8x8xf32>
    %584 = math.exp %583 : vector<8x8xf32>
    %cst_145 = arith.constant dense<0.000000e+00> : vector<8xf32>
    %585 = vector.multi_reduction <add>, %584, %cst_145 [1] : vector<8x8xf32> to vector<8xf32>
    %586 = vector.shape_cast %585 : vector<8xf32> to vector<8x1xf32>
    %587 = tpu.reciprocal %586 {approx = true} : vector<8x1xf32> -> vector<8x1xf32>
    %588 = vector.broadcast %587 : vector<8x1xf32> to vector<8x8xf32>
    %589 = arith.mulf %584, %588 : vector<8x8xf32>
    %590 = arith.mulf %577, %589 : vector<8x8xf32>
    %cst_146 = arith.constant dense<0.000000e+00> : vector<8xf32>
    %591 = vector.multi_reduction <add>, %590, %cst_146 [1] : vector<8x8xf32> to vector<8xf32>
    %592 = vector.shape_cast %591 : vector<8xf32> to vector<8x1xf32>
    %593 = tpu.reciprocal %592 {approx = true} : vector<8x1xf32> -> vector<8x1xf32>
    %594 = vector.broadcast %593 : vector<8x1xf32> to vector<8x8xf32>
    %595 = arith.mulf %590, %594 : vector<8x8xf32>
    %c0_147 = arith.constant 0 : index
    %c0_148 = arith.constant 0 : index
    %596 = vector.load %arg5[%c0_147, %c0_148] : memref<8x8xf32, #tpu.memory_space<vmem>>, vector<8x8xf32>
    tpu.vector_store %arg5[%c0_147, %c0_148], %595 {strides = array<i32>} : memref<8x8xf32, #tpu.memory_space<vmem>>, vector<8x8xf32>,
    %597 = vector.extract_strided_slice %6 {offsets = [8, 0], sizes = [8, 32], strides = [1, 1]} : vector<16x32xf32> to vector<8x32xf32>
    %598 = vector.extract_strided_slice %7 {offsets = [8, 0], sizes = [8, 32], strides = [1, 1]} : vector<16x32xf32> to vector<8x32xf32>
    %599 = vector.extract_strided_slice %8 {offsets = [8, 0], sizes = [8, 32], strides = [1, 1]} : vector<16x32xf32> to vector<8x32xf32>
    %600 = vector.extract_strided_slice %9 {offsets = [8, 0], sizes = [8, 32], strides = [1, 1]} : vector<16x32xf32> to vector<8x32xf32>
    %601 = vector.extract_strided_slice %10 {offsets = [8, 0], sizes = [8, 32], strides = [1, 1]} : vector<16x32xf32> to vector<8x32xf32>
    %602 = vector.extract_strided_slice %597 {offsets = [0, 0], sizes = [8, 4], strides = [1, 1]} : vector<8x32xf32> to vector<8x4xf32>
    %603 = arith.mulf %602, %602 : vector<8x4xf32>
    %cst_149 = arith.constant dense<0.000000e+00> : vector<8xf32>
    %604 = vector.multi_reduction <add>, %603, %cst_149 [1] : vector<8x4xf32> to vector<8xf32>
    %605 = vector.shape_cast %604 : vector<8xf32> to vector<8x1xf32>
    %606 = math.rsqrt %605 : vector<8x1xf32>
    %607 = vector.broadcast %606 : vector<8x1xf32> to vector<8x4xf32>
    %608 = arith.mulf %602, %607 : vector<8x4xf32>
    %cst_150 = arith.constant 2.500000e+01 : f32
    %609 = vector.broadcast %cst_150 : f32 to vector<8x4xf32>
    %610 = arith.mulf %608, %609 : vector<8x4xf32>
    %611 = vector.extract_strided_slice %598 {offsets = [0, 0], sizes = [8, 4], strides = [1, 1]} : vector<8x32xf32> to vector<8x4xf32>
    %612 = arith.mulf %611, %611 : vector<8x4xf32>
    %cst_151 = arith.constant dense<0.000000e+00> : vector<8xf32>
    %613 = vector.multi_reduction <add>, %612, %cst_151 [1] : vector<8x4xf32> to vector<8xf32>
    %614 = vector.shape_cast %613 : vector<8xf32> to vector<8x1xf32>
    %615 = math.rsqrt %614 : vector<8x1xf32>
    %616 = vector.broadcast %615 : vector<8x1xf32> to vector<8x4xf32>
    %617 = arith.mulf %611, %616 : vector<8x4xf32>
    %618 = vector.extract_strided_slice %600 {offsets = [0, 0], sizes = [8, 4], strides = [1, 1]} : vector<8x32xf32> to vector<8x4xf32>
    %619 = arith.mulf %618, %618 : vector<8x4xf32>
    %cst_152 = arith.constant dense<0.000000e+00> : vector<8xf32>
    %620 = vector.multi_reduction <add>, %619, %cst_152 [1] : vector<8x4xf32> to vector<8xf32>
    %621 = vector.shape_cast %620 : vector<8xf32> to vector<8x1xf32>
    %622 = math.rsqrt %621 : vector<8x1xf32>
    %623 = vector.broadcast %622 : vector<8x1xf32> to vector<8x4xf32>
    %624 = arith.mulf %618, %623 : vector<8x4xf32>
    %cst_153 = arith.constant 2.500000e+01 : f32
    %625 = vector.broadcast %cst_153 : f32 to vector<8x4xf32>
    %626 = arith.mulf %624, %625 : vector<8x4xf32>
    %627 = vector.extract_strided_slice %601 {offsets = [0, 0], sizes = [8, 4], strides = [1, 1]} : vector<8x32xf32> to vector<8x4xf32>
    %628 = arith.mulf %627, %627 : vector<8x4xf32>
    %cst_154 = arith.constant dense<0.000000e+00> : vector<8xf32>
    %629 = vector.multi_reduction <add>, %628, %cst_154 [1] : vector<8x4xf32> to vector<8xf32>
    %630 = vector.shape_cast %629 : vector<8xf32> to vector<8x1xf32>
    %631 = math.rsqrt %630 : vector<8x1xf32>
    %632 = vector.broadcast %631 : vector<8x1xf32> to vector<8x4xf32>
    %633 = arith.mulf %627, %632 : vector<8x4xf32>
    %634 = vector.extract_strided_slice %599 {offsets = [0, 0], sizes = [8, 4], strides = [1, 1]} : vector<8x32xf32> to vector<8x4xf32>
    %cst_155 = arith.constant dense<0.000000e+00> : vector<8x8xf32>
    %635 = tpu.matmul %610, %617, %cst_155 {dimension_numbers = #tpu.dot_dimension_numbers<[1], [1], [0], [0], [0, 0, 1, 0], [], []>} : vector<8x4xf32>, vector<8x4xf32>, vector<8x8xf32> -> vector<8x8xf32>
    %cst_156 = arith.constant dense<0xFF800000> : vector<8xf32>
    %636 = vector.multi_reduction <maximumf>, %635, %cst_156 [1] : vector<8x8xf32> to vector<8xf32>
    %637 = vector.shape_cast %636 : vector<8xf32> to vector<8x1xf32>
    %638 = vector.broadcast %637 : vector<8x1xf32> to vector<8x8xf32>
    %639 = arith.subf %635, %638 : vector<8x8xf32>
    %640 = math.exp %639 : vector<8x8xf32>
    %cst_157 = arith.constant dense<0.000000e+00> : vector<8xf32>
    %641 = vector.multi_reduction <add>, %640, %cst_157 [1] : vector<8x8xf32> to vector<8xf32>
    %642 = vector.shape_cast %641 : vector<8xf32> to vector<8x1xf32>
    %643 = tpu.reciprocal %642 {approx = true} : vector<8x1xf32> -> vector<8x1xf32>
    %644 = vector.broadcast %643 : vector<8x1xf32> to vector<8x8xf32>
    %645 = arith.mulf %640, %644 : vector<8x8xf32>
    %cst_158 = arith.constant dense<0.000000e+00> : vector<8x8xf32>
    %646 = tpu.matmul %626, %633, %cst_158 {dimension_numbers = #tpu.dot_dimension_numbers<[1], [1], [0], [0], [0, 0, 1, 0], [], []>} : vector<8x4xf32>, vector<8x4xf32>, vector<8x8xf32> -> vector<8x8xf32>
    %cst_159 = arith.constant dense<0xFF800000> : vector<8xf32>
    %647 = vector.multi_reduction <maximumf>, %646, %cst_159 [1] : vector<8x8xf32> to vector<8xf32>
    %648 = vector.shape_cast %647 : vector<8xf32> to vector<8x1xf32>
    %649 = vector.broadcast %648 : vector<8x1xf32> to vector<8x8xf32>
    %650 = arith.subf %646, %649 : vector<8x8xf32>
    %651 = math.exp %650 : vector<8x8xf32>
    %cst_160 = arith.constant dense<0.000000e+00> : vector<8xf32>
    %652 = vector.multi_reduction <add>, %651, %cst_160 [1] : vector<8x8xf32> to vector<8xf32>
    %653 = vector.shape_cast %652 : vector<8xf32> to vector<8x1xf32>
    %654 = tpu.reciprocal %653 {approx = true} : vector<8x1xf32> -> vector<8x1xf32>
    %655 = vector.broadcast %654 : vector<8x1xf32> to vector<8x8xf32>
    %656 = arith.mulf %651, %655 : vector<8x8xf32>
    %657 = arith.addf %645, %656 : vector<8x8xf32>
    %cst_161 = arith.constant 5.000000e-01 : f32
    %658 = vector.broadcast %cst_161 : f32 to vector<8x8xf32>
    %659 = arith.mulf %657, %658 : vector<8x8xf32>
    %cst_162 = arith.constant dense<0.000000e+00> : vector<8x4xf32>
    %660 = tpu.matmul %659, %634, %cst_162 {dimension_numbers = #tpu.dot_dimension_numbers<[1], [0], [0], [1], [0, 0, 1, 1], [], []>} : vector<8x8xf32>, vector<8x4xf32>, vector<8x4xf32> -> vector<8x4xf32>
    %661 = vector.extract_strided_slice %597 {offsets = [0, 4], sizes = [8, 4], strides = [1, 1]} : vector<8x32xf32> to vector<8x4xf32>
    %662 = arith.mulf %661, %661 : vector<8x4xf32>
    %cst_163 = arith.constant dense<0.000000e+00> : vector<8xf32>
    %663 = vector.multi_reduction <add>, %662, %cst_163 [1] : vector<8x4xf32> to vector<8xf32>
    %664 = vector.shape_cast %663 : vector<8xf32> to vector<8x1xf32>
    %665 = math.rsqrt %664 : vector<8x1xf32>
    %666 = vector.broadcast %665 : vector<8x1xf32> to vector<8x4xf32>
    %667 = arith.mulf %661, %666 : vector<8x4xf32>
    %cst_164 = arith.constant 2.500000e+01 : f32
    %668 = vector.broadcast %cst_164 : f32 to vector<8x4xf32>
    %669 = arith.mulf %667, %668 : vector<8x4xf32>
    %670 = vector.extract_strided_slice %598 {offsets = [0, 4], sizes = [8, 4], strides = [1, 1]} : vector<8x32xf32> to vector<8x4xf32>
    %671 = arith.mulf %670, %670 : vector<8x4xf32>
    %cst_165 = arith.constant dense<0.000000e+00> : vector<8xf32>
    %672 = vector.multi_reduction <add>, %671, %cst_165 [1] : vector<8x4xf32> to vector<8xf32>
    %673 = vector.shape_cast %672 : vector<8xf32> to vector<8x1xf32>
    %674 = math.rsqrt %673 : vector<8x1xf32>
    %675 = vector.broadcast %674 : vector<8x1xf32> to vector<8x4xf32>
    %676 = arith.mulf %670, %675 : vector<8x4xf32>
    %677 = vector.extract_strided_slice %600 {offsets = [0, 4], sizes = [8, 4], strides = [1, 1]} : vector<8x32xf32> to vector<8x4xf32>
    %678 = arith.mulf %677, %677 : vector<8x4xf32>
    %cst_166 = arith.constant dense<0.000000e+00> : vector<8xf32>
    %679 = vector.multi_reduction <add>, %678, %cst_166 [1] : vector<8x4xf32> to vector<8xf32>
    %680 = vector.shape_cast %679 : vector<8xf32> to vector<8x1xf32>
    %681 = math.rsqrt %680 : vector<8x1xf32>
    %682 = vector.broadcast %681 : vector<8x1xf32> to vector<8x4xf32>
    %683 = arith.mulf %677, %682 : vector<8x4xf32>
    %cst_167 = arith.constant 2.500000e+01 : f32
    %684 = vector.broadcast %cst_167 : f32 to vector<8x4xf32>
    %685 = arith.mulf %683, %684 : vector<8x4xf32>
    %686 = vector.extract_strided_slice %601 {offsets = [0, 4], sizes = [8, 4], strides = [1, 1]} : vector<8x32xf32> to vector<8x4xf32>
    %687 = arith.mulf %686, %686 : vector<8x4xf32>
    %cst_168 = arith.constant dense<0.000000e+00> : vector<8xf32>
    %688 = vector.multi_reduction <add>, %687, %cst_168 [1] : vector<8x4xf32> to vector<8xf32>
    %689 = vector.shape_cast %688 : vector<8xf32> to vector<8x1xf32>
    %690 = math.rsqrt %689 : vector<8x1xf32>
    %691 = vector.broadcast %690 : vector<8x1xf32> to vector<8x4xf32>
    %692 = arith.mulf %686, %691 : vector<8x4xf32>
    %693 = vector.extract_strided_slice %599 {offsets = [0, 4], sizes = [8, 4], strides = [1, 1]} : vector<8x32xf32> to vector<8x4xf32>
    %cst_169 = arith.constant dense<0.000000e+00> : vector<8x8xf32>
    %694 = tpu.matmul %669, %676, %cst_169 {dimension_numbers = #tpu.dot_dimension_numbers<[1], [1], [0], [0], [0, 0, 1, 0], [], []>} : vector<8x4xf32>, vector<8x4xf32>, vector<8x8xf32> -> vector<8x8xf32>
    %cst_170 = arith.constant dense<0xFF800000> : vector<8xf32>
    %695 = vector.multi_reduction <maximumf>, %694, %cst_170 [1] : vector<8x8xf32> to vector<8xf32>
    %696 = vector.shape_cast %695 : vector<8xf32> to vector<8x1xf32>
    %697 = vector.broadcast %696 : vector<8x1xf32> to vector<8x8xf32>
    %698 = arith.subf %694, %697 : vector<8x8xf32>
    %699 = math.exp %698 : vector<8x8xf32>
    %cst_171 = arith.constant dense<0.000000e+00> : vector<8xf32>
    %700 = vector.multi_reduction <add>, %699, %cst_171 [1] : vector<8x8xf32> to vector<8xf32>
    %701 = vector.shape_cast %700 : vector<8xf32> to vector<8x1xf32>
    %702 = tpu.reciprocal %701 {approx = true} : vector<8x1xf32> -> vector<8x1xf32>
    %703 = vector.broadcast %702 : vector<8x1xf32> to vector<8x8xf32>
    %704 = arith.mulf %699, %703 : vector<8x8xf32>
    %cst_172 = arith.constant dense<0.000000e+00> : vector<8x8xf32>
    %705 = tpu.matmul %685, %692, %cst_172 {dimension_numbers = #tpu.dot_dimension_numbers<[1], [1], [0], [0], [0, 0, 1, 0], [], []>} : vector<8x4xf32>, vector<8x4xf32>, vector<8x8xf32> -> vector<8x8xf32>
    %cst_173 = arith.constant dense<0xFF800000> : vector<8xf32>
    %706 = vector.multi_reduction <maximumf>, %705, %cst_173 [1] : vector<8x8xf32> to vector<8xf32>
    %707 = vector.shape_cast %706 : vector<8xf32> to vector<8x1xf32>
    %708 = vector.broadcast %707 : vector<8x1xf32> to vector<8x8xf32>
    %709 = arith.subf %705, %708 : vector<8x8xf32>
    %710 = math.exp %709 : vector<8x8xf32>
    %cst_174 = arith.constant dense<0.000000e+00> : vector<8xf32>
    %711 = vector.multi_reduction <add>, %710, %cst_174 [1] : vector<8x8xf32> to vector<8xf32>
    %712 = vector.shape_cast %711 : vector<8xf32> to vector<8x1xf32>
    %713 = tpu.reciprocal %712 {approx = true} : vector<8x1xf32> -> vector<8x1xf32>
    %714 = vector.broadcast %713 : vector<8x1xf32> to vector<8x8xf32>
    %715 = arith.mulf %710, %714 : vector<8x8xf32>
    %716 = arith.addf %704, %715 : vector<8x8xf32>
    %cst_175 = arith.constant 5.000000e-01 : f32
    %717 = vector.broadcast %cst_175 : f32 to vector<8x8xf32>
    %718 = arith.mulf %716, %717 : vector<8x8xf32>
    %cst_176 = arith.constant dense<0.000000e+00> : vector<8x4xf32>
    %719 = tpu.matmul %718, %693, %cst_176 {dimension_numbers = #tpu.dot_dimension_numbers<[1], [0], [0], [1], [0, 0, 1, 1], [], []>} : vector<8x8xf32>, vector<8x4xf32>, vector<8x4xf32> -> vector<8x4xf32>
    %720 = vector.extract_strided_slice %597 {offsets = [0, 8], sizes = [8, 4], strides = [1, 1]} : vector<8x32xf32> to vector<8x4xf32>
    %721 = arith.mulf %720, %720 : vector<8x4xf32>
    %cst_177 = arith.constant dense<0.000000e+00> : vector<8xf32>
    %722 = vector.multi_reduction <add>, %721, %cst_177 [1] : vector<8x4xf32> to vector<8xf32>
    %723 = vector.shape_cast %722 : vector<8xf32> to vector<8x1xf32>
    %724 = math.rsqrt %723 : vector<8x1xf32>
    %725 = vector.broadcast %724 : vector<8x1xf32> to vector<8x4xf32>
    %726 = arith.mulf %720, %725 : vector<8x4xf32>
    %cst_178 = arith.constant 2.500000e+01 : f32
    %727 = vector.broadcast %cst_178 : f32 to vector<8x4xf32>
    %728 = arith.mulf %726, %727 : vector<8x4xf32>
    %729 = vector.extract_strided_slice %598 {offsets = [0, 8], sizes = [8, 4], strides = [1, 1]} : vector<8x32xf32> to vector<8x4xf32>
    %730 = arith.mulf %729, %729 : vector<8x4xf32>
    %cst_179 = arith.constant dense<0.000000e+00> : vector<8xf32>
    %731 = vector.multi_reduction <add>, %730, %cst_179 [1] : vector<8x4xf32> to vector<8xf32>
    %732 = vector.shape_cast %731 : vector<8xf32> to vector<8x1xf32>
    %733 = math.rsqrt %732 : vector<8x1xf32>
    %734 = vector.broadcast %733 : vector<8x1xf32> to vector<8x4xf32>
    %735 = arith.mulf %729, %734 : vector<8x4xf32>
    %736 = vector.extract_strided_slice %600 {offsets = [0, 8], sizes = [8, 4], strides = [1, 1]} : vector<8x32xf32> to vector<8x4xf32>
    %737 = arith.mulf %736, %736 : vector<8x4xf32>
    %cst_180 = arith.constant dense<0.000000e+00> : vector<8xf32>
    %738 = vector.multi_reduction <add>, %737, %cst_180 [1] : vector<8x4xf32> to vector<8xf32>
    %739 = vector.shape_cast %738 : vector<8xf32> to vector<8x1xf32>
    %740 = math.rsqrt %739 : vector<8x1xf32>
    %741 = vector.broadcast %740 : vector<8x1xf32> to vector<8x4xf32>
    %742 = arith.mulf %736, %741 : vector<8x4xf32>
    %cst_181 = arith.constant 2.500000e+01 : f32
    %743 = vector.broadcast %cst_181 : f32 to vector<8x4xf32>
    %744 = arith.mulf %742, %743 : vector<8x4xf32>
    %745 = vector.extract_strided_slice %601 {offsets = [0, 8], sizes = [8, 4], strides = [1, 1]} : vector<8x32xf32> to vector<8x4xf32>
    %746 = arith.mulf %745, %745 : vector<8x4xf32>
    %cst_182 = arith.constant dense<0.000000e+00> : vector<8xf32>
    %747 = vector.multi_reduction <add>, %746, %cst_182 [1] : vector<8x4xf32> to vector<8xf32>
    %748 = vector.shape_cast %747 : vector<8xf32> to vector<8x1xf32>
    %749 = math.rsqrt %748 : vector<8x1xf32>
    %750 = vector.broadcast %749 : vector<8x1xf32> to vector<8x4xf32>
    %751 = arith.mulf %745, %750 : vector<8x4xf32>
    %752 = vector.extract_strided_slice %599 {offsets = [0, 8], sizes = [8, 4], strides = [1, 1]} : vector<8x32xf32> to vector<8x4xf32>
    %cst_183 = arith.constant dense<0.000000e+00> : vector<8x8xf32>
    %753 = tpu.matmul %728, %735, %cst_183 {dimension_numbers = #tpu.dot_dimension_numbers<[1], [1], [0], [0], [0, 0, 1, 0], [], []>} : vector<8x4xf32>, vector<8x4xf32>, vector<8x8xf32> -> vector<8x8xf32>
    %cst_184 = arith.constant dense<0xFF800000> : vector<8xf32>
    %754 = vector.multi_reduction <maximumf>, %753, %cst_184 [1] : vector<8x8xf32> to vector<8xf32>
    %755 = vector.shape_cast %754 : vector<8xf32> to vector<8x1xf32>
    %756 = vector.broadcast %755 : vector<8x1xf32> to vector<8x8xf32>
    %757 = arith.subf %753, %756 : vector<8x8xf32>
    %758 = math.exp %757 : vector<8x8xf32>
    %cst_185 = arith.constant dense<0.000000e+00> : vector<8xf32>
    %759 = vector.multi_reduction <add>, %758, %cst_185 [1] : vector<8x8xf32> to vector<8xf32>
    %760 = vector.shape_cast %759 : vector<8xf32> to vector<8x1xf32>
    %761 = tpu.reciprocal %760 {approx = true} : vector<8x1xf32> -> vector<8x1xf32>
    %762 = vector.broadcast %761 : vector<8x1xf32> to vector<8x8xf32>
    %763 = arith.mulf %758, %762 : vector<8x8xf32>
    %cst_186 = arith.constant dense<0.000000e+00> : vector<8x8xf32>
    %764 = tpu.matmul %744, %751, %cst_186 {dimension_numbers = #tpu.dot_dimension_numbers<[1], [1], [0], [0], [0, 0, 1, 0], [], []>} : vector<8x4xf32>, vector<8x4xf32>, vector<8x8xf32> -> vector<8x8xf32>
    %cst_187 = arith.constant dense<0xFF800000> : vector<8xf32>
    %765 = vector.multi_reduction <maximumf>, %764, %cst_187 [1] : vector<8x8xf32> to vector<8xf32>
    %766 = vector.shape_cast %765 : vector<8xf32> to vector<8x1xf32>
    %767 = vector.broadcast %766 : vector<8x1xf32> to vector<8x8xf32>
    %768 = arith.subf %764, %767 : vector<8x8xf32>
    %769 = math.exp %768 : vector<8x8xf32>
    %cst_188 = arith.constant dense<0.000000e+00> : vector<8xf32>
    %770 = vector.multi_reduction <add>, %769, %cst_188 [1] : vector<8x8xf32> to vector<8xf32>
    %771 = vector.shape_cast %770 : vector<8xf32> to vector<8x1xf32>
    %772 = tpu.reciprocal %771 {approx = true} : vector<8x1xf32> -> vector<8x1xf32>
    %773 = vector.broadcast %772 : vector<8x1xf32> to vector<8x8xf32>
    %774 = arith.mulf %769, %773 : vector<8x8xf32>
    %775 = arith.addf %763, %774 : vector<8x8xf32>
    %cst_189 = arith.constant 5.000000e-01 : f32
    %776 = vector.broadcast %cst_189 : f32 to vector<8x8xf32>
    %777 = arith.mulf %775, %776 : vector<8x8xf32>
    %cst_190 = arith.constant dense<0.000000e+00> : vector<8x4xf32>
    %778 = tpu.matmul %777, %752, %cst_190 {dimension_numbers = #tpu.dot_dimension_numbers<[1], [0], [0], [1], [0, 0, 1, 1], [], []>} : vector<8x8xf32>, vector<8x4xf32>, vector<8x4xf32> -> vector<8x4xf32>
    %779 = vector.extract_strided_slice %597 {offsets = [0, 12], sizes = [8, 4], strides = [1, 1]} : vector<8x32xf32> to vector<8x4xf32>
    %780 = arith.mulf %779, %779 : vector<8x4xf32>
    %cst_191 = arith.constant dense<0.000000e+00> : vector<8xf32>
    %781 = vector.multi_reduction <add>, %780, %cst_191 [1] : vector<8x4xf32> to vector<8xf32>
    %782 = vector.shape_cast %781 : vector<8xf32> to vector<8x1xf32>
    %783 = math.rsqrt %782 : vector<8x1xf32>
    %784 = vector.broadcast %783 : vector<8x1xf32> to vector<8x4xf32>
    %785 = arith.mulf %779, %784 : vector<8x4xf32>
    %cst_192 = arith.constant 2.500000e+01 : f32
    %786 = vector.broadcast %cst_192 : f32 to vector<8x4xf32>
    %787 = arith.mulf %785, %786 : vector<8x4xf32>
    %788 = vector.extract_strided_slice %598 {offsets = [0, 12], sizes = [8, 4], strides = [1, 1]} : vector<8x32xf32> to vector<8x4xf32>
    %789 = arith.mulf %788, %788 : vector<8x4xf32>
    %cst_193 = arith.constant dense<0.000000e+00> : vector<8xf32>
    %790 = vector.multi_reduction <add>, %789, %cst_193 [1] : vector<8x4xf32> to vector<8xf32>
    %791 = vector.shape_cast %790 : vector<8xf32> to vector<8x1xf32>
    %792 = math.rsqrt %791 : vector<8x1xf32>
    %793 = vector.broadcast %792 : vector<8x1xf32> to vector<8x4xf32>
    %794 = arith.mulf %788, %793 : vector<8x4xf32>
    %795 = vector.extract_strided_slice %600 {offsets = [0, 12], sizes = [8, 4], strides = [1, 1]} : vector<8x32xf32> to vector<8x4xf32>
    %796 = arith.mulf %795, %795 : vector<8x4xf32>
    %cst_194 = arith.constant dense<0.000000e+00> : vector<8xf32>
    %797 = vector.multi_reduction <add>, %796, %cst_194 [1] : vector<8x4xf32> to vector<8xf32>
    %798 = vector.shape_cast %797 : vector<8xf32> to vector<8x1xf32>
    %799 = math.rsqrt %798 : vector<8x1xf32>
    %800 = vector.broadcast %799 : vector<8x1xf32> to vector<8x4xf32>
    %801 = arith.mulf %795, %800 : vector<8x4xf32>
    %cst_195 = arith.constant 2.500000e+01 : f32
    %802 = vector.broadcast %cst_195 : f32 to vector<8x4xf32>
    %803 = arith.mulf %801, %802 : vector<8x4xf32>
    %804 = vector.extract_strided_slice %601 {offsets = [0, 12], sizes = [8, 4], strides = [1, 1]} : vector<8x32xf32> to vector<8x4xf32>
    %805 = arith.mulf %804, %804 : vector<8x4xf32>
    %cst_196 = arith.constant dense<0.000000e+00> : vector<8xf32>
    %806 = vector.multi_reduction <add>, %805, %cst_196 [1] : vector<8x4xf32> to vector<8xf32>
    %807 = vector.shape_cast %806 : vector<8xf32> to vector<8x1xf32>
    %808 = math.rsqrt %807 : vector<8x1xf32>
    %809 = vector.broadcast %808 : vector<8x1xf32> to vector<8x4xf32>
    %810 = arith.mulf %804, %809 : vector<8x4xf32>
    %811 = vector.extract_strided_slice %599 {offsets = [0, 12], sizes = [8, 4], strides = [1, 1]} : vector<8x32xf32> to vector<8x4xf32>
    %cst_197 = arith.constant dense<0.000000e+00> : vector<8x8xf32>
    %812 = tpu.matmul %787, %794, %cst_197 {dimension_numbers = #tpu.dot_dimension_numbers<[1], [1], [0], [0], [0, 0, 1, 0], [], []>} : vector<8x4xf32>, vector<8x4xf32>, vector<8x8xf32> -> vector<8x8xf32>
    %cst_198 = arith.constant dense<0xFF800000> : vector<8xf32>
    %813 = vector.multi_reduction <maximumf>, %812, %cst_198 [1] : vector<8x8xf32> to vector<8xf32>
    %814 = vector.shape_cast %813 : vector<8xf32> to vector<8x1xf32>
    %815 = vector.broadcast %814 : vector<8x1xf32> to vector<8x8xf32>
    %816 = arith.subf %812, %815 : vector<8x8xf32>
    %817 = math.exp %816 : vector<8x8xf32>
    %cst_199 = arith.constant dense<0.000000e+00> : vector<8xf32>
    %818 = vector.multi_reduction <add>, %817, %cst_199 [1] : vector<8x8xf32> to vector<8xf32>
    %819 = vector.shape_cast %818 : vector<8xf32> to vector<8x1xf32>
    %820 = tpu.reciprocal %819 {approx = true} : vector<8x1xf32> -> vector<8x1xf32>
    %821 = vector.broadcast %820 : vector<8x1xf32> to vector<8x8xf32>
    %822 = arith.mulf %817, %821 : vector<8x8xf32>
    %cst_200 = arith.constant dense<0.000000e+00> : vector<8x8xf32>
    %823 = tpu.matmul %803, %810, %cst_200 {dimension_numbers = #tpu.dot_dimension_numbers<[1], [1], [0], [0], [0, 0, 1, 0], [], []>} : vector<8x4xf32>, vector<8x4xf32>, vector<8x8xf32> -> vector<8x8xf32>
    %cst_201 = arith.constant dense<0xFF800000> : vector<8xf32>
    %824 = vector.multi_reduction <maximumf>, %823, %cst_201 [1] : vector<8x8xf32> to vector<8xf32>
    %825 = vector.shape_cast %824 : vector<8xf32> to vector<8x1xf32>
    %826 = vector.broadcast %825 : vector<8x1xf32> to vector<8x8xf32>
    %827 = arith.subf %823, %826 : vector<8x8xf32>
    %828 = math.exp %827 : vector<8x8xf32>
    %cst_202 = arith.constant dense<0.000000e+00> : vector<8xf32>
    %829 = vector.multi_reduction <add>, %828, %cst_202 [1] : vector<8x8xf32> to vector<8xf32>
    %830 = vector.shape_cast %829 : vector<8xf32> to vector<8x1xf32>
    %831 = tpu.reciprocal %830 {approx = true} : vector<8x1xf32> -> vector<8x1xf32>
    %832 = vector.broadcast %831 : vector<8x1xf32> to vector<8x8xf32>
    %833 = arith.mulf %828, %832 : vector<8x8xf32>
    %834 = arith.addf %822, %833 : vector<8x8xf32>
    %cst_203 = arith.constant 5.000000e-01 : f32
    %835 = vector.broadcast %cst_203 : f32 to vector<8x8xf32>
    %836 = arith.mulf %834, %835 : vector<8x8xf32>
    %cst_204 = arith.constant dense<0.000000e+00> : vector<8x4xf32>
    %837 = tpu.matmul %836, %811, %cst_204 {dimension_numbers = #tpu.dot_dimension_numbers<[1], [0], [0], [1], [0, 0, 1, 1], [], []>} : vector<8x8xf32>, vector<8x4xf32>, vector<8x4xf32> -> vector<8x4xf32>
    %838 = vector.extract_strided_slice %597 {offsets = [0, 16], sizes = [8, 4], strides = [1, 1]} : vector<8x32xf32> to vector<8x4xf32>
    %839 = arith.mulf %838, %838 : vector<8x4xf32>
    %cst_205 = arith.constant dense<0.000000e+00> : vector<8xf32>
    %840 = vector.multi_reduction <add>, %839, %cst_205 [1] : vector<8x4xf32> to vector<8xf32>
    %841 = vector.shape_cast %840 : vector<8xf32> to vector<8x1xf32>
    %842 = math.rsqrt %841 : vector<8x1xf32>
    %843 = vector.broadcast %842 : vector<8x1xf32> to vector<8x4xf32>
    %844 = arith.mulf %838, %843 : vector<8x4xf32>
    %cst_206 = arith.constant 2.500000e+01 : f32
    %845 = vector.broadcast %cst_206 : f32 to vector<8x4xf32>
    %846 = arith.mulf %844, %845 : vector<8x4xf32>
    %847 = vector.extract_strided_slice %598 {offsets = [0, 16], sizes = [8, 4], strides = [1, 1]} : vector<8x32xf32> to vector<8x4xf32>
    %848 = arith.mulf %847, %847 : vector<8x4xf32>
    %cst_207 = arith.constant dense<0.000000e+00> : vector<8xf32>
    %849 = vector.multi_reduction <add>, %848, %cst_207 [1] : vector<8x4xf32> to vector<8xf32>
    %850 = vector.shape_cast %849 : vector<8xf32> to vector<8x1xf32>
    %851 = math.rsqrt %850 : vector<8x1xf32>
    %852 = vector.broadcast %851 : vector<8x1xf32> to vector<8x4xf32>
    %853 = arith.mulf %847, %852 : vector<8x4xf32>
    %854 = vector.extract_strided_slice %600 {offsets = [0, 16], sizes = [8, 4], strides = [1, 1]} : vector<8x32xf32> to vector<8x4xf32>
    %855 = arith.mulf %854, %854 : vector<8x4xf32>
    %cst_208 = arith.constant dense<0.000000e+00> : vector<8xf32>
    %856 = vector.multi_reduction <add>, %855, %cst_208 [1] : vector<8x4xf32> to vector<8xf32>
    %857 = vector.shape_cast %856 : vector<8xf32> to vector<8x1xf32>
    %858 = math.rsqrt %857 : vector<8x1xf32>
    %859 = vector.broadcast %858 : vector<8x1xf32> to vector<8x4xf32>
    %860 = arith.mulf %854, %859 : vector<8x4xf32>
    %cst_209 = arith.constant 2.500000e+01 : f32
    %861 = vector.broadcast %cst_209 : f32 to vector<8x4xf32>
    %862 = arith.mulf %860, %861 : vector<8x4xf32>
    %863 = vector.extract_strided_slice %601 {offsets = [0, 16], sizes = [8, 4], strides = [1, 1]} : vector<8x32xf32> to vector<8x4xf32>
    %864 = arith.mulf %863, %863 : vector<8x4xf32>
    %cst_210 = arith.constant dense<0.000000e+00> : vector<8xf32>
    %865 = vector.multi_reduction <add>, %864, %cst_210 [1] : vector<8x4xf32> to vector<8xf32>
    %866 = vector.shape_cast %865 : vector<8xf32> to vector<8x1xf32>
    %867 = math.rsqrt %866 : vector<8x1xf32>
    %868 = vector.broadcast %867 : vector<8x1xf32> to vector<8x4xf32>
    %869 = arith.mulf %863, %868 : vector<8x4xf32>
    %870 = vector.extract_strided_slice %599 {offsets = [0, 16], sizes = [8, 4], strides = [1, 1]} : vector<8x32xf32> to vector<8x4xf32>
    %cst_211 = arith.constant dense<0.000000e+00> : vector<8x8xf32>
    %871 = tpu.matmul %846, %853, %cst_211 {dimension_numbers = #tpu.dot_dimension_numbers<[1], [1], [0], [0], [0, 0, 1, 0], [], []>} : vector<8x4xf32>, vector<8x4xf32>, vector<8x8xf32> -> vector<8x8xf32>
    %cst_212 = arith.constant dense<0xFF800000> : vector<8xf32>
    %872 = vector.multi_reduction <maximumf>, %871, %cst_212 [1] : vector<8x8xf32> to vector<8xf32>
    %873 = vector.shape_cast %872 : vector<8xf32> to vector<8x1xf32>
    %874 = vector.broadcast %873 : vector<8x1xf32> to vector<8x8xf32>
    %875 = arith.subf %871, %874 : vector<8x8xf32>
    %876 = math.exp %875 : vector<8x8xf32>
    %cst_213 = arith.constant dense<0.000000e+00> : vector<8xf32>
    %877 = vector.multi_reduction <add>, %876, %cst_213 [1] : vector<8x8xf32> to vector<8xf32>
    %878 = vector.shape_cast %877 : vector<8xf32> to vector<8x1xf32>
    %879 = tpu.reciprocal %878 {approx = true} : vector<8x1xf32> -> vector<8x1xf32>
    %880 = vector.broadcast %879 : vector<8x1xf32> to vector<8x8xf32>
    %881 = arith.mulf %876, %880 : vector<8x8xf32>
    %cst_214 = arith.constant dense<0.000000e+00> : vector<8x8xf32>
    %882 = tpu.matmul %862, %869, %cst_214 {dimension_numbers = #tpu.dot_dimension_numbers<[1], [1], [0], [0], [0, 0, 1, 0], [], []>} : vector<8x4xf32>, vector<8x4xf32>, vector<8x8xf32> -> vector<8x8xf32>
    %cst_215 = arith.constant dense<0xFF800000> : vector<8xf32>
    %883 = vector.multi_reduction <maximumf>, %882, %cst_215 [1] : vector<8x8xf32> to vector<8xf32>
    %884 = vector.shape_cast %883 : vector<8xf32> to vector<8x1xf32>
    %885 = vector.broadcast %884 : vector<8x1xf32> to vector<8x8xf32>
    %886 = arith.subf %882, %885 : vector<8x8xf32>
    %887 = math.exp %886 : vector<8x8xf32>
    %cst_216 = arith.constant dense<0.000000e+00> : vector<8xf32>
    %888 = vector.multi_reduction <add>, %887, %cst_216 [1] : vector<8x8xf32> to vector<8xf32>
    %889 = vector.shape_cast %888 : vector<8xf32> to vector<8x1xf32>
    %890 = tpu.reciprocal %889 {approx = true} : vector<8x1xf32> -> vector<8x1xf32>
    %891 = vector.broadcast %890 : vector<8x1xf32> to vector<8x8xf32>
    %892 = arith.mulf %887, %891 : vector<8x8xf32>
    %893 = arith.addf %881, %892 : vector<8x8xf32>
    %cst_217 = arith.constant 5.000000e-01 : f32
    %894 = vector.broadcast %cst_217 : f32 to vector<8x8xf32>
    %895 = arith.mulf %893, %894 : vector<8x8xf32>
    %cst_218 = arith.constant dense<0.000000e+00> : vector<8x4xf32>
    %896 = tpu.matmul %895, %870, %cst_218 {dimension_numbers = #tpu.dot_dimension_numbers<[1], [0], [0], [1], [0, 0, 1, 1], [], []>} : vector<8x8xf32>, vector<8x4xf32>, vector<8x4xf32> -> vector<8x4xf32>
    %897 = vector.extract_strided_slice %597 {offsets = [0, 20], sizes = [8, 4], strides = [1, 1]} : vector<8x32xf32> to vector<8x4xf32>
    %898 = arith.mulf %897, %897 : vector<8x4xf32>
    %cst_219 = arith.constant dense<0.000000e+00> : vector<8xf32>
    %899 = vector.multi_reduction <add>, %898, %cst_219 [1] : vector<8x4xf32> to vector<8xf32>
    %900 = vector.shape_cast %899 : vector<8xf32> to vector<8x1xf32>
    %901 = math.rsqrt %900 : vector<8x1xf32>
    %902 = vector.broadcast %901 : vector<8x1xf32> to vector<8x4xf32>
    %903 = arith.mulf %897, %902 : vector<8x4xf32>
    %cst_220 = arith.constant 2.500000e+01 : f32
    %904 = vector.broadcast %cst_220 : f32 to vector<8x4xf32>
    %905 = arith.mulf %903, %904 : vector<8x4xf32>
    %906 = vector.extract_strided_slice %598 {offsets = [0, 20], sizes = [8, 4], strides = [1, 1]} : vector<8x32xf32> to vector<8x4xf32>
    %907 = arith.mulf %906, %906 : vector<8x4xf32>
    %cst_221 = arith.constant dense<0.000000e+00> : vector<8xf32>
    %908 = vector.multi_reduction <add>, %907, %cst_221 [1] : vector<8x4xf32> to vector<8xf32>
    %909 = vector.shape_cast %908 : vector<8xf32> to vector<8x1xf32>
    %910 = math.rsqrt %909 : vector<8x1xf32>
    %911 = vector.broadcast %910 : vector<8x1xf32> to vector<8x4xf32>
    %912 = arith.mulf %906, %911 : vector<8x4xf32>
    %913 = vector.extract_strided_slice %600 {offsets = [0, 20], sizes = [8, 4], strides = [1, 1]} : vector<8x32xf32> to vector<8x4xf32>
    %914 = arith.mulf %913, %913 : vector<8x4xf32>
    %cst_222 = arith.constant dense<0.000000e+00> : vector<8xf32>
    %915 = vector.multi_reduction <add>, %914, %cst_222 [1] : vector<8x4xf32> to vector<8xf32>
    %916 = vector.shape_cast %915 : vector<8xf32> to vector<8x1xf32>
    %917 = math.rsqrt %916 : vector<8x1xf32>
    %918 = vector.broadcast %917 : vector<8x1xf32> to vector<8x4xf32>
    %919 = arith.mulf %913, %918 : vector<8x4xf32>
    %cst_223 = arith.constant 2.500000e+01 : f32
    %920 = vector.broadcast %cst_223 : f32 to vector<8x4xf32>
    %921 = arith.mulf %919, %920 : vector<8x4xf32>
    %922 = vector.extract_strided_slice %601 {offsets = [0, 20], sizes = [8, 4], strides = [1, 1]} : vector<8x32xf32> to vector<8x4xf32>
    %923 = arith.mulf %922, %922 : vector<8x4xf32>
    %cst_224 = arith.constant dense<0.000000e+00> : vector<8xf32>
    %924 = vector.multi_reduction <add>, %923, %cst_224 [1] : vector<8x4xf32> to vector<8xf32>
    %925 = vector.shape_cast %924 : vector<8xf32> to vector<8x1xf32>
    %926 = math.rsqrt %925 : vector<8x1xf32>
    %927 = vector.broadcast %926 : vector<8x1xf32> to vector<8x4xf32>
    %928 = arith.mulf %922, %927 : vector<8x4xf32>
    %929 = vector.extract_strided_slice %599 {offsets = [0, 20], sizes = [8, 4], strides = [1, 1]} : vector<8x32xf32> to vector<8x4xf32>
    %cst_225 = arith.constant dense<0.000000e+00> : vector<8x8xf32>
    %930 = tpu.matmul %905, %912, %cst_225 {dimension_numbers = #tpu.dot_dimension_numbers<[1], [1], [0], [0], [0, 0, 1, 0], [], []>} : vector<8x4xf32>, vector<8x4xf32>, vector<8x8xf32> -> vector<8x8xf32>
    %cst_226 = arith.constant dense<0xFF800000> : vector<8xf32>
    %931 = vector.multi_reduction <maximumf>, %930, %cst_226 [1] : vector<8x8xf32> to vector<8xf32>
    %932 = vector.shape_cast %931 : vector<8xf32> to vector<8x1xf32>
    %933 = vector.broadcast %932 : vector<8x1xf32> to vector<8x8xf32>
    %934 = arith.subf %930, %933 : vector<8x8xf32>
    %935 = math.exp %934 : vector<8x8xf32>
    %cst_227 = arith.constant dense<0.000000e+00> : vector<8xf32>
    %936 = vector.multi_reduction <add>, %935, %cst_227 [1] : vector<8x8xf32> to vector<8xf32>
    %937 = vector.shape_cast %936 : vector<8xf32> to vector<8x1xf32>
    %938 = tpu.reciprocal %937 {approx = true} : vector<8x1xf32> -> vector<8x1xf32>
    %939 = vector.broadcast %938 : vector<8x1xf32> to vector<8x8xf32>
    %940 = arith.mulf %935, %939 : vector<8x8xf32>
    %cst_228 = arith.constant dense<0.000000e+00> : vector<8x8xf32>
    %941 = tpu.matmul %921, %928, %cst_228 {dimension_numbers = #tpu.dot_dimension_numbers<[1], [1], [0], [0], [0, 0, 1, 0], [], []>} : vector<8x4xf32>, vector<8x4xf32>, vector<8x8xf32> -> vector<8x8xf32>
    %cst_229 = arith.constant dense<0xFF800000> : vector<8xf32>
    %942 = vector.multi_reduction <maximumf>, %941, %cst_229 [1] : vector<8x8xf32> to vector<8xf32>
    %943 = vector.shape_cast %942 : vector<8xf32> to vector<8x1xf32>
    %944 = vector.broadcast %943 : vector<8x1xf32> to vector<8x8xf32>
    %945 = arith.subf %941, %944 : vector<8x8xf32>
    %946 = math.exp %945 : vector<8x8xf32>
    %cst_230 = arith.constant dense<0.000000e+00> : vector<8xf32>
    %947 = vector.multi_reduction <add>, %946, %cst_230 [1] : vector<8x8xf32> to vector<8xf32>
    %948 = vector.shape_cast %947 : vector<8xf32> to vector<8x1xf32>
    %949 = tpu.reciprocal %948 {approx = true} : vector<8x1xf32> -> vector<8x1xf32>
    %950 = vector.broadcast %949 : vector<8x1xf32> to vector<8x8xf32>
    %951 = arith.mulf %946, %950 : vector<8x8xf32>
    %952 = arith.addf %940, %951 : vector<8x8xf32>
    %cst_231 = arith.constant 5.000000e-01 : f32
    %953 = vector.broadcast %cst_231 : f32 to vector<8x8xf32>
    %954 = arith.mulf %952, %953 : vector<8x8xf32>
    %cst_232 = arith.constant dense<0.000000e+00> : vector<8x4xf32>
    %955 = tpu.matmul %954, %929, %cst_232 {dimension_numbers = #tpu.dot_dimension_numbers<[1], [0], [0], [1], [0, 0, 1, 1], [], []>} : vector<8x8xf32>, vector<8x4xf32>, vector<8x4xf32> -> vector<8x4xf32>
    %956 = vector.extract_strided_slice %597 {offsets = [0, 24], sizes = [8, 4], strides = [1, 1]} : vector<8x32xf32> to vector<8x4xf32>
    %957 = arith.mulf %956, %956 : vector<8x4xf32>
    %cst_233 = arith.constant dense<0.000000e+00> : vector<8xf32>
    %958 = vector.multi_reduction <add>, %957, %cst_233 [1] : vector<8x4xf32> to vector<8xf32>
    %959 = vector.shape_cast %958 : vector<8xf32> to vector<8x1xf32>
    %960 = math.rsqrt %959 : vector<8x1xf32>
    %961 = vector.broadcast %960 : vector<8x1xf32> to vector<8x4xf32>
    %962 = arith.mulf %956, %961 : vector<8x4xf32>
    %cst_234 = arith.constant 2.500000e+01 : f32
    %963 = vector.broadcast %cst_234 : f32 to vector<8x4xf32>
    %964 = arith.mulf %962, %963 : vector<8x4xf32>
    %965 = vector.extract_strided_slice %598 {offsets = [0, 24], sizes = [8, 4], strides = [1, 1]} : vector<8x32xf32> to vector<8x4xf32>
    %966 = arith.mulf %965, %965 : vector<8x4xf32>
    %cst_235 = arith.constant dense<0.000000e+00> : vector<8xf32>
    %967 = vector.multi_reduction <add>, %966, %cst_235 [1] : vector<8x4xf32> to vector<8xf32>
    %968 = vector.shape_cast %967 : vector<8xf32> to vector<8x1xf32>
    %969 = math.rsqrt %968 : vector<8x1xf32>
    %970 = vector.broadcast %969 : vector<8x1xf32> to vector<8x4xf32>
    %971 = arith.mulf %965, %970 : vector<8x4xf32>
    %972 = vector.extract_strided_slice %600 {offsets = [0, 24], sizes = [8, 4], strides = [1, 1]} : vector<8x32xf32> to vector<8x4xf32>
    %973 = arith.mulf %972, %972 : vector<8x4xf32>
    %cst_236 = arith.constant dense<0.000000e+00> : vector<8xf32>
    %974 = vector.multi_reduction <add>, %973, %cst_236 [1] : vector<8x4xf32> to vector<8xf32>
    %975 = vector.shape_cast %974 : vector<8xf32> to vector<8x1xf32>
    %976 = math.rsqrt %975 : vector<8x1xf32>
    %977 = vector.broadcast %976 : vector<8x1xf32> to vector<8x4xf32>
    %978 = arith.mulf %972, %977 : vector<8x4xf32>
    %cst_237 = arith.constant 2.500000e+01 : f32
    %979 = vector.broadcast %cst_237 : f32 to vector<8x4xf32>
    %980 = arith.mulf %978, %979 : vector<8x4xf32>
    %981 = vector.extract_strided_slice %601 {offsets = [0, 24], sizes = [8, 4], strides = [1, 1]} : vector<8x32xf32> to vector<8x4xf32>
    %982 = arith.mulf %981, %981 : vector<8x4xf32>
    %cst_238 = arith.constant dense<0.000000e+00> : vector<8xf32>
    %983 = vector.multi_reduction <add>, %982, %cst_238 [1] : vector<8x4xf32> to vector<8xf32>
    %984 = vector.shape_cast %983 : vector<8xf32> to vector<8x1xf32>
    %985 = math.rsqrt %984 : vector<8x1xf32>
    %986 = vector.broadcast %985 : vector<8x1xf32> to vector<8x4xf32>
    %987 = arith.mulf %981, %986 : vector<8x4xf32>
    %988 = vector.extract_strided_slice %599 {offsets = [0, 24], sizes = [8, 4], strides = [1, 1]} : vector<8x32xf32> to vector<8x4xf32>
    %cst_239 = arith.constant dense<0.000000e+00> : vector<8x8xf32>
    %989 = tpu.matmul %964, %971, %cst_239 {dimension_numbers = #tpu.dot_dimension_numbers<[1], [1], [0], [0], [0, 0, 1, 0], [], []>} : vector<8x4xf32>, vector<8x4xf32>, vector<8x8xf32> -> vector<8x8xf32>
    %cst_240 = arith.constant dense<0xFF800000> : vector<8xf32>
    %990 = vector.multi_reduction <maximumf>, %989, %cst_240 [1] : vector<8x8xf32> to vector<8xf32>
    %991 = vector.shape_cast %990 : vector<8xf32> to vector<8x1xf32>
    %992 = vector.broadcast %991 : vector<8x1xf32> to vector<8x8xf32>
    %993 = arith.subf %989, %992 : vector<8x8xf32>
    %994 = math.exp %993 : vector<8x8xf32>
    %cst_241 = arith.constant dense<0.000000e+00> : vector<8xf32>
    %995 = vector.multi_reduction <add>, %994, %cst_241 [1] : vector<8x8xf32> to vector<8xf32>
    %996 = vector.shape_cast %995 : vector<8xf32> to vector<8x1xf32>
    %997 = tpu.reciprocal %996 {approx = true} : vector<8x1xf32> -> vector<8x1xf32>
    %998 = vector.broadcast %997 : vector<8x1xf32> to vector<8x8xf32>
    %999 = arith.mulf %994, %998 : vector<8x8xf32>
    %cst_242 = arith.constant dense<0.000000e+00> : vector<8x8xf32>
    %1000 = tpu.matmul %980, %987, %cst_242 {dimension_numbers = #tpu.dot_dimension_numbers<[1], [1], [0], [0], [0, 0, 1, 0], [], []>} : vector<8x4xf32>, vector<8x4xf32>, vector<8x8xf32> -> vector<8x8xf32>
    %cst_243 = arith.constant dense<0xFF800000> : vector<8xf32>
    %1001 = vector.multi_reduction <maximumf>, %1000, %cst_243 [1] : vector<8x8xf32> to vector<8xf32>
    %1002 = vector.shape_cast %1001 : vector<8xf32> to vector<8x1xf32>
    %1003 = vector.broadcast %1002 : vector<8x1xf32> to vector<8x8xf32>
    %1004 = arith.subf %1000, %1003 : vector<8x8xf32>
    %1005 = math.exp %1004 : vector<8x8xf32>
    %cst_244 = arith.constant dense<0.000000e+00> : vector<8xf32>
    %1006 = vector.multi_reduction <add>, %1005, %cst_244 [1] : vector<8x8xf32> to vector<8xf32>
    %1007 = vector.shape_cast %1006 : vector<8xf32> to vector<8x1xf32>
    %1008 = tpu.reciprocal %1007 {approx = true} : vector<8x1xf32> -> vector<8x1xf32>
    %1009 = vector.broadcast %1008 : vector<8x1xf32> to vector<8x8xf32>
    %1010 = arith.mulf %1005, %1009 : vector<8x8xf32>
    %1011 = arith.addf %999, %1010 : vector<8x8xf32>
    %cst_245 = arith.constant 5.000000e-01 : f32
    %1012 = vector.broadcast %cst_245 : f32 to vector<8x8xf32>
    %1013 = arith.mulf %1011, %1012 : vector<8x8xf32>
    %cst_246 = arith.constant dense<0.000000e+00> : vector<8x4xf32>
    %1014 = tpu.matmul %1013, %988, %cst_246 {dimension_numbers = #tpu.dot_dimension_numbers<[1], [0], [0], [1], [0, 0, 1, 1], [], []>} : vector<8x8xf32>, vector<8x4xf32>, vector<8x4xf32> -> vector<8x4xf32>
    %1015 = vector.extract_strided_slice %597 {offsets = [0, 28], sizes = [8, 4], strides = [1, 1]} : vector<8x32xf32> to vector<8x4xf32>
    %1016 = arith.mulf %1015, %1015 : vector<8x4xf32>
    %cst_247 = arith.constant dense<0.000000e+00> : vector<8xf32>
    %1017 = vector.multi_reduction <add>, %1016, %cst_247 [1] : vector<8x4xf32> to vector<8xf32>
    %1018 = vector.shape_cast %1017 : vector<8xf32> to vector<8x1xf32>
    %1019 = math.rsqrt %1018 : vector<8x1xf32>
    %1020 = vector.broadcast %1019 : vector<8x1xf32> to vector<8x4xf32>
    %1021 = arith.mulf %1015, %1020 : vector<8x4xf32>
    %cst_248 = arith.constant 2.500000e+01 : f32
    %1022 = vector.broadcast %cst_248 : f32 to vector<8x4xf32>
    %1023 = arith.mulf %1021, %1022 : vector<8x4xf32>
    %1024 = vector.extract_strided_slice %598 {offsets = [0, 28], sizes = [8, 4], strides = [1, 1]} : vector<8x32xf32> to vector<8x4xf32>
    %1025 = arith.mulf %1024, %1024 : vector<8x4xf32>
    %cst_249 = arith.constant dense<0.000000e+00> : vector<8xf32>
    %1026 = vector.multi_reduction <add>, %1025, %cst_249 [1] : vector<8x4xf32> to vector<8xf32>
    %1027 = vector.shape_cast %1026 : vector<8xf32> to vector<8x1xf32>
    %1028 = math.rsqrt %1027 : vector<8x1xf32>
    %1029 = vector.broadcast %1028 : vector<8x1xf32> to vector<8x4xf32>
    %1030 = arith.mulf %1024, %1029 : vector<8x4xf32>
    %1031 = vector.extract_strided_slice %600 {offsets = [0, 28], sizes = [8, 4], strides = [1, 1]} : vector<8x32xf32> to vector<8x4xf32>
    %1032 = arith.mulf %1031, %1031 : vector<8x4xf32>
    %cst_250 = arith.constant dense<0.000000e+00> : vector<8xf32>
    %1033 = vector.multi_reduction <add>, %1032, %cst_250 [1] : vector<8x4xf32> to vector<8xf32>
    %1034 = vector.shape_cast %1033 : vector<8xf32> to vector<8x1xf32>
    %1035 = math.rsqrt %1034 : vector<8x1xf32>
    %1036 = vector.broadcast %1035 : vector<8x1xf32> to vector<8x4xf32>
    %1037 = arith.mulf %1031, %1036 : vector<8x4xf32>
    %cst_251 = arith.constant 2.500000e+01 : f32
    %1038 = vector.broadcast %cst_251 : f32 to vector<8x4xf32>
    %1039 = arith.mulf %1037, %1038 : vector<8x4xf32>
    %1040 = vector.extract_strided_slice %601 {offsets = [0, 28], sizes = [8, 4], strides = [1, 1]} : vector<8x32xf32> to vector<8x4xf32>
    %1041 = arith.mulf %1040, %1040 : vector<8x4xf32>
    %cst_252 = arith.constant dense<0.000000e+00> : vector<8xf32>
    %1042 = vector.multi_reduction <add>, %1041, %cst_252 [1] : vector<8x4xf32> to vector<8xf32>
    %1043 = vector.shape_cast %1042 : vector<8xf32> to vector<8x1xf32>
    %1044 = math.rsqrt %1043 : vector<8x1xf32>
    %1045 = vector.broadcast %1044 : vector<8x1xf32> to vector<8x4xf32>
    %1046 = arith.mulf %1040, %1045 : vector<8x4xf32>
    %1047 = vector.extract_strided_slice %599 {offsets = [0, 28], sizes = [8, 4], strides = [1, 1]} : vector<8x32xf32> to vector<8x4xf32>
    %cst_253 = arith.constant dense<0.000000e+00> : vector<8x8xf32>
    %1048 = tpu.matmul %1023, %1030, %cst_253 {dimension_numbers = #tpu.dot_dimension_numbers<[1], [1], [0], [0], [0, 0, 1, 0], [], []>} : vector<8x4xf32>, vector<8x4xf32>, vector<8x8xf32> -> vector<8x8xf32>
    %cst_254 = arith.constant dense<0xFF800000> : vector<8xf32>
    %1049 = vector.multi_reduction <maximumf>, %1048, %cst_254 [1] : vector<8x8xf32> to vector<8xf32>
    %1050 = vector.shape_cast %1049 : vector<8xf32> to vector<8x1xf32>
    %1051 = vector.broadcast %1050 : vector<8x1xf32> to vector<8x8xf32>
    %1052 = arith.subf %1048, %1051 : vector<8x8xf32>
    %1053 = math.exp %1052 : vector<8x8xf32>
    %cst_255 = arith.constant dense<0.000000e+00> : vector<8xf32>
    %1054 = vector.multi_reduction <add>, %1053, %cst_255 [1] : vector<8x8xf32> to vector<8xf32>
    %1055 = vector.shape_cast %1054 : vector<8xf32> to vector<8x1xf32>
    %1056 = tpu.reciprocal %1055 {approx = true} : vector<8x1xf32> -> vector<8x1xf32>
    %1057 = vector.broadcast %1056 : vector<8x1xf32> to vector<8x8xf32>
    %1058 = arith.mulf %1053, %1057 : vector<8x8xf32>
    %cst_256 = arith.constant dense<0.000000e+00> : vector<8x8xf32>
    %1059 = tpu.matmul %1039, %1046, %cst_256 {dimension_numbers = #tpu.dot_dimension_numbers<[1], [1], [0], [0], [0, 0, 1, 0], [], []>} : vector<8x4xf32>, vector<8x4xf32>, vector<8x8xf32> -> vector<8x8xf32>
    %cst_257 = arith.constant dense<0xFF800000> : vector<8xf32>
    %1060 = vector.multi_reduction <maximumf>, %1059, %cst_257 [1] : vector<8x8xf32> to vector<8xf32>
    %1061 = vector.shape_cast %1060 : vector<8xf32> to vector<8x1xf32>
    %1062 = vector.broadcast %1061 : vector<8x1xf32> to vector<8x8xf32>
    %1063 = arith.subf %1059, %1062 : vector<8x8xf32>
    %1064 = math.exp %1063 : vector<8x8xf32>
    %cst_258 = arith.constant dense<0.000000e+00> : vector<8xf32>
    %1065 = vector.multi_reduction <add>, %1064, %cst_258 [1] : vector<8x8xf32> to vector<8xf32>
    %1066 = vector.shape_cast %1065 : vector<8xf32> to vector<8x1xf32>
    %1067 = tpu.reciprocal %1066 {approx = true} : vector<8x1xf32> -> vector<8x1xf32>
    %1068 = vector.broadcast %1067 : vector<8x1xf32> to vector<8x8xf32>
    %1069 = arith.mulf %1064, %1068 : vector<8x8xf32>
    %1070 = arith.addf %1058, %1069 : vector<8x8xf32>
    %cst_259 = arith.constant 5.000000e-01 : f32
    %1071 = vector.broadcast %cst_259 : f32 to vector<8x8xf32>
    %1072 = arith.mulf %1070, %1071 : vector<8x8xf32>
    %cst_260 = arith.constant dense<0.000000e+00> : vector<8x4xf32>
    %1073 = tpu.matmul %1072, %1047, %cst_260 {dimension_numbers = #tpu.dot_dimension_numbers<[1], [0], [0], [1], [0, 0, 1, 1], [], []>} : vector<8x8xf32>, vector<8x4xf32>, vector<8x4xf32> -> vector<8x4xf32>
    %1074 = tpu.concatenate %660, %719, %778, %837, %896, %955, %1014, %1073 in 1 : vector<8x4xf32>, vector<8x4xf32>, vector<8x4xf32>, vector<8x4xf32>, vector<8x4xf32>, vector<8x4xf32>, vector<8x4xf32>, vector<8x4xf32> -> vector<8x32xf32>
    %1075 = tpu.concatenate %1074, %599 in 1 : vector<8x32xf32>, vector<8x32xf32> -> vector<8x64xf32>
    %c1 = arith.constant 1 : index
    %c0_261 = arith.constant 0 : index
    %c0_262 = arith.constant 0 : index
    %1076 = vector.load %arg4[%c1, %c0_261, %c0_262] : memref<2x8x64xf32, #tpu.memory_space<vmem>>, vector<1x8x64xf32>
    %1077 = vector.shape_cast %1076 : vector<1x8x64xf32> to vector<8x64xf32>
    %1078 = vector.shape_cast %1075 : vector<8x64xf32> to vector<1x8x64xf32>
    tpu.vector_store %arg4[%c1, %c0_261, %c0_262], %1078 {strides = array<i32>} : memref<2x8x64xf32, #tpu.memory_space<vmem>>, vector<1x8x64xf32>,
    return
  }
}

</mosaic_0001>

<bundles_post_ra>
// kernel: tpu_custom_call.1
= control target key start
LH: loop header
LB: loop body
LE: loop exit
PB: predicated region body
PF: predicated region fallthrough
CT: control target
= control target key end

     0   :  { %11 = vsyncpa [#allocation3], 0  ;;  %s7835_s0 = inlined_call_operand.hbm [shape: f32[16,32], index: 0, kind: input, shape index: {}]   ;;  %s7836_s1 = inlined_call_operand.hbm [shape: f32[16,32], index: 1, kind: input, shape index: {}]   ;;  %s7837_s2 = inlined_call_operand.hbm [shape: f32[32,96], index: 2, kind: input, shape index: {}]   ;;  %s7838_s3 = inlined_call_operand.hbm [shape: f32[32,96], index: 3, kind: input, shape index: {}]   ;;  %s7839_s4 = inlined_call_operand.hbm [shape: f32[2,8,64], index: 4, kind: output, shape index: {0}]   ;;  %s7840_s5 = inlined_call_operand.hbm [shape: f32[8,8], index: 5, kind: output, shape index: {1}]  }
   0x1   :  { %12 = vsyncpa [#allocation6], 0 }
   0x2   :  { %13 = vsyncpa [#allocation9], 0 }
   0x3   :  { %14 = vsyncpa [#allocation4], 0 }
   0x4   :  { %15 = vsyncpa [#allocation12], 0  ;;  %s6781_s18 = smov [#allocation5]   ;;  %s6782_s20 = smov [#allocation2]  }
   0x5   :  { %s33_s19 = sshll.u32 %s6781_s18, 4  ;;  %s21_s21 = sshll.u32 %s6782_s20, 4  ;;  %s34_s19 = int_to_ptr.vmem [resolvable:$true] %s33_s19  ;;  %s6850_s21 = int_to_ptr.vmem [resolvable:$true] %s21_s21 }
   0x6   :  { %s6639_s24 = scalar_lea.hbm %s7836_s1, 256 }
   0x7   :  { %p6640_p0 = scmp.ne.s32.totalorder %s7836_s1, %s6639_s24  ;;  %p6643_p1 = scmp.lt.u32.totalorder %s6639_s24, %s7836_s1 }
   0x9   :  { %p6645_p2 = pnand %p6643_p1, %p6640_p0 }
   0xb   :  { %6648 = shalt.err (!%p6645_p2)
}
   0xc   :  { %s6649_s29 = scalar_lea.vmem %s34_s19, 256  ;;  %p6654_p4 = scmp.lt.s32.totalorder %s34_s19, %s34_s19 }
   0xd   :  { %p6650_p3 = scmp.ne.s32.totalorder %s34_s19, %s6649_s29  ;;  %p6655_p5 = scmp.lt.s32.totalorder %s6649_s29, %s6649_s29 }
   0xf   :  { %p6656_p6 = por %p6655_p5, %p6654_p4 }
  0x11   :  { %p6657_p7 = pnand %p6656_p6, %p6650_p3 }
  0x13   :  { %6660 = shalt.err (!%p6657_p7)
}
  0x14   :  { %s6783_s30 = smov 128   ;;  %s6784_s6 = smov 8  }
  0x15   :  { %39 = dma.hbm_to_vmem [thread:$0]  %s7836_s1, 256, %s34_s19, [#allocation6], %s6783_s30, %s6783_s30, %s6784_s6  }
  0x16   :  { %s6661_s11 = scalar_lea.hbm %s7835_s0, 256 }
  0x17   :  { %p6662_p8 = scmp.ne.s32.totalorder %s7835_s0, %s6661_s11  ;;  %p6665_p9 = scmp.lt.u32.totalorder %s6661_s11, %s7835_s0 }
  0x19   :  { %p6667_p10 = pnand %p6665_p9, %p6662_p8 }
  0x1b   :  { %6670 = shalt.err (!%p6667_p10)
}
  0x1c   :  { %s6671_s16 = scalar_lea.vmem %s6850_s21, 256  ;;  %p6676_p12 = scmp.lt.s32.totalorder %s6850_s21, %s6850_s21 }
  0x1d   :  { %p6672_p11 = scmp.ne.s32.totalorder %s6850_s21, %s6671_s16  ;;  %p6677_p13 = scmp.lt.s32.totalorder %s6671_s16, %s6671_s16 }
  0x1f   :  { %p6678_p0 = por %p6677_p13, %p6676_p12 }
  0x21   :  { %p6679_p1 = pnand %p6678_p0, %p6672_p11 }
  0x23   :  { %6682 = shalt.err (!%p6679_p1)
}
  0x24   :  { %27 = dma.hbm_to_vmem [thread:$0]  %s7835_s0, 256, %s6850_s21, [#allocation3], %s6783_s30, %s6783_s30, %s6784_s6  }
  0x25   :  { %s6785_s18 = smov [#allocation7]   ;;  %s6786_s20 = smov [#allocation8]  }
  0x26   :  { %s45_s19 = sshll.u32 %s6785_s18, 4  ;;  %s57_s22 = sshll.u32 %s6786_s20, 4  ;;  %s46_s19 = int_to_ptr.vmem [resolvable:$true] %s45_s19  ;;  %s6887_s22 = int_to_ptr.vmem [resolvable:$true] %s57_s22 }
  0x27   :  { %s6683_s25 = scalar_lea.hbm %s7837_s2, 512 }
  0x28   :  { %p6684_p2 = scmp.ne.s32.totalorder %s7837_s2, %s6683_s25  ;;  %p6687_p3 = scmp.lt.u32.totalorder %s6683_s25, %s7837_s2 }
  0x2a   :  { %p6689_p4 = pnand %p6687_p3, %p6684_p2 }
  0x2c   :  { %6692 = shalt.err (!%p6689_p4)
}
  0x2d   :  { %s6693_s0 = scalar_lea.vmem %s46_s19, 512  ;;  %p6698_p6 = scmp.lt.s32.totalorder %s46_s19, %s46_s19 }
  0x2e   :  { %p6694_p5 = scmp.ne.s32.totalorder %s46_s19, %s6693_s0  ;;  %p6699_p7 = scmp.lt.s32.totalorder %s6693_s0, %s6693_s0 }
  0x30   :  { %p6700_p8 = por %p6699_p7, %p6698_p6 }
  0x32   :  { %p6701_p9 = pnand %p6700_p8, %p6694_p5 }
  0x34   :  { %6704 = shalt.err (!%p6701_p9)
}
  0x35   :  { %51 = dma.hbm_to_vmem [thread:$0]  %s7837_s2, 512, %s46_s19, [#allocation6], %s6783_s30, %s6783_s30, %s6784_s6  }
  0x36   :  { %s6705_s10 = scalar_lea.hbm %s7838_s3, 512 }
  0x37   :  { %p6706_p10 = scmp.ne.s32.totalorder %s7838_s3, %s6705_s10  ;;  %p6709_p11 = scmp.lt.u32.totalorder %s6705_s10, %s7838_s3 }
  0x39   :  { %p6711_p12 = pnand %p6709_p11, %p6706_p10 }
  0x3b   :  { %6714 = shalt.err (!%p6711_p12)
}
  0x3c   :  { %s6715_s15 = scalar_lea.vmem %s6887_s22, 512  ;;  %p6720_p0 = scmp.lt.s32.totalorder %s6887_s22, %s6887_s22 }
  0x3d   :  { %p6716_p13 = scmp.ne.s32.totalorder %s6887_s22, %s6715_s15  ;;  %p6721_p1 = scmp.lt.s32.totalorder %s6715_s15, %s6715_s15 }
  0x3f   :  { %p6722_p2 = por %p6721_p1, %p6720_p0 }
  0x41   :  { %p6723_p3 = pnand %p6722_p2, %p6716_p13 }
  0x43   :  { %6726 = shalt.err (!%p6723_p3)
}
  0x44   :  { %63 = dma.hbm_to_vmem [thread:$0]  %s7838_s3, 512, %s6887_s22, [#allocation9], %s6783_s30, %s6783_s30, %s6784_s6  }
  0x45   :  { %6771 = dma.done.wait [#allocation3], 256  }
  0x46   :  { %6772 = vsyncadd [#allocation3], 4294967040 }
  0x47   :  { %6773 = dma.done.wait [#allocation6], 768  }
  0x48   :  { %6774 = vsyncadd [#allocation6], 4294966528 }
  0x49   :  { %6775 = dma.done.wait [#allocation9], 512  }
  0x4a   :  { %6776 = vsyncadd [#allocation9], 4294966784  ;;  %v80_v0 = vld [vmem:[#allocation7] sm:$0xff]  ;;  %v81_v1 = vld [vmem:[#allocation7 + $0x8] sm:$0xff]  ;;  %vm88_vm0 = vcmask 261120   ;;  %s6787_s3 = smov 96  }
  0x4b   :  { %v84_v2 = vld [vmem:[#allocation8] sm:$0xff]  ;;  %v6292_v3 = vpack.c.bf16 %v81_v1, %v80_v0  ;;  %v85_v4 = vld [vmem:[#allocation8 + $0x8] sm:$0xff]  ;;  %v82_v5 = vld [vmem:[#allocation7 + $0x10] sm:$0xff]  ;;  %vm252_vm1 = vcmask 31744   ;;  %s6788_s1 = smov 124   ;;  %v6789_v28 = vmov 0.0  }
  0x4c   :  { %v83_v6 = vld [vmem:[#allocation7 + $0x18] sm:$0xff]  ;;  %v6300_v7 = vpack.c.bf16 %v85_v4, %v84_v2  ;;  %v76_v9 = vld [vmem:[#allocation2] sm:$0xff]  ;;  %v86_v10 = vld [vmem:[#allocation8 + $0x10] sm:$0xff]  ;;  %vm6790_vm2 = vmmov 0   ;;  %s6791_s17 = smov 92   ;;  %vm362_vm3 = vcmask 64512  }
  0x4d   :  { %v6296_v8 = vpack.c.bf16 %v83_v6, %v82_v5  ;;  %v87_v11 = vld [vmem:[#allocation8 + $0x18] sm:$0xff]  ;;  %6293 = vmatprep.subr.bf16.mxu0 %v6292_v3  ;;  %5998 = vmatprep.mubr.msk.f32.mxu0 %vm88_vm0, %v76_v9  ;;  %v78_v13 = vld [vmem:[#allocation5] sm:$0xff]  ;;  %v77_v14 = vld [vmem:[#allocation2 + $0x8] sm:$0xff]  ;;  %s6792_s18 = smov 64   ;;  %s6793_s19 = smov 88   ;;  %vm2637_vm4 = vcmask 97280  }
  0x4e   :  { %v6304_v12 = vpack.c.bf16 %v87_v11, %v86_v10  ;;  %6295 = vmatpush3.bf16.msra.mxu0 %v6292_v3  ;;  %6301 = vmatprep.subr.bf16.mxu1 %v6300_v7  ;;  %v79_v15 = vld [vmem:[#allocation5 + $0x8] sm:$0xff]  ;;  %s6794_s20 = smov 120   ;;  %s6795_s22 = smov 60   ;;  %vm2639_vm5 = vcmask 130048   ;;  %vm2641_vm6 = vcmask 162816   ;;  %vm2643_vm7 = vcmask 195584  }
  0x4f   :  { %6297 = vmatprep.subr.bf16.mxu0 %v6296_v8  ;;  %6303 = vmatpush3.bf16.msra.mxu1 %v6300_v7  ;;  %s6796_s23 = smov 84   ;;  %s6797_s24 = smov 116   ;;  %vm2645_vm8 = vcmask 228352   ;;  %vm2651_vm9 = vcmask 523264  }
  0x50   :  { %6305 = vmatprep.subr.bf16.mxu1 %v6304_v12  ;;  %6009 = vmatprep.mubr.msk.f32.mxu1 %vm88_vm0, %v78_v13  ;;  %s6798_s25 = smov 56   ;;  %s6799_s26 = smov 80  }
  0x51   :  { %s6800_s27 = smov 112   ;;  %s6801_s28 = smov 52  }
  0x52   :  { %6299 = vmatpush3.bf16.msra.mxu0 %v6296_v8  ;;  %s6802_s29 = smov 76   ;;  %s6803_s0 = smov 108  }
  0x53   :  { %6307 = vmatpush3.bf16.msra.mxu1 %v6304_v12  ;;  %6012 = vmatprep.subr.mxu0 %v6789_v28  ;;  %s6804_s21 = smov 48   ;;  %s6805_s7 = smov 72  }
  0x54   :  { %6017 = vmatprep.subr.mxu1 %v6789_v28  ;;  %s6806_s8 = smov 104   ;;  %s6807_s9 = smov 44  }
  0x55   :  { %5999 = vmatmul.mubr.msk.f32.vlgmr.msra.gmra.mrb[0].mxu0 %vm88_vm0, %v77_v14  ;;  %s6808_s10 = smov 68   ;;  %s6809_s11 = smov 100  }
  0x56   :  { %6010 = vmatmul.mubr.msk.f32.vlgmr.msra.gmra.mrb[0].mxu1 %vm88_vm0, %v79_v15  ;;  %6014 = vmatprep.mubr.msk.f32.mxu0 %vm6790_vm2, %v6789_v28  ;;  %s6810_s12 = smov 40   ;;  %s6811_s13 = smov 36  }
  0x57   :  { %6019 = vmatprep.mubr.msk.f32.mxu1 %vm6790_vm2, %v6789_v28  ;;  %s6812_s14 = smov 4   ;;  %s6813_s15 = smov 12  }
  0x58   :  { %s6814_s2 = smov 16   ;;  %s6815_s16 = smov 20  }
 0x128   :  { %v6928_v16 = vpop.f32.mrb[0].mxu0 }
 0x129   :  { %v6930_v17 = vpop.f32.mrb[1].mxu0  ;;  %v6932_v18 = vpop.f32.mrb[0].mxu1 }
 0x12a   :  { %v6934_v19 = vpop.f32.mrb[1].mxu1  ;;  %v6938_v20 = vmul.f32 %v6930_v17, %v6930_v17 }
 0x12b   :  { %v6942_v21 = vmul.f32 %v6934_v19, %v6934_v19 }
 0x12c   :  { %260 = vrot.lane.b32.xlu0 %v6938_v20, %s6787_s3  ;;  %v253_v22 = vsel %vm252_vm1, %v6938_v20, 0.0 }
 0x12d   :  { %v269_v27 = vsel %vm252_vm1, %v6942_v21, 0.0 }
 0x130   :  { %276 = vrot.lane.b32.xlu0 %v6942_v21, %s6787_s3 }
 0x14f   :  { %254 = vadd.xlane.f32.xlu0 %v253_v22 }
 0x165   :  { %542 = vrot.lane.b32.xlu0 %v6938_v20, %s6788_s1 }
 0x19e   :  { %v261_v23 = vpop.permute.xlu0 %260 }
 0x19f   :  { %v263_v24 = vsel %vm252_vm1, %v261_v23, 0.0 }
 0x1a0   :  { %264 = vadd.xlane.f32.xlu1 %v263_v24 }
 0x1a2   :  { %v277_v25 = vpop.permute.xlu0 %276 }
 0x1a3   :  { %v279_v26 = vsel %vm252_vm1, %v277_v25, 0.0 }
 0x1a4   :  { %280 = vadd.xlane.f32.xlu1 %v279_v26 }
 0x1a8   :  { %270 = vadd.xlane.f32.xlu1 %v269_v27 }
 0x1dc   :  { %v255_v35 = vpop.xlane.xlu0 %254 }
 0x1e0   :  { %v543_v57 = vpop.permute.xlu0 %542 }
 0x1e1   :  { %v545_v58 = vsel %vm252_vm1, %v543_v57, 0.0 }
 0x22d   :  { %v265_v29 = vpop.xlane.xlu1 %264 }
 0x22e   :  { %6361 = vrsqrt.f32 %v265_v29 }
 0x231   :  { %v281_v30 = vpop.xlane.xlu1 %280 }
 0x232   :  { %6363 = vrsqrt.f32 %v281_v30 }
 0x233   :  { %6365 = vrsqrt.f32 %v255_v35 }
 0x235   :  { %v271_v36 = vpop.xlane.xlu1 %270 }
 0x236   :  { %6367 = vrsqrt.f32 %v271_v36 }
 0x238   :  { %v6362_v31 = vpop.eup %6361 }
 0x239   :  { %v267_v32 = vmul.f32 %v6362_v31, %v6930_v17 }
 0x23b   :  { %285 = vrot.lane.b32.xlu1 %v267_v32, %s6787_s3 }
 0x23c   :  { %v6364_v33 = vpop.eup %6363 }
 0x23d   :  { %v283_v34 = vmul.f32 %v6364_v33, %v6934_v19  ;;  %v6366_v37 = vpop.eup %6365 }
 0x23e   :  { %v257_v38 = vmul.f32 %v6366_v37, %v6930_v17 }
 0x23f   :  { %375 = vrot.lane.b32.xlu1 %v283_v34, %s6787_s3 }
 0x240   :  { %v6368_v39 = vpop.eup %6367  ;;  %v258_v41 = vmul.f32 25.0, %v257_v38 }
 0x241   :  { %v273_v42 = vmul.f32 %v6368_v39, %v6934_v19 }
 0x243   :  { %551 = vrot.lane.b32.xlu1 %v6938_v20, %s6791_s17  ;;  %v274_v44 = vmul.f32 25.0, %v273_v42 }
 0x247   :  { %568 = vrot.lane.b32.xlu1 %v6942_v21, %s6791_s17 }
 0x24b   :  { %559 = vrot.lane.b32.xlu1 %v6942_v21, %s6788_s1 }
 0x2ad   :  { %v286_v40 = vpop.permute.xlu1 %285 }
 0x2ae   :  { %6013 = vmatpush3.xpose.msk.msra.mxu0 %vm252_vm1, %v286_v40 }
 0x2af   :  { %6022 = vmatprep.subr.mxu0 %v6789_v28 }
 0x2b1   :  { %v376_v43 = vpop.permute.xlu1 %375  ;;  %6015 = vmatmul.mubr.msk.f32.vlgmr.msra.gmra.mrb[2].mxu0 %vm252_vm1, %v258_v41 }
 0x2b2   :  { %6018 = vmatpush3.xpose.msk.msra.mxu1 %vm252_vm1, %v376_v43  ;;  %6024 = vmatprep.mubr.msk.f32.mxu0 %vm6790_vm2, %v6789_v28 }
 0x2b3   :  { %6027 = vmatprep.subr.mxu1 %v6789_v28 }
 0x2b5   :  { %6020 = vmatmul.mubr.msk.f32.vlgmr.msra.gmra.mrb[2].mxu1 %vm252_vm1, %v274_v44  ;;  %v552_v45 = vpop.permute.xlu1 %551 }
 0x2b6   :  { %6029 = vmatprep.mubr.msk.f32.mxu1 %vm6790_vm2, %v6789_v28  ;;  %v554_v53 = vsel %vm252_vm1, %v552_v45, 0.0 }
 0x2b9   :  { %v569_v46 = vpop.permute.xlu1 %568 }
 0x2ba   :  { %v571_v56 = vsel %vm252_vm1, %v569_v46, 0.0 }
 0x2bd   :  { %v560_v54 = vpop.permute.xlu1 %559 }
 0x2be   :  { %v562_v55 = vsel %vm252_vm1, %v560_v54, 0.0 }
 0x384   :  { %v358_v47 = vpop.f32.mrb[2].mxu0 }
 0x385   :  { %v6016_v48 = vpop.f32.mrb[3].mxu0  ;;  %v363_v49 = vsel %vm362_vm3, %v358_v47, -inf }
 0x386   :  { %364 = vmax.xlane.f32.xlu1 %v363_v49 }
 0x388   :  { %v448_v50 = vpop.f32.mrb[2].mxu1 }
 0x389   :  { %v6021_v51 = vpop.f32.mrb[3].mxu1  ;;  %v452_v52 = vsel %vm362_vm3, %v448_v50, -inf }
 0x38a   :  { %453 = vmax.xlane.f32.xlu0 %v452_v52  ;;  %555 = vadd.xlane.f32.xlu1 %v554_v53 }
 0x38e   :  { %563 = vadd.xlane.f32.xlu0 %v562_v55  ;;  %572 = vadd.xlane.f32.xlu1 %v571_v56 }
 0x392   :  { %546 = vadd.xlane.f32.xlu1 %v545_v58 }
 0x3a3   :  { %466 = vrot.lane.b32.xlu1 %v6930_v17, %s6792_s18 }
 0x413   :  { %v365_v59 = vpop.xlane.xlu1 %364 }
 0x414   :  { %v366_v60 = vsub.f32 %v358_v47, %v365_v59 }
 0x416   :  { %v367_v61 = vmul.f32 1.442695, %v366_v60 }
 0x417   :  { %v556_v62 = vpop.xlane.xlu1 %555  ;;  %v454_v63 = vpop.xlane.xlu0 %453 }
 0x418   :  { %6369 = vpow2.f32 %v367_v61  ;;  %v455_v0 = vsub.f32 %v448_v50, %v454_v63 }
 0x41a   :  { %v456_v1 = vmul.f32 1.442695, %v455_v0 }
 0x41b   :  { %v573_v2 = vpop.xlane.xlu1 %572  ;;  %v564_v9 = vpop.xlane.xlu0 %563 }
 0x41c   :  { %6371 = vpow2.f32 %v456_v1 }
 0x41d   :  { %6373 = vrsqrt.f32 %v573_v2 }
 0x41f   :  { %v547_v3 = vpop.xlane.xlu1 %546 }
 0x420   :  { %6375 = vrsqrt.f32 %v547_v3 }
 0x421   :  { %6377 = vrsqrt.f32 %v556_v62 }
 0x422   :  { %v6370_v4 = vpop.eup %6369  ;;  %6379 = vrsqrt.f32 %v564_v9 }
 0x423   :  { %v467_v5 = vpop.permute.xlu1 %466  ;;  %v369_v6 = vsel %vm362_vm3, %v6370_v4, 0.0 }
 0x424   :  { %370 = vadd.xlane.f32.xlu1 %v369_v6  ;;  %6023 = vmatpush3.msra.mxu0 %v467_v5 }
 0x425   :  { %6032 = vmatprep.subr.mxu0 %v6789_v28 }
 0x426   :  { %v6372_v7 = vpop.eup %6371 }
 0x427   :  { %v458_v8 = vsel %vm362_vm3, %v6372_v7, 0.0  ;;  %v6374_v10 = vpop.eup %6373 }
 0x428   :  { %459 = vadd.xlane.f32.xlu0 %v458_v8  ;;  %v575_v12 = vmul.f32 %v6374_v10, %v6934_v19 }
 0x42a   :  { %v6376_v11 = vpop.eup %6375 }
 0x42b   :  { %v549_v13 = vmul.f32 %v6376_v11, %v6930_v17  ;;  %v6378_v15 = vpop.eup %6377 }
 0x42c   :  { %v6380_v22 = vpop.eup %6379  ;;  %v558_v23 = vmul.f32 %v6378_v15, %v6930_v17 }
 0x42d   :  { %v550_v14 = vmul.f32 25.0, %v549_v13  ;;  %v566_v24 = vmul.f32 %v6380_v22, %v6934_v19 }
 0x42f   :  { %v567_v25 = vmul.f32 25.0, %v566_v24 }
 0x435   :  { %671 = vrot.lane.b32.xlu1 %v575_v12, %s6791_s17 }
 0x439   :  { %577 = vrot.lane.b32.xlu1 %v550_v14, %s6788_s1 }
 0x43d   :  { %846 = vrot.lane.b32.xlu1 %v6938_v20, %s6793_s19 }
 0x43e   :  { %580 = vrot.lane.b32.xlu0 %v558_v23, %s6791_s17 }
 0x441   :  { %837 = vrot.lane.b32.xlu1 %v6938_v20, %s6794_s20 }
 0x442   :  { %668 = vrot.lane.b32.xlu0 %v567_v25, %s6788_s1 }
 0x446   :  { %863 = vrot.lane.b32.xlu0 %v6942_v21, %s6793_s19 }
 0x44a   :  { %854 = vrot.lane.b32.xlu0 %v6942_v21, %s6794_s20 }
 0x4b1   :  { %v371_v26 = vpop.xlane.xlu1 %370 }
 0x4b2   :  { %6381 = vrcp.f32 %v371_v26 }
 0x4b5   :  { %v460_v27 = vpop.xlane.xlu0 %459  ;;  %v672_v29 = vpop.permute.xlu1 %671 }
 0x4b6   :  { %6383 = vrcp.f32 %v460_v27 }
 0x4b9   :  { %v581_v30 = vpop.permute.xlu0 %580  ;;  %v578_v31 = vpop.permute.xlu1 %577 }
 0x4ba   :  { %6028 = vmatpush3.xpose.msk.msra.mxu1 %vm252_vm1, %v581_v30 }
 0x4bb   :  { %6037 = vmatprep.subr.mxu1 %v6789_v28 }
 0x4bc   :  { %v6382_v32 = vpop.eup %6381 }
 0x4bd   :  { %6030 = vmatmul.mubr.msk.f32.vlgmr.msra.gmra.mrb[4].mxu1 %vm252_vm1, %v578_v31  ;;  %v373_v34 = vmul.f32 %v6382_v32, %v6370_v4  ;;  %v669_v38 = vpop.permute.xlu0 %668  ;;  %v847_v48 = vpop.permute.xlu1 %846 }
 0x4be   :  { %6039 = vmatprep.mubr.msk.f32.mxu1 %vm6790_vm2, %v6789_v28  ;;  %v849_v52 = vsel %vm252_vm1, %v847_v48, 0.0 }
 0x4c0   :  { %v6384_v33 = vpop.eup %6383 }
 0x4c1   :  { %v462_v35 = vmul.f32 %v6384_v33, %v6372_v7  ;;  %v864_v39 = vpop.permute.xlu0 %863  ;;  %v838_v53 = vpop.permute.xlu1 %837 }
 0x4c2   :  { %v866_v43 = vsel %vm252_vm1, %v864_v39, 0.0  ;;  %v840_v54 = vsel %vm252_vm1, %v838_v53, 0.0 }
 0x4c3   :  { %v463_v36 = vadd.f32 %v462_v35, %v373_v34 }
 0x4c5   :  { %v7016_v37 = vmul.f32 0.5, %v463_v36  ;;  %v855_v44 = vpop.permute.xlu0 %854 }
 0x4c6   :  { %v857_v45 = vsel %vm252_vm1, %v855_v44, 0.0 }
 0x4c7   :  { %6025 = vmatmul.mubr.msk.f32.vlgmr.msra.gmra.mrb[4].mxu0 %vm362_vm3, %v7016_v37 }
 0x4c8   :  { %6033 = vmatpush3.xpose.msk.msra.mxu0 %vm252_vm1, %v672_v29  ;;  %6034 = vmatprep.mubr.msk.f32.mxu0 %vm6790_vm2, %v6789_v28 }
 0x4c9   :  { %6042 = vmatprep.subr.mxu0 %v6789_v28 }
 0x4cb   :  { %6035 = vmatmul.mubr.msk.f32.vlgmr.msra.gmra.mrb[6].mxu0 %vm252_vm1, %v669_v38 }
 0x4cc   :  { %6044 = vmatprep.mubr.msk.f32.mxu0 %vm6790_vm2, %v6789_v28 }
 0x590   :  { %v652_v40 = vpop.f32.mrb[4].mxu1 }
 0x591   :  { %v6031_v41 = vpop.f32.mrb[5].mxu1  ;;  %v656_v42 = vsel %vm362_vm3, %v652_v40, -inf }
 0x592   :  { %657 = vmax.xlane.f32.xlu1 %v656_v42 }
 0x596   :  { %867 = vadd.xlane.f32.xlu1 %v866_v43 }
 0x59a   :  { %v7030_v46 = vpop.f32.mrb[4].mxu0  ;;  %858 = vadd.xlane.f32.xlu1 %v857_v45 }
 0x59b   :  { %v6026_v47 = vpop.f32.mrb[5].mxu0 }
 0x59e   :  { %v743_v49 = vpop.f32.mrb[6].mxu0 }
 0x59f   :  { %v6036_v50 = vpop.f32.mrb[7].mxu0  ;;  %v747_v51 = vsel %vm362_vm3, %v743_v49, -inf }
 0x5a0   :  { %748 = vmax.xlane.f32.xlu0 %v747_v51 }
 0x5a4   :  { %850 = vadd.xlane.f32.xlu0 %v849_v52 }
 0x5a8   :  { %841 = vadd.xlane.f32.xlu0 %v840_v54 }
 0x61f   :  { %v658_v55 = vpop.xlane.xlu1 %657 }
 0x620   :  { %v659_v56 = vsub.f32 %v652_v40, %v658_v55 }
 0x622   :  { %v660_v57 = vmul.f32 1.442695, %v659_v56 }
 0x623   :  { %v868_v62 = vpop.xlane.xlu1 %867 }
 0x624   :  { %6385 = vpow2.f32 %v660_v57 }
 0x627   :  { %v859_v9 = vpop.xlane.xlu1 %858 }
 0x62d   :  { %v749_v58 = vpop.xlane.xlu0 %748 }
 0x62e   :  { %v6386_v59 = vpop.eup %6385  ;;  %v750_v7 = vsub.f32 %v743_v49, %v749_v58 }
 0x62f   :  { %v662_v60 = vsel %vm362_vm3, %v6386_v59, 0.0 }
 0x630   :  { %663 = vadd.xlane.f32.xlu0 %v662_v60  ;;  %v751_v8 = vmul.f32 1.442695, %v750_v7 }
 0x631   :  { %v851_v61 = vpop.xlane.xlu0 %850 }
 0x632   :  { %6387 = vrsqrt.f32 %v851_v61 }
 0x633   :  { %6389 = vrsqrt.f32 %v868_v62 }
 0x635   :  { %v842_v63 = vpop.xlane.xlu0 %841 }
 0x636   :  { %6391 = vrsqrt.f32 %v842_v63 }
 0x637   :  { %6393 = vpow2.f32 %v751_v8 }
 0x638   :  { %6395 = vrsqrt.f32 %v859_v9 }
 0x63c   :  { %v6388_v0 = vpop.eup %6387 }
 0x63d   :  { %v853_v1 = vmul.f32 %v6388_v0, %v6930_v17  ;;  %v6390_v2 = vpop.eup %6389 }
 0x63e   :  { %v870_v4 = vmul.f32 %v6390_v2, %v6934_v19 }
 0x63f   :  { %875 = vrot.lane.b32.xlu1 %v853_v1, %s6793_s19 }
 0x640   :  { %v6392_v3 = vpop.eup %6391 }
 0x641   :  { %v844_v5 = vmul.f32 %v6392_v3, %v6930_v17  ;;  %v6394_v10 = vpop.eup %6393 }
 0x642   :  { %v753_v11 = vsel %vm362_vm3, %v6394_v10, 0.0  ;;  %v6396_v12 = vpop.eup %6395 }
 0x643   :  { %966 = vrot.lane.b32.xlu1 %v870_v4, %s6793_s19  ;;  %v845_v6 = vmul.f32 25.0, %v844_v5  ;;  %v861_v13 = vmul.f32 %v6396_v12, %v6934_v19 }
 0x645   :  { %v862_v14 = vmul.f32 25.0, %v861_v13 }
 0x646   :  { %760 = vrot.lane.b32.xlu0 %v6930_v17, %s6795_s22 }
 0x64a   :  { %872 = vrot.lane.b32.xlu0 %v845_v6, %s6794_s20 }
 0x64e   :  { %1141 = vrot.lane.b32.xlu0 %v6938_v20, %s6796_s23 }
 0x652   :  { %1132 = vrot.lane.b32.xlu0 %v6938_v20, %s6797_s24 }
 0x667   :  { %754 = vadd.xlane.f32.xlu1 %v753_v11 }
 0x678   :  { %963 = vrot.lane.b32.xlu1 %v862_v14, %s6794_s20 }
 0x67c   :  { %1158 = vrot.lane.b32.xlu1 %v6942_v21, %s6796_s23 }
 0x680   :  { %1149 = vrot.lane.b32.xlu1 %v6942_v21, %s6797_s24 }
 0x6b1   :  { %v876_v15 = vpop.permute.xlu1 %875 }
 0x6b2   :  { %6043 = vmatpush3.xpose.msk.msra.mxu0 %vm252_vm1, %v876_v15 }
 0x6b3   :  { %6052 = vmatprep.subr.mxu0 %v6789_v28 }
 0x6b5   :  { %v967_v25 = vpop.permute.xlu1 %966 }
 0x6bd   :  { %v664_v22 = vpop.xlane.xlu0 %663 }
 0x6be   :  { %6397 = vrcp.f32 %v664_v22 }
 0x6c1   :  { %v761_v23 = vpop.permute.xlu0 %760 }
 0x6c2   :  { %6038 = vmatpush3.msra.mxu1 %v761_v23 }
 0x6c3   :  { %6047 = vmatprep.subr.mxu1 %v6789_v28 }
 0x6c5   :  { %v873_v24 = vpop.permute.xlu0 %872 }
 0x6c6   :  { %6045 = vmatmul.mubr.msk.f32.vlgmr.msra.gmra.mrb[8].mxu0 %vm252_vm1, %v873_v24 }
 0x6c7   :  { %6054 = vmatprep.mubr.msk.f32.mxu0 %vm6790_vm2, %v6789_v28 }
 0x6c8   :  { %v6398_v27 = vpop.eup %6397 }
 0x6c9   :  { %v666_v30 = vmul.f32 %v6398_v27, %v6386_v59  ;;  %v1142_v39 = vpop.permute.xlu0 %1141 }
 0x6ca   :  { %v1144_v41 = vsel %vm252_vm1, %v1142_v39, 0.0 }
 0x6cd   :  { %v1133_v51 = vpop.permute.xlu0 %1132 }
 0x6ce   :  { %v1135_v52 = vsel %vm252_vm1, %v1133_v51, 0.0 }
 0x6f4   :  { %v755_v26 = vpop.xlane.xlu1 %754 }
 0x6f5   :  { %6399 = vrcp.f32 %v755_v26 }
 0x6f8   :  { %v964_v34 = vpop.permute.xlu1 %963 }
 0x6fc   :  { %v1159_v40 = vpop.permute.xlu1 %1158 }
 0x6fd   :  { %v1161_v42 = vsel %vm252_vm1, %v1159_v40, 0.0 }
 0x6ff   :  { %v6400_v29 = vpop.eup %6399 }
 0x700   :  { %v757_v31 = vmul.f32 %v6400_v29, %v6394_v10  ;;  %v1150_v43 = vpop.permute.xlu1 %1149 }
 0x701   :  { %v1152_v44 = vsel %vm252_vm1, %v1150_v43, 0.0 }
 0x702   :  { %v758_v32 = vadd.f32 %v757_v31, %v666_v30 }
 0x704   :  { %v7061_v33 = vmul.f32 0.5, %v758_v32 }
 0x706   :  { %6040 = vmatmul.mubr.msk.f32.vlgmr.msra.gmra.mrb[6].mxu1 %vm362_vm3, %v7061_v33  ;;  %v836_v31 = vadd.f32 %v7061_v33, %v7016_v37 }
 0x707   :  { %6048 = vmatpush3.xpose.msk.msra.mxu1 %vm252_vm1, %v967_v25  ;;  %6049 = vmatprep.mubr.msk.f32.mxu1 %vm6790_vm2, %v6789_v28 }
 0x708   :  { %6057 = vmatprep.subr.mxu1 %v6789_v28 }
 0x70a   :  { %6050 = vmatmul.mubr.msk.f32.vlgmr.msra.gmra.mrb[8].mxu1 %vm252_vm1, %v964_v34 }
 0x70b   :  { %6059 = vmatprep.mubr.msk.f32.mxu1 %vm6790_vm2, %v6789_v28 }
 0x799   :  { %v947_v35 = vpop.f32.mrb[8].mxu0 }
 0x79a   :  { %v6046_v36 = vpop.f32.mrb[9].mxu0  ;;  %v951_v38 = vsel %vm362_vm3, %v947_v35, -inf }
 0x79b   :  { %952 = vmax.xlane.f32.xlu0 %v951_v38 }
 0x79f   :  { %1145 = vadd.xlane.f32.xlu0 %v1144_v41 }
 0x7a3   :  { %1162 = vadd.xlane.f32.xlu0 %v1161_v42 }
 0x7a7   :  { %1153 = vadd.xlane.f32.xlu0 %v1152_v44 }
 0x7d9   :  { %v7076_v45 = vpop.f32.mrb[6].mxu1 }
 0x7da   :  { %v6041_v47 = vpop.f32.mrb[7].mxu1 }
 0x7dd   :  { %v1038_v48 = vpop.f32.mrb[8].mxu1 }
 0x7de   :  { %v6051_v49 = vpop.f32.mrb[9].mxu1  ;;  %v1042_v50 = vsel %vm362_vm3, %v1038_v48, -inf }
 0x7df   :  { %1043 = vmax.xlane.f32.xlu1 %v1042_v50 }
 0x7e3   :  { %1136 = vadd.xlane.f32.xlu1 %v1135_v52 }
 0x828   :  { %v953_v53 = vpop.xlane.xlu0 %952 }
 0x829   :  { %v954_v54 = vsub.f32 %v947_v35, %v953_v53 }
 0x82b   :  { %v955_v55 = vmul.f32 1.442695, %v954_v54 }
 0x82c   :  { %v1146_v56 = vpop.xlane.xlu0 %1145 }
 0x82d   :  { %6401 = vpow2.f32 %v955_v55 }
 0x830   :  { %v1163_v59 = vpop.xlane.xlu0 %1162 }
 0x831   :  { %6403 = vrsqrt.f32 %v1163_v59 }
 0x834   :  { %v1154_v7 = vpop.xlane.xlu0 %1153 }
 0x837   :  { %v6402_v57 = vpop.eup %6401 }
 0x838   :  { %v957_v58 = vsel %vm362_vm3, %v6402_v57, 0.0 }
 0x839   :  { %958 = vadd.xlane.f32.xlu1 %v957_v58 }
 0x83b   :  { %v6404_v60 = vpop.eup %6403 }
 0x83c   :  { %v1165_v61 = vmul.f32 %v6404_v60, %v6934_v19 }
 0x84a   :  { %1055 = vrot.lane.b32.xlu1 %v6930_v17, %s6798_s25 }
 0x84e   :  { %1261 = vrot.lane.b32.xlu1 %v1165_v61, %s6796_s23 }
 0x86c   :  { %v1044_v62 = vpop.xlane.xlu1 %1043 }
 0x86d   :  { %v1045_v63 = vsub.f32 %v1038_v48, %v1044_v62 }
 0x86f   :  { %v1046_v0 = vmul.f32 1.442695, %v1045_v63 }
 0x870   :  { %v1137_v1 = vpop.xlane.xlu1 %1136 }
 0x871   :  { %6405 = vpow2.f32 %v1046_v0 }
 0x872   :  { %6407 = vrsqrt.f32 %v1137_v1 }
 0x873   :  { %6409 = vrsqrt.f32 %v1146_v56 }
 0x874   :  { %6411 = vrsqrt.f32 %v1154_v7 }
 0x87b   :  { %v6406_v2 = vpop.eup %6405 }
 0x87c   :  { %v6408_v3 = vpop.eup %6407  ;;  %v1048_v4 = vsel %vm362_vm3, %v6406_v2, 0.0 }
 0x87d   :  { %1049 = vadd.xlane.f32.xlu0 %v1048_v4  ;;  %v1139_v5 = vmul.f32 %v6408_v3, %v6930_v17  ;;  %v6410_v8 = vpop.eup %6409 }
 0x87e   :  { %v6412_v9 = vpop.eup %6411  ;;  %v1148_v10 = vmul.f32 %v6410_v8, %v6930_v17 }
 0x87f   :  { %v1140_v6 = vmul.f32 25.0, %v1139_v5  ;;  %v1156_v11 = vmul.f32 %v6412_v9, %v6934_v19 }
 0x881   :  { %1167 = vrot.lane.b32.xlu1 %v1140_v6, %s6797_s24  ;;  %v1157_v12 = vmul.f32 25.0, %v1156_v11 }
 0x885   :  { %1436 = vrot.lane.b32.xlu1 %v6938_v20, %s6799_s26 }
 0x889   :  { %1427 = vrot.lane.b32.xlu1 %v6938_v20, %s6800_s27 }
 0x893   :  { %1170 = vrot.lane.b32.xlu0 %v1148_v10, %s6796_s23 }
 0x897   :  { %1258 = vrot.lane.b32.xlu0 %v1157_v12, %s6797_s24 }
 0x89b   :  { %1453 = vrot.lane.b32.xlu0 %v6942_v21, %s6799_s26 }
 0x89f   :  { %1444 = vrot.lane.b32.xlu0 %v6942_v21, %s6800_s27 }
 0x8c6   :  { %v959_v13 = vpop.xlane.xlu1 %958 }
 0x8c7   :  { %6413 = vrcp.f32 %v959_v13 }
 0x8ca   :  { %v1056_v14 = vpop.permute.xlu1 %1055 }
 0x8cb   :  { %6053 = vmatpush3.msra.mxu0 %v1056_v14 }
 0x8cc   :  { %6062 = vmatprep.subr.mxu0 %v6789_v28 }
 0x8ce   :  { %v1262_v22 = vpop.permute.xlu1 %1261 }
 0x8d1   :  { %v6414_v25 = vpop.eup %6413 }
 0x8d2   :  { %v961_v27 = vmul.f32 %v6414_v25, %v6402_v57 }
 0x8f3   :  { %v1168_v24 = vpop.permute.xlu1 %1167 }
 0x8f7   :  { %v1437_v44 = vpop.permute.xlu1 %1436 }
 0x8f8   :  { %v1439_v50 = vsel %vm252_vm1, %v1437_v44, 0.0 }
 0x8fb   :  { %v1428_v51 = vpop.permute.xlu1 %1427 }
 0x8fc   :  { %v1430_v52 = vsel %vm252_vm1, %v1428_v51, 0.0 }
 0x90a   :  { %v1050_v15 = vpop.xlane.xlu0 %1049 }
 0x90b   :  { %6415 = vrcp.f32 %v1050_v15 }
 0x90e   :  { %v1171_v23 = vpop.permute.xlu0 %1170 }
 0x90f   :  { %6058 = vmatpush3.xpose.msk.msra.mxu1 %vm252_vm1, %v1171_v23 }
 0x910   :  { %6067 = vmatprep.subr.mxu1 %v6789_v28 }
 0x912   :  { %6060 = vmatmul.mubr.msk.f32.vlgmr.msra.gmra.mrb[10].mxu1 %vm252_vm1, %v1168_v24  ;;  %v1259_v35 = vpop.permute.xlu0 %1258 }
 0x913   :  { %6069 = vmatprep.mubr.msk.f32.mxu1 %vm6790_vm2, %v6789_v28 }
 0x915   :  { %v6416_v26 = vpop.eup %6415 }
 0x916   :  { %v1052_v29 = vmul.f32 %v6416_v26, %v6406_v2  ;;  %v1454_v36 = vpop.permute.xlu0 %1453 }
 0x917   :  { %v1456_v39 = vsel %vm252_vm1, %v1454_v36, 0.0 }
 0x918   :  { %v1053_v30 = vadd.f32 %v1052_v29, %v961_v27 }
 0x91a   :  { %v1054_v32 = vmul.f32 0.5, %v1053_v30  ;;  %v1445_v40 = vpop.permute.xlu0 %1444 }
 0x91b   :  { %v1447_v41 = vsel %vm252_vm1, %v1445_v40, 0.0 }
 0x91c   :  { %6055 = vmatmul.mubr.msk.f32.vlgmr.msra.gmra.mrb[10].mxu0 %vm362_vm3, %v1054_v32  ;;  %v7109_v34 = vadd.f32 %v1054_v32, %v836_v31 }
 0x91d   :  { %6063 = vmatpush3.xpose.msk.msra.mxu0 %vm252_vm1, %v1262_v22  ;;  %6064 = vmatprep.mubr.msk.f32.mxu0 %vm6790_vm2, %v6789_v28 }
 0x91e   :  { %6072 = vmatprep.subr.mxu0 %v6789_v28 }
 0x920   :  { %6065 = vmatmul.mubr.msk.f32.vlgmr.msra.gmra.mrb[12].mxu0 %vm252_vm1, %v1259_v35 }
 0x921   :  { %6074 = vmatprep.mubr.msk.f32.mxu0 %vm6790_vm2, %v6789_v28 }
 0x9e5   :  { %v1242_v37 = vpop.f32.mrb[10].mxu1 }
 0x9e6   :  { %v6061_v33 = vpop.f32.mrb[11].mxu1  ;;  %v1246_v38 = vsel %vm362_vm3, %v1242_v37, -inf }
 0x9e7   :  { %1247 = vmax.xlane.f32.xlu1 %v1246_v38 }
 0x9eb   :  { %1457 = vadd.xlane.f32.xlu1 %v1456_v39 }
 0x9ef   :  { %v7121_v42 = vpop.f32.mrb[10].mxu0  ;;  %1448 = vadd.xlane.f32.xlu1 %v1447_v41 }
 0x9f0   :  { %v6056_v43 = vpop.f32.mrb[11].mxu0 }
 0x9f3   :  { %v1333_v47 = vpop.f32.mrb[12].mxu0 }
 0x9f4   :  { %v6066_v48 = vpop.f32.mrb[13].mxu0  ;;  %v1337_v49 = vsel %vm362_vm3, %v1333_v47, -inf }
 0x9f5   :  { %1338 = vmax.xlane.f32.xlu0 %v1337_v49 }
 0x9f9   :  { %1440 = vadd.xlane.f32.xlu0 %v1439_v50 }
 0x9fd   :  { %1431 = vadd.xlane.f32.xlu0 %v1430_v52 }
 0xa74   :  { %v1248_v53 = vpop.xlane.xlu1 %1247 }
 0xa75   :  { %v1249_v54 = vsub.f32 %v1242_v37, %v1248_v53 }
 0xa77   :  { %v1250_v55 = vmul.f32 1.442695, %v1249_v54 }
 0xa78   :  { %v1458_v60 = vpop.xlane.xlu1 %1457 }
 0xa79   :  { %6417 = vpow2.f32 %v1250_v55 }
 0xa7c   :  { %v1449_v7 = vpop.xlane.xlu1 %1448 }
 0xa82   :  { %v1339_v56 = vpop.xlane.xlu0 %1338 }
 0xa83   :  { %v6418_v57 = vpop.eup %6417  ;;  %v1340_v5 = vsub.f32 %v1333_v47, %v1339_v56 }
 0xa84   :  { %v1252_v58 = vsel %vm362_vm3, %v6418_v57, 0.0 }
 0xa85   :  { %1253 = vadd.xlane.f32.xlu0 %v1252_v58  ;;  %v1341_v6 = vmul.f32 1.442695, %v1340_v5 }
 0xa86   :  { %v1441_v59 = vpop.xlane.xlu0 %1440 }
 0xa87   :  { %6419 = vrsqrt.f32 %v1441_v59 }
 0xa88   :  { %6421 = vrsqrt.f32 %v1458_v60 }
 0xa8a   :  { %v1432_v61 = vpop.xlane.xlu0 %1431 }
 0xa8b   :  { %6423 = vrsqrt.f32 %v1432_v61 }
 0xa8c   :  { %6425 = vpow2.f32 %v1341_v6 }
 0xa8d   :  { %6427 = vrsqrt.f32 %v1449_v7 }
 0xa91   :  { %v6420_v62 = vpop.eup %6419 }
 0xa92   :  { %v1443_v63 = vmul.f32 %v6420_v62, %v6930_v17  ;;  %v6422_v0 = vpop.eup %6421 }
 0xa93   :  { %v1460_v2 = vmul.f32 %v6422_v0, %v6934_v19 }
 0xa94   :  { %1465 = vrot.lane.b32.xlu1 %v1443_v63, %s6799_s26 }
 0xa95   :  { %v6424_v1 = vpop.eup %6423 }
 0xa96   :  { %v1434_v3 = vmul.f32 %v6424_v1, %v6930_v17  ;;  %v6426_v8 = vpop.eup %6425 }
 0xa97   :  { %v1343_v9 = vsel %vm362_vm3, %v6426_v8, 0.0  ;;  %v6428_v10 = vpop.eup %6427 }
 0xa98   :  { %1556 = vrot.lane.b32.xlu1 %v1460_v2, %s6799_s26  ;;  %v1435_v4 = vmul.f32 25.0, %v1434_v3  ;;  %v1451_v11 = vmul.f32 %v6428_v10, %v6934_v19 }
 0xa9a   :  { %v1452_v12 = vmul.f32 25.0, %v1451_v11 }
 0xa9b   :  { %1350 = vrot.lane.b32.xlu0 %v6930_v17, %s6801_s28 }
 0xa9f   :  { %1462 = vrot.lane.b32.xlu0 %v1435_v4, %s6800_s27 }
 0xaa3   :  { %1731 = vrot.lane.b32.xlu0 %v6938_v20, %s6802_s29 }
 0xaa7   :  { %1722 = vrot.lane.b32.xlu0 %v6938_v20, %s6803_s0 }
 0xabc   :  { %1344 = vadd.xlane.f32.xlu1 %v1343_v9 }
 0xacd   :  { %1553 = vrot.lane.b32.xlu1 %v1452_v12, %s6800_s27 }
 0xad1   :  { %1748 = vrot.lane.b32.xlu1 %v6942_v21, %s6802_s29 }
 0xad5   :  { %1739 = vrot.lane.b32.xlu1 %v6942_v21, %s6803_s0 }
 0xb06   :  { %v1466_v13 = vpop.permute.xlu1 %1465 }
 0xb07   :  { %6073 = vmatpush3.xpose.msk.msra.mxu0 %vm252_vm1, %v1466_v13 }
 0xb08   :  { %6082 = vmatprep.subr.mxu0 %v6789_v28 }
 0xb0a   :  { %v1557_v23 = vpop.permute.xlu1 %1556 }
 0xb12   :  { %v1254_v14 = vpop.xlane.xlu0 %1253 }
 0xb13   :  { %6429 = vrcp.f32 %v1254_v14 }
 0xb16   :  { %v1351_v15 = vpop.permute.xlu0 %1350 }
 0xb17   :  { %6068 = vmatpush3.msra.mxu1 %v1351_v15 }
 0xb18   :  { %6077 = vmatprep.subr.mxu1 %v6789_v28 }
 0xb1a   :  { %v1463_v22 = vpop.permute.xlu0 %1462 }
 0xb1b   :  { %6075 = vmatmul.mubr.msk.f32.vlgmr.msra.gmra.mrb[14].mxu0 %vm252_vm1, %v1463_v22 }
 0xb1c   :  { %6084 = vmatprep.mubr.msk.f32.mxu0 %vm6790_vm2, %v6789_v28 }
 0xb1d   :  { %v6430_v25 = vpop.eup %6429 }
 0xb1e   :  { %v1256_v27 = vmul.f32 %v6430_v25, %v6418_v57  ;;  %v1732_v38 = vpop.permute.xlu0 %1731 }
 0xb1f   :  { %v1734_v39 = vsel %vm252_vm1, %v1732_v38, 0.0 }
 0xb22   :  { %v1723_v51 = vpop.permute.xlu0 %1722 }
 0xb23   :  { %v1725_v52 = vsel %vm252_vm1, %v1723_v51, 0.0 }
 0xb49   :  { %v1345_v24 = vpop.xlane.xlu1 %1344 }
 0xb4a   :  { %6431 = vrcp.f32 %v1345_v24 }
 0xb4d   :  { %v1554_v35 = vpop.permute.xlu1 %1553 }
 0xb54   :  { %v6432_v26 = vpop.eup %6431 }
 0xb55   :  { %v1347_v29 = vmul.f32 %v6432_v26, %v6426_v8 }
 0xb57   :  { %v1348_v30 = vadd.f32 %v1347_v29, %v1256_v27 }
 0xb59   :  { %v1349_v31 = vmul.f32 0.5, %v1348_v30 }
 0xb5b   :  { %6070 = vmatmul.mubr.msk.f32.vlgmr.msra.gmra.mrb[12].mxu1 %vm362_vm3, %v1349_v31  ;;  %v7154_v32 = vadd.f32 %v1349_v31, %v7109_v34  ;;  %v1749_v34 = vpop.permute.xlu1 %1748 }
 0xb5c   :  { %6078 = vmatpush3.xpose.msk.msra.mxu1 %vm252_vm1, %v1557_v23  ;;  %6079 = vmatprep.mubr.msk.f32.mxu1 %vm6790_vm2, %v6789_v28  ;;  %v1751_v40 = vsel %vm252_vm1, %v1749_v34, 0.0 }
 0xb5d   :  { %6087 = vmatprep.subr.mxu1 %v6789_v28 }
 0xb5f   :  { %6080 = vmatmul.mubr.msk.f32.vlgmr.msra.gmra.mrb[14].mxu1 %vm252_vm1, %v1554_v35  ;;  %v1740_v41 = vpop.permute.xlu1 %1739 }
 0xb60   :  { %6089 = vmatprep.mubr.msk.f32.mxu1 %vm6790_vm2, %v6789_v28  ;;  %v1742_v43 = vsel %vm252_vm1, %v1740_v41, 0.0 }
 0xbee   :  { %v1537_v36 = vpop.f32.mrb[14].mxu0 }
 0xbef   :  { %v6076_v37 = vpop.f32.mrb[15].mxu0  ;;  %v1541_v33 = vsel %vm362_vm3, %v1537_v36, -inf }
 0xbf0   :  { %1542 = vmax.xlane.f32.xlu0 %v1541_v33 }
 0xbf4   :  { %1735 = vadd.xlane.f32.xlu0 %v1734_v39 }
 0xbf8   :  { %1752 = vadd.xlane.f32.xlu0 %v1751_v40 }
 0xbfc   :  { %1743 = vadd.xlane.f32.xlu0 %v1742_v43 }
 0xc2e   :  { %v7167_v44 = vpop.f32.mrb[12].mxu1 }
 0xc2f   :  { %v6071_v47 = vpop.f32.mrb[13].mxu1 }
 0xc32   :  { %v1628_v48 = vpop.f32.mrb[14].mxu1 }
 0xc33   :  { %v6081_v49 = vpop.f32.mrb[15].mxu1  ;;  %v1632_v50 = vsel %vm362_vm3, %v1628_v48, -inf }
 0xc34   :  { %1633 = vmax.xlane.f32.xlu1 %v1632_v50 }
 0xc38   :  { %1726 = vadd.xlane.f32.xlu1 %v1725_v52 }
 0xc7d   :  { %v1543_v53 = vpop.xlane.xlu0 %1542 }
 0xc7e   :  { %v1544_v54 = vsub.f32 %v1537_v36, %v1543_v53 }
 0xc80   :  { %v1545_v55 = vmul.f32 1.442695, %v1544_v54 }
 0xc81   :  { %v1736_v56 = vpop.xlane.xlu0 %1735 }
 0xc82   :  { %6433 = vpow2.f32 %v1545_v55 }
 0xc85   :  { %v1753_v59 = vpop.xlane.xlu0 %1752 }
 0xc86   :  { %6435 = vrsqrt.f32 %v1753_v59 }
 0xc89   :  { %v1744_v7 = vpop.xlane.xlu0 %1743 }
 0xc8c   :  { %v6434_v57 = vpop.eup %6433 }
 0xc8d   :  { %v1547_v58 = vsel %vm362_vm3, %v6434_v57, 0.0 }
 0xc8e   :  { %1548 = vadd.xlane.f32.xlu1 %v1547_v58 }
 0xc90   :  { %v6436_v60 = vpop.eup %6435 }
 0xc91   :  { %v1755_v61 = vmul.f32 %v6436_v60, %v6934_v19 }
 0xc9f   :  { %1645 = vrot.lane.b32.xlu1 %v6930_v17, %s6804_s21 }
 0xca3   :  { %1851 = vrot.lane.b32.xlu1 %v1755_v61, %s6802_s29 }
 0xcc1   :  { %v1634_v62 = vpop.xlane.xlu1 %1633 }
 0xcc2   :  { %v1635_v63 = vsub.f32 %v1628_v48, %v1634_v62 }
 0xcc4   :  { %v1636_v0 = vmul.f32 1.442695, %v1635_v63 }
 0xcc5   :  { %v1727_v1 = vpop.xlane.xlu1 %1726 }
 0xcc6   :  { %6437 = vpow2.f32 %v1636_v0 }
 0xcc7   :  { %6439 = vrsqrt.f32 %v1727_v1 }
 0xcc8   :  { %6441 = vrsqrt.f32 %v1736_v56 }
 0xcc9   :  { %6443 = vrsqrt.f32 %v1744_v7 }
 0xcd0   :  { %v6438_v2 = vpop.eup %6437 }
 0xcd1   :  { %v6440_v3 = vpop.eup %6439  ;;  %v1638_v4 = vsel %vm362_vm3, %v6438_v2, 0.0 }
 0xcd2   :  { %1639 = vadd.xlane.f32.xlu0 %v1638_v4  ;;  %v1729_v5 = vmul.f32 %v6440_v3, %v6930_v17  ;;  %v6442_v8 = vpop.eup %6441 }
 0xcd3   :  { %v6444_v9 = vpop.eup %6443  ;;  %v1738_v10 = vmul.f32 %v6442_v8, %v6930_v17 }
 0xcd4   :  { %v1730_v6 = vmul.f32 25.0, %v1729_v5  ;;  %v1746_v11 = vmul.f32 %v6444_v9, %v6934_v19 }
 0xcd6   :  { %1757 = vrot.lane.b32.xlu1 %v1730_v6, %s6803_s0  ;;  %v1747_v12 = vmul.f32 25.0, %v1746_v11 }
 0xcda   :  { %2026 = vrot.lane.b32.xlu1 %v6938_v20, %s6805_s7 }
 0xcde   :  { %2017 = vrot.lane.b32.xlu1 %v6938_v20, %s6806_s8 }
 0xce8   :  { %1760 = vrot.lane.b32.xlu0 %v1738_v10, %s6802_s29 }
 0xcec   :  { %1848 = vrot.lane.b32.xlu0 %v1747_v12, %s6803_s0 }
 0xcf0   :  { %2043 = vrot.lane.b32.xlu0 %v6942_v21, %s6805_s7 }
 0xcf4   :  { %2034 = vrot.lane.b32.xlu0 %v6942_v21, %s6806_s8 }
 0xd1b   :  { %v1549_v13 = vpop.xlane.xlu1 %1548 }
 0xd1c   :  { %6445 = vrcp.f32 %v1549_v13 }
 0xd1f   :  { %v1646_v14 = vpop.permute.xlu1 %1645 }
 0xd20   :  { %6083 = vmatpush3.msra.mxu0 %v1646_v14 }
 0xd21   :  { %6092 = vmatprep.subr.mxu0 %v6789_v28 }
 0xd23   :  { %v1852_v22 = vpop.permute.xlu1 %1851 }
 0xd26   :  { %v6446_v25 = vpop.eup %6445 }
 0xd27   :  { %v1551_v27 = vmul.f32 %v6446_v25, %v6434_v57 }
 0xd48   :  { %v1758_v24 = vpop.permute.xlu1 %1757 }
 0xd4c   :  { %v2027_v47 = vpop.permute.xlu1 %2026 }
 0xd4d   :  { %v2029_v51 = vsel %vm252_vm1, %v2027_v47, 0.0 }
 0xd50   :  { %v2018_v52 = vpop.permute.xlu1 %2017 }
 0xd51   :  { %v2020_v53 = vsel %vm252_vm1, %v2018_v52, 0.0 }
 0xd5f   :  { %v1640_v15 = vpop.xlane.xlu0 %1639 }
 0xd60   :  { %6447 = vrcp.f32 %v1640_v15 }
 0xd63   :  { %v1761_v23 = vpop.permute.xlu0 %1760 }
 0xd64   :  { %6088 = vmatpush3.xpose.msk.msra.mxu1 %vm252_vm1, %v1761_v23 }
 0xd65   :  { %6097 = vmatprep.subr.mxu1 %v6789_v28 }
 0xd67   :  { %6090 = vmatmul.mubr.msk.f32.vlgmr.msra.gmra.mrb[16].mxu1 %vm252_vm1, %v1758_v24  ;;  %v1849_v36 = vpop.permute.xlu0 %1848 }
 0xd68   :  { %6099 = vmatprep.mubr.msk.f32.mxu1 %vm6790_vm2, %v6789_v28 }
 0xd6a   :  { %v6448_v26 = vpop.eup %6447 }
 0xd6b   :  { %v1642_v29 = vmul.f32 %v6448_v26, %v6438_v2  ;;  %v2044_v37 = vpop.permute.xlu0 %2043 }
 0xd6d   :  { %v1643_v30 = vadd.f32 %v1642_v29, %v1551_v27 }
 0xd6f   :  { %v1644_v31 = vmul.f32 0.5, %v1643_v30  ;;  %v2035_v39 = vpop.permute.xlu0 %2034 }
 0xd70   :  { %v2037_v40 = vsel %vm252_vm1, %v2035_v39, 0.0 }
 0xd71   :  { %6085 = vmatmul.mubr.msk.f32.vlgmr.msra.gmra.mrb[16].mxu0 %vm362_vm3, %v1644_v31  ;;  %v7199_v35 = vadd.f32 %v1644_v31, %v7154_v32  ;;  %v2046_v32 = vsel %vm252_vm1, %v2044_v37, 0.0 }
 0xd72   :  { %6093 = vmatpush3.xpose.msk.msra.mxu0 %vm252_vm1, %v1852_v22  ;;  %6094 = vmatprep.mubr.msk.f32.mxu0 %vm6790_vm2, %v6789_v28 }
 0xd73   :  { %6102 = vmatprep.subr.mxu0 %v6789_v28 }
 0xd75   :  { %6095 = vmatmul.mubr.msk.f32.vlgmr.msra.gmra.mrb[18].mxu0 %vm252_vm1, %v1849_v36 }
 0xd76   :  { %6104 = vmatprep.mubr.msk.f32.mxu0 %vm6790_vm2, %v6789_v28 }
 0xe3a   :  { %v1832_v33 = vpop.f32.mrb[16].mxu1 }
 0xe3b   :  { %v6091_v38 = vpop.f32.mrb[17].mxu1  ;;  %v1836_v34 = vsel %vm362_vm3, %v1832_v33, -inf }
 0xe3c   :  { %1837 = vmax.xlane.f32.xlu1 %v1836_v34 }
 0xe40   :  { %2047 = vadd.xlane.f32.xlu1 %v2046_v32 }
 0xe44   :  { %v7211_v41 = vpop.f32.mrb[16].mxu0  ;;  %2038 = vadd.xlane.f32.xlu1 %v2037_v40 }
 0xe45   :  { %v6086_v43 = vpop.f32.mrb[17].mxu0 }
 0xe48   :  { %v1923_v48 = vpop.f32.mrb[18].mxu0 }
 0xe49   :  { %v6096_v49 = vpop.f32.mrb[19].mxu0  ;;  %v1927_v50 = vsel %vm362_vm3, %v1923_v48, -inf }
 0xe4a   :  { %1928 = vmax.xlane.f32.xlu0 %v1927_v50 }
 0xe4e   :  { %2030 = vadd.xlane.f32.xlu0 %v2029_v51 }
 0xe52   :  { %2021 = vadd.xlane.f32.xlu0 %v2020_v53 }
 0xec9   :  { %v1838_v54 = vpop.xlane.xlu1 %1837 }
 0xeca   :  { %v1839_v55 = vsub.f32 %v1832_v33, %v1838_v54 }
 0xecc   :  { %v1840_v56 = vmul.f32 1.442695, %v1839_v55 }
 0xecd   :  { %v2048_v61 = vpop.xlane.xlu1 %2047 }
 0xece   :  { %6449 = vpow2.f32 %v1840_v56 }
 0xed1   :  { %v2039_v8 = vpop.xlane.xlu1 %2038 }
 0xed7   :  { %v1929_v57 = vpop.xlane.xlu0 %1928 }
 0xed8   :  { %v6450_v58 = vpop.eup %6449  ;;  %v1930_v6 = vsub.f32 %v1923_v48, %v1929_v57 }
 0xed9   :  { %v1842_v59 = vsel %vm362_vm3, %v6450_v58, 0.0 }
 0xeda   :  { %1843 = vadd.xlane.f32.xlu0 %v1842_v59  ;;  %v1931_v7 = vmul.f32 1.442695, %v1930_v6 }
 0xedb   :  { %v2031_v60 = vpop.xlane.xlu0 %2030 }
 0xedc   :  { %6451 = vrsqrt.f32 %v2031_v60 }
 0xedd   :  { %6453 = vrsqrt.f32 %v2048_v61 }
 0xedf   :  { %v2022_v62 = vpop.xlane.xlu0 %2021 }
 0xee0   :  { %6455 = vrsqrt.f32 %v2022_v62 }
 0xee1   :  { %6457 = vpow2.f32 %v1931_v7 }
 0xee2   :  { %6459 = vrsqrt.f32 %v2039_v8 }
 0xee6   :  { %v6452_v63 = vpop.eup %6451 }
 0xee7   :  { %v2033_v0 = vmul.f32 %v6452_v63, %v6930_v17  ;;  %v6454_v1 = vpop.eup %6453 }
 0xee8   :  { %v2050_v3 = vmul.f32 %v6454_v1, %v6934_v19 }
 0xee9   :  { %2055 = vrot.lane.b32.xlu1 %v2033_v0, %s6805_s7 }
 0xeea   :  { %v6456_v2 = vpop.eup %6455 }
 0xeeb   :  { %v2024_v4 = vmul.f32 %v6456_v2, %v6930_v17  ;;  %v6458_v9 = vpop.eup %6457 }
 0xeec   :  { %v1933_v10 = vsel %vm362_vm3, %v6458_v9, 0.0  ;;  %v6460_v11 = vpop.eup %6459 }
 0xeed   :  { %2146 = vrot.lane.b32.xlu1 %v2050_v3, %s6805_s7  ;;  %v2025_v5 = vmul.f32 25.0, %v2024_v4  ;;  %v2041_v12 = vmul.f32 %v6460_v11, %v6934_v19 }
 0xeef   :  { %v2042_v13 = vmul.f32 25.0, %v2041_v12 }
 0xef0   :  { %1940 = vrot.lane.b32.xlu0 %v6930_v17, %s6807_s9 }
 0xef4   :  { %2052 = vrot.lane.b32.xlu0 %v2025_v5, %s6806_s8 }
 0xef8   :  { %2321 = vrot.lane.b32.xlu0 %v6938_v20, %s6808_s10 }
 0xefc   :  { %2312 = vrot.lane.b32.xlu0 %v6938_v20, %s6809_s11 }
 0xf11   :  { %1934 = vadd.xlane.f32.xlu1 %v1933_v10  ;;  %v7271_v10 = vmul.f32 %v6928_v16, %v6928_v16 }
 0xf22   :  { %2143 = vrot.lane.b32.xlu1 %v2042_v13, %s6806_s8 }
 0xf26   :  { %2338 = vrot.lane.b32.xlu1 %v6942_v21, %s6808_s10 }
 0xf2a   :  { %2329 = vrot.lane.b32.xlu1 %v6942_v21, %s6809_s11 }
 0xf5b   :  { %v2056_v14 = vpop.permute.xlu1 %2055 }
 0xf5c   :  { %6103 = vmatpush3.xpose.msk.msra.mxu0 %vm252_vm1, %v2056_v14 }
 0xf5d   :  { %6112 = vmatprep.subr.mxu0 %v6789_v28 }
 0xf5f   :  { %v2147_v24 = vpop.permute.xlu1 %2146 }
 0xf67   :  { %v1844_v15 = vpop.xlane.xlu0 %1843 }
 0xf68   :  { %6461 = vrcp.f32 %v1844_v15 }
 0xf6b   :  { %v1941_v22 = vpop.permute.xlu0 %1940 }
 0xf6c   :  { %6098 = vmatpush3.msra.mxu1 %v1941_v22  ;;  %v7281_v22 = vmul.f32 %v6932_v18, %v6932_v18 }
 0xf6d   :  { %6107 = vmatprep.subr.mxu1 %v6789_v28 }
 0xf6f   :  { %v2053_v23 = vpop.permute.xlu0 %2052 }
 0xf70   :  { %6105 = vmatmul.mubr.msk.f32.vlgmr.msra.gmra.mrb[20].mxu0 %vm252_vm1, %v2053_v23 }
 0xf71   :  { %6114 = vmatprep.mubr.msk.f32.mxu0 %vm6790_vm2, %v6789_v28 }
 0xf72   :  { %v6462_v21 = vpop.eup %6461 }
 0xf73   :  { %v1846_v27 = vmul.f32 %v6462_v21, %v6450_v58  ;;  %v2322_v32 = vpop.permute.xlu0 %2321 }
 0xf74   :  { %v2324_v39 = vsel %vm252_vm1, %v2322_v32, 0.0 }
 0xf77   :  { %v2313_v53 = vpop.permute.xlu0 %2312 }
 0xf78   :  { %v2315_v54 = vsel %vm252_vm1, %v2313_v53, 0.0 }
 0xf9e   :  { %v1935_v25 = vpop.xlane.xlu1 %1934 }
 0xf9f   :  { %6463 = vrcp.f32 %v1935_v25 }
 0xfa2   :  { %v2144_v37 = vpop.permute.xlu1 %2143 }
 0xfa9   :  { %v6464_v26 = vpop.eup %6463 }
 0xfaa   :  { %v1937_v29 = vmul.f32 %v6464_v26, %v6458_v9 }
 0xfac   :  { %v1938_v30 = vadd.f32 %v1937_v29, %v1846_v27 }
 0xfae   :  { %v1939_v31 = vmul.f32 0.5, %v1938_v30 }
 0xfb0   :  { %6100 = vmatmul.mubr.msk.f32.vlgmr.msra.gmra.mrb[18].mxu1 %vm362_vm3, %v1939_v31  ;;  %v7244_v36 = vadd.f32 %v1939_v31, %v7199_v35  ;;  %v2339_v35 = vpop.permute.xlu1 %2338 }
 0xfb1   :  { %6108 = vmatpush3.xpose.msk.msra.mxu1 %vm252_vm1, %v2147_v24  ;;  %6109 = vmatprep.mubr.msk.f32.mxu1 %vm6790_vm2, %v6789_v28  ;;  %v2341_v40 = vsel %vm252_vm1, %v2339_v35, 0.0 }
 0xfb2   :  { %6117 = vmatprep.subr.mxu1 %v6789_v28 }
 0xfb4   :  { %6110 = vmatmul.mubr.msk.f32.vlgmr.msra.gmra.mrb[20].mxu1 %vm252_vm1, %v2144_v37  ;;  %v2330_v43 = vpop.permute.xlu1 %2329 }
 0xfb5   :  { %6119 = vmatprep.mubr.msk.f32.mxu1 %vm6790_vm2, %v6789_v28  ;;  %v2332_v47 = vsel %vm252_vm1, %v2330_v43, 0.0  ;;  %v3362_v43 = vsel %vm252_vm1, %v7281_v22, 0.0 }
0x1043   :  { %v2127_v33 = vpop.f32.mrb[20].mxu0 }
0x1044   :  { %v6106_v38 = vpop.f32.mrb[21].mxu0  ;;  %v2131_v34 = vsel %vm362_vm3, %v2127_v33, -inf }
0x1045   :  { %2132 = vmax.xlane.f32.xlu0 %v2131_v34 }
0x1049   :  { %2325 = vadd.xlane.f32.xlu0 %v2324_v39 }
0x104d   :  { %2342 = vadd.xlane.f32.xlu0 %v2341_v40 }
0x1051   :  { %2333 = vadd.xlane.f32.xlu0 %v2332_v47 }
0x1083   :  { %v7257_v48 = vpop.f32.mrb[18].mxu1 }
0x1084   :  { %v6101_v49 = vpop.f32.mrb[19].mxu1 }
0x1087   :  { %v2218_v50 = vpop.f32.mrb[20].mxu1 }
0x1088   :  { %v6111_v51 = vpop.f32.mrb[21].mxu1  ;;  %v2222_v52 = vsel %vm362_vm3, %v2218_v50, -inf }
0x1089   :  { %2223 = vmax.xlane.f32.xlu1 %v2222_v52 }
0x108d   :  { %2316 = vadd.xlane.f32.xlu1 %v2315_v54 }
0x10d2   :  { %v2133_v55 = vpop.xlane.xlu0 %2132 }
0x10d3   :  { %v2134_v56 = vsub.f32 %v2127_v33, %v2133_v55 }
0x10d5   :  { %v2135_v57 = vmul.f32 1.442695, %v2134_v56 }
0x10d6   :  { %v2326_v58 = vpop.xlane.xlu0 %2325 }
0x10d7   :  { %6465 = vpow2.f32 %v2135_v57 }
0x10da   :  { %v2343_v61 = vpop.xlane.xlu0 %2342 }
0x10db   :  { %6467 = vrsqrt.f32 %v2343_v61 }
0x10de   :  { %v2334_v9 = vpop.xlane.xlu0 %2333 }
0x10e1   :  { %v6466_v59 = vpop.eup %6465 }
0x10e2   :  { %v2137_v60 = vsel %vm362_vm3, %v6466_v59, 0.0 }
0x10e3   :  { %2138 = vadd.xlane.f32.xlu1 %v2137_v60 }
0x10e5   :  { %v6468_v62 = vpop.eup %6467 }
0x10e6   :  { %v2345_v63 = vmul.f32 %v6468_v62, %v6934_v19  ;;  %v3346_v62 = vsel %vm252_vm1, %v7271_v10, 0.0 }
0x10f4   :  { %2235 = vrot.lane.b32.xlu1 %v6930_v17, %s6810_s12 }
0x10f8   :  { %2441 = vrot.lane.b32.xlu1 %v2345_v63, %s6808_s10 }
0x1116   :  { %v2224_v0 = vpop.xlane.xlu1 %2223 }
0x1117   :  { %v2225_v1 = vsub.f32 %v2218_v50, %v2224_v0 }
0x1119   :  { %v2226_v2 = vmul.f32 1.442695, %v2225_v1 }
0x111a   :  { %v2317_v3 = vpop.xlane.xlu1 %2316 }
0x111b   :  { %6469 = vpow2.f32 %v2226_v2 }
0x111c   :  { %6471 = vrsqrt.f32 %v2317_v3 }
0x111d   :  { %6473 = vrsqrt.f32 %v2326_v58 }
0x111e   :  { %6475 = vrsqrt.f32 %v2334_v9 }
0x1125   :  { %v6470_v4 = vpop.eup %6469 }
0x1126   :  { %v6472_v5 = vpop.eup %6471  ;;  %v2228_v6 = vsel %vm362_vm3, %v6470_v4, 0.0 }
0x1127   :  { %2229 = vadd.xlane.f32.xlu0 %v2228_v6  ;;  %v2319_v7 = vmul.f32 %v6472_v5, %v6930_v17  ;;  %v6474_v11 = vpop.eup %6473 }
0x1128   :  { %v6476_v12 = vpop.eup %6475  ;;  %v2328_v13 = vmul.f32 %v6474_v11, %v6930_v17 }
0x1129   :  { %v2320_v8 = vmul.f32 25.0, %v2319_v7  ;;  %v2336_v14 = vmul.f32 %v6476_v12, %v6934_v19 }
0x112b   :  { %2347 = vrot.lane.b32.xlu1 %v2320_v8, %s6809_s11  ;;  %v2337_v15 = vmul.f32 25.0, %v2336_v14 }
0x112f   :  { %3353 = vrot.lane.b32.xlu1 %v7271_v10, %s6787_s3 }
0x113d   :  { %2350 = vrot.lane.b32.xlu0 %v2328_v13, %s6808_s10 }
0x1141   :  { %2438 = vrot.lane.b32.xlu0 %v2337_v15, %s6809_s11 }
0x1145   :  { %3369 = vrot.lane.b32.xlu0 %v7281_v22, %s6787_s3 }
0x1170   :  { %v2139_v23 = vpop.xlane.xlu1 %2138 }
0x1171   :  { %6477 = vrcp.f32 %v2139_v23 }
0x1174   :  { %v2236_v24 = vpop.permute.xlu1 %2235 }
0x1175   :  { %6113 = vmatpush3.msra.mxu0 %v2236_v24 }
0x1176   :  { %6122 = vmatprep.subr.mxu0 %v6789_v28 }
0x1178   :  { %v2442_v19 = vpop.permute.xlu1 %2441 }
0x117b   :  { %v6478_v27 = vpop.eup %6477 }
0x117c   :  { %v2141_v30 = vmul.f32 %v6478_v27, %v6466_v59 }
0x119d   :  { %v2348_v26 = vpop.permute.xlu1 %2347 }
0x11a1   :  { %v3354_v53 = vpop.permute.xlu1 %3353 }
0x11a2   :  { %v3356_v54 = vsel %vm252_vm1, %v3354_v53, 0.0 }
0x11b4   :  { %v2230_v25 = vpop.xlane.xlu0 %2229 }
0x11b5   :  { %6479 = vrcp.f32 %v2230_v25 }
0x11b8   :  { %v2351_v21 = vpop.permute.xlu0 %2350 }
0x11b9   :  { %6118 = vmatpush3.xpose.msk.msra.mxu1 %vm252_vm1, %v2351_v21 }
0x11ba   :  { %6127 = vmatprep.subr.mxu1 %v6789_v28 }
0x11bc   :  { %6120 = vmatmul.mubr.msk.f32.vlgmr.msra.gmra.mrb[22].mxu1 %vm252_vm1, %v2348_v26  ;;  %v2439_v34 = vpop.permute.xlu0 %2438 }
0x11bd   :  { %6129 = vmatprep.mubr.msk.f32.mxu1 %vm6790_vm2, %v6789_v28 }
0x11bf   :  { %v6480_v29 = vpop.eup %6479 }
0x11c0   :  { %v2232_v31 = vmul.f32 %v6480_v29, %v6470_v4  ;;  %v3370_v40 = vpop.permute.xlu0 %3369 }
0x11c2   :  { %v2233_v37 = vadd.f32 %v2232_v31, %v2141_v30 }
0x11c4   :  { %v2234_v33 = vmul.f32 0.5, %v2233_v37 }
0x11c6   :  { %6115 = vmatmul.mubr.msk.f32.vlgmr.msra.gmra.mrb[22].mxu0 %vm362_vm3, %v2234_v33  ;;  %v7293_v38 = vadd.f32 %v2234_v33, %v7244_v36  ;;  %v3372_v36 = vsel %vm252_vm1, %v3370_v40, 0.0 }
0x11c7   :  { %6123 = vmatpush3.xpose.msk.msra.mxu0 %vm252_vm1, %v2442_v19  ;;  %6124 = vmatprep.mubr.msk.f32.mxu0 %vm6790_vm2, %v6789_v28 }
0x11c8   :  { %6132 = vmatprep.subr.mxu0 %v6789_v28 }
0x11ca   :  { %6125 = vmatmul.mubr.msk.f32.vlgmr.msra.gmra.mrb[24].mxu0 %vm252_vm1, %v2439_v34 }
0x11cb   :  { %6134 = vmatprep.mubr.msk.f32.mxu0 %vm6790_vm2, %v6789_v28 }
0x128f   :  { %v2422_v32 = vpop.f32.mrb[22].mxu1 }
0x1290   :  { %v6121_v35 = vpop.f32.mrb[23].mxu1  ;;  %v2426_v39 = vsel %vm362_vm3, %v2422_v32, -inf }
0x1291   :  { %2427 = vmax.xlane.f32.xlu1 %v2426_v39 }
0x1295   :  { %3373 = vadd.xlane.f32.xlu1 %v3372_v36 }
0x1299   :  { %v7306_v47 = vpop.f32.mrb[22].mxu0  ;;  %3363 = vadd.xlane.f32.xlu1 %v3362_v43 }
0x129a   :  { %v6116_v49 = vpop.f32.mrb[23].mxu0 }
0x129d   :  { %v2513_v50 = vpop.f32.mrb[24].mxu0 }
0x129e   :  { %v6126_v51 = vpop.f32.mrb[25].mxu0  ;;  %v2517_v52 = vsel %vm362_vm3, %v2513_v50, -inf }
0x129f   :  { %2518 = vmax.xlane.f32.xlu0 %v2517_v52 }
0x12a3   :  { %3357 = vadd.xlane.f32.xlu0 %v3356_v54 }
0x131e   :  { %v2428_v55 = vpop.xlane.xlu1 %2427 }
0x131f   :  { %v2429_v56 = vsub.f32 %v2422_v32, %v2428_v55 }
0x1321   :  { %v2430_v57 = vmul.f32 1.442695, %v2429_v56 }
0x1322   :  { %v3374_v4 = vpop.xlane.xlu1 %3373 }
0x1323   :  { %6481 = vpow2.f32 %v2430_v57 }
0x1326   :  { %v3364_v12 = vpop.xlane.xlu1 %3363 }
0x132c   :  { %v2519_v58 = vpop.xlane.xlu0 %2518 }
0x132d   :  { %v6482_v59 = vpop.eup %6481  ;;  %v2520_v1 = vsub.f32 %v2513_v50, %v2519_v58 }
0x132e   :  { %v2432_v60 = vsel %vm362_vm3, %v6482_v59, 0.0 }
0x132f   :  { %2433 = vadd.xlane.f32.xlu0 %v2432_v60  ;;  %v2521_v2 = vmul.f32 1.442695, %v2520_v1 }
0x1330   :  { %v3358_v61 = vpop.xlane.xlu0 %3357 }
0x1331   :  { %6483 = vrsqrt.f32 %v3358_v61 }
0x1332   :  { %6485 = vpow2.f32 %v2521_v2 }
0x1333   :  { %3347 = vadd.xlane.f32.xlu0 %v3346_v62  ;;  %6487 = vrsqrt.f32 %v3374_v4 }
0x133b   :  { %v6484_v63 = vpop.eup %6483 }
0x133c   :  { %v3360_v0 = vmul.f32 %v6484_v63, %v6928_v16  ;;  %v6486_v3 = vpop.eup %6485 }
0x133d   :  { %v2523_v5 = vsel %vm362_vm3, %v6486_v3, 0.0  ;;  %v6488_v6 = vpop.eup %6487 }
0x133e   :  { %3378 = vrot.lane.b32.xlu1 %v3360_v0, %s6787_s3  ;;  %v3376_v7 = vmul.f32 %v6488_v6, %v6932_v18 }
0x1349   :  { %2530 = vrot.lane.b32.xlu0 %v6930_v17, %s6811_s13 }
0x134d   :  { %3643 = vrot.lane.b32.xlu0 %v7271_v10, %s6791_s17 }
0x1351   :  { %3660 = vrot.lane.b32.xlu0 %v7281_v22, %s6791_s17 }
0x1362   :  { %2524 = vadd.xlane.f32.xlu1 %v2523_v5 }
0x1373   :  { %3467 = vrot.lane.b32.xlu1 %v3376_v7, %s6787_s3 }
0x1377   :  { %3634 = vrot.lane.b32.xlu1 %v7271_v10, %s6788_s1 }
0x137b   :  { %3651 = vrot.lane.b32.xlu1 %v7281_v22, %s6788_s1 }
0x13b0   :  { %v3379_v13 = vpop.permute.xlu1 %3378 }
0x13bc   :  { %v2434_v8 = vpop.xlane.xlu0 %2433 }
0x13bd   :  { %6489 = vrcp.f32 %v2434_v8 }
0x13c0   :  { %v3348_v9 = vpop.xlane.xlu0 %3347 }
0x13c4   :  { %v2531_v11 = vpop.permute.xlu0 %2530 }
0x13c5   :  { %6128 = vmatpush3.msra.mxu1 %v2531_v11 }
0x13c6   :  { %6172 = vmatprep.subr.mxu1 %v6789_v28 }
0x13c7   :  { %v6490_v15 = vpop.eup %6489 }
0x13c8   :  { %v2436_v24 = vmul.f32 %v6490_v15, %v6482_v59  ;;  %v3644_v35 = vpop.permute.xlu0 %3643 }
0x13c9   :  { %v3646_v52 = vsel %vm252_vm1, %v3644_v35, 0.0 }
0x13cc   :  { %v3661_v53 = vpop.permute.xlu0 %3660 }
0x13cd   :  { %v3663_v55 = vsel %vm252_vm1, %v3661_v53, 0.0 }
0x13ef   :  { %v2525_v14 = vpop.xlane.xlu1 %2524 }
0x13f0   :  { %6491 = vrcp.f32 %v2525_v14 }
0x13f1   :  { %6493 = vrsqrt.f32 %v3348_v9 }
0x13f2   :  { %6495 = vrsqrt.f32 %v3364_v12 }
0x13f3   :  { %v3468_v33 = vpop.permute.xlu1 %3467 }
0x13f7   :  { %v3635_v43 = vpop.permute.xlu1 %3634 }
0x13f8   :  { %v3637_v54 = vsel %vm252_vm1, %v3635_v43, 0.0 }
0x13fa   :  { %v6492_v23 = vpop.eup %6491 }
0x13fb   :  { %v2527_v25 = vmul.f32 %v6492_v23, %v6486_v3  ;;  %v6494_v19 = vpop.eup %6493  ;;  %v3652_v56 = vpop.permute.xlu1 %3651 }
0x13fc   :  { %v3350_v27 = vmul.f32 %v6494_v19, %v6928_v16  ;;  %v6496_v29 = vpop.eup %6495  ;;  %v3654_v57 = vsel %vm252_vm1, %v3652_v56, 0.0 }
0x13fd   :  { %v2528_v21 = vadd.f32 %v2527_v25, %v2436_v24  ;;  %v3366_v37 = vmul.f32 %v6496_v29, %v6932_v18 }
0x13fe   :  { %v3351_v31 = vmul.f32 25.0, %v3350_v27 }
0x13ff   :  { %v2529_v26 = vmul.f32 0.5, %v2528_v21 }
0x1401   :  { %6130 = vmatmul.mubr.msk.f32.vlgmr.msra.gmra.mrb[24].mxu1 %vm362_vm3, %v2529_v26  ;;  %v7332_v30 = vadd.f32 %v2529_v26, %v7293_v38  ;;  %v3367_v38 = vmul.f32 25.0, %v3366_v37 }
0x1402   :  { %6173 = vmatpush3.xpose.msk.msra.mxu1 %vm252_vm1, %v3379_v13  ;;  %6174 = vmatprep.mubr.msk.f32.mxu1 %vm6790_vm2, %v6789_v28 }
0x1403   :  { %6177 = vmatprep.subr.mxu1 %v6789_v28 }
0x1405   :  { %6175 = vmatmul.mubr.msk.f32.vlgmr.msra.gmra.mrb[26].mxu1 %vm252_vm1, %v3351_v31 }
0x1406   :  { %6178 = vmatpush3.xpose.msk.msra.mxu1 %vm252_vm1, %v3468_v33  ;;  %6179 = vmatprep.mubr.msk.f32.mxu1 %vm6790_vm2, %v6789_v28 }
0x1407   :  { %6182 = vmatprep.subr.mxu1 %v6789_v28 }
0x1409   :  { %6180 = vmatmul.mubr.msk.f32.vlgmr.msra.gmra.mrb[28].mxu1 %vm252_vm1, %v3367_v38 }
0x140a   :  { %6184 = vmatprep.mubr.msk.f32.mxu1 %vm6790_vm2, %v6789_v28 }
0x14d4   :  { %v7347_v34 = vpop.f32.mrb[24].mxu1 }
0x14d5   :  { %v6131_v32 = vpop.f32.mrb[25].mxu1 }
0x14d8   :  { %v3451_v39 = vpop.f32.mrb[26].mxu1 }
0x14d9   :  { %v6176_v40 = vpop.f32.mrb[27].mxu1  ;;  %v3455_v36 = vsel %vm362_vm3, %v3451_v39, -inf }
0x14da   :  { %3456 = vmax.xlane.f32.xlu0 %v3455_v36 }
0x14dc   :  { %v3540_v49 = vpop.f32.mrb[28].mxu1 }
0x14dd   :  { %v6181_v50 = vpop.f32.mrb[29].mxu1  ;;  %v3544_v51 = vsel %vm362_vm3, %v3540_v49, -inf }
0x14de   :  { %3545 = vmax.xlane.f32.xlu1 %v3544_v51  ;;  %3647 = vadd.xlane.f32.xlu0 %v3646_v52 }
0x14e2   :  { %3638 = vadd.xlane.f32.xlu0 %v3637_v54  ;;  %3664 = vadd.xlane.f32.xlu1 %v3663_v55 }
0x14e6   :  { %3655 = vadd.xlane.f32.xlu0 %v3654_v57 }
0x1567   :  { %v3457_v58 = vpop.xlane.xlu0 %3456 }
0x1568   :  { %v3458_v59 = vsub.f32 %v3451_v39, %v3457_v58 }
0x156a   :  { %v3459_v60 = vmul.f32 1.442695, %v3458_v59 }
0x156b   :  { %v3546_v61 = vpop.xlane.xlu1 %3545  ;;  %v3648_v0 = vpop.xlane.xlu0 %3647 }
0x156c   :  { %6497 = vpow2.f32 %v3459_v60  ;;  %v3547_v62 = vsub.f32 %v3540_v49, %v3546_v61 }
0x156e   :  { %v3548_v63 = vmul.f32 1.442695, %v3547_v62 }
0x156f   :  { %v3639_v2 = vpop.xlane.xlu0 %3638  ;;  %v3665_v6 = vpop.xlane.xlu1 %3664 }
0x1570   :  { %6499 = vpow2.f32 %v3548_v63 }
0x1571   :  { %6501 = vrsqrt.f32 %v3639_v2 }
0x1572   :  { %6503 = vrsqrt.f32 %v3648_v0 }
0x1573   :  { %v3656_v7 = vpop.xlane.xlu0 %3655  ;;  %6505 = vrsqrt.f32 %v3665_v6 }
0x1574   :  { %6507 = vrsqrt.f32 %v3656_v7 }
0x1576   :  { %v6498_v1 = vpop.eup %6497 }
0x1577   :  { %v3461_v3 = vsel %vm362_vm3, %v6498_v1, 0.0 }
0x1578   :  { %3462 = vadd.xlane.f32.xlu1 %v3461_v3 }
0x157a   :  { %v6500_v4 = vpop.eup %6499 }
0x157b   :  { %v3550_v5 = vsel %vm362_vm3, %v6500_v4, 0.0  ;;  %v6502_v8 = vpop.eup %6501 }
0x157c   :  { %3551 = vadd.xlane.f32.xlu0 %v3550_v5  ;;  %v3641_v9 = vmul.f32 %v6502_v8, %v6928_v16  ;;  %v6504_v11 = vpop.eup %6503 }
0x157d   :  { %v6506_v13 = vpop.eup %6505  ;;  %v3650_v23 = vmul.f32 %v6504_v11, %v6928_v16 }
0x157e   :  { %v3642_v12 = vmul.f32 25.0, %v3641_v9  ;;  %v6508_v14 = vpop.eup %6507  ;;  %v3667_v15 = vmul.f32 %v6506_v13, %v6932_v18 }
0x157f   :  { %v3658_v24 = vmul.f32 %v6508_v14, %v6932_v18 }
0x1581   :  { %v3659_v25 = vmul.f32 25.0, %v3658_v24 }
0x1589   :  { %3558 = vrot.lane.b32.xlu1 %v6928_v16, %s6792_s18 }
0x158d   :  { %3669 = vrot.lane.b32.xlu1 %v3642_v12, %s6788_s1 }
0x1591   :  { %3763 = vrot.lane.b32.xlu1 %v3667_v15, %s6791_s17 }
0x1592   :  { %3672 = vrot.lane.b32.xlu0 %v3650_v23, %s6791_s17  ;;  %s6817_s17 = smov 28  }
0x1595   :  { %3937 = vrot.lane.b32.xlu1 %v7271_v10, %s6793_s19 }
0x1596   :  { %3760 = vrot.lane.b32.xlu0 %v3659_v25, %s6788_s1  ;;  %s6816_s1 = smov 24  }
0x1599   :  { %3954 = vrot.lane.b32.xlu1 %v7281_v22, %s6793_s19 }
0x159a   :  { %3928 = vrot.lane.b32.xlu0 %v7271_v10, %s6794_s20 }
0x159e   :  { %3945 = vrot.lane.b32.xlu0 %v7281_v22, %s6794_s20 }
0x1605   :  { %v3463_v19 = vpop.xlane.xlu1 %3462 }
0x1606   :  { %6509 = vrcp.f32 %v3463_v19 }
0x1609   :  { %v3559_v21 = vpop.permute.xlu1 %3558  ;;  %v3552_v26 = vpop.xlane.xlu0 %3551 }
0x160a   :  { %6511 = vrcp.f32 %v3552_v26  ;;  %6183 = vmatpush3.msra.mxu1 %v3559_v21 }
0x160b   :  { %6187 = vmatprep.subr.mxu1 %v6789_v28 }
0x160d   :  { %v3670_v38 = vpop.permute.xlu1 %3669  ;;  %v3673_v35 = vpop.permute.xlu0 %3672 }
0x1610   :  { %v6510_v27 = vpop.eup %6509 }
0x1611   :  { %v3465_v31 = vmul.f32 %v6510_v27, %v6498_v1  ;;  %v3764_v39 = vpop.permute.xlu1 %3763  ;;  %v3761_v40 = vpop.permute.xlu0 %3760 }
0x1614   :  { %v6512_v29 = vpop.eup %6511 }
0x1615   :  { %v3554_v37 = vmul.f32 %v6512_v29, %v6500_v4  ;;  %v3929_v49 = vpop.permute.xlu0 %3928  ;;  %v3938_v53 = vpop.permute.xlu1 %3937 }
0x1616   :  { %v3931_v57 = vsel %vm252_vm1, %v3929_v49, 0.0  ;;  %v3940_v59 = vsel %vm252_vm1, %v3938_v53, 0.0 }
0x1617   :  { %v3555_v33 = vadd.f32 %v3554_v37, %v3465_v31 }
0x1619   :  { %v3556_v32 = vmul.f32 0.5, %v3555_v33  ;;  %v3946_v58 = vpop.permute.xlu0 %3945  ;;  %v3955_v61 = vpop.permute.xlu1 %3954 }
0x161a   :  { %v3948_v60 = vsel %vm252_vm1, %v3946_v58, 0.0  ;;  %v3957_v62 = vsel %vm252_vm1, %v3955_v61, 0.0 }
0x161b   :  { %6185 = vmatmul.mubr.msk.f32.vlgmr.msra.gmra.mrb[30].mxu1 %vm362_vm3, %v3556_v32 }
0x161c   :  { %6188 = vmatpush3.xpose.msk.msra.mxu1 %vm252_vm1, %v3673_v35  ;;  %6189 = vmatprep.mubr.msk.f32.mxu1 %vm6790_vm2, %v6789_v28 }
0x161d   :  { %6192 = vmatprep.subr.mxu1 %v6789_v28 }
0x161f   :  { %6190 = vmatmul.mubr.msk.f32.vlgmr.msra.gmra.mrb[32].mxu1 %vm252_vm1, %v3670_v38 }
0x1620   :  { %6193 = vmatpush3.xpose.msk.msra.mxu1 %vm252_vm1, %v3764_v39  ;;  %6194 = vmatprep.mubr.msk.f32.mxu1 %vm6790_vm2, %v6789_v28 }
0x1621   :  { %6197 = vmatprep.subr.mxu1 %v6789_v28 }
0x1623   :  { %6195 = vmatmul.mubr.msk.f32.vlgmr.msra.gmra.mrb[34].mxu1 %vm252_vm1, %v3761_v40 }
0x1624   :  { %6199 = vmatprep.mubr.msk.f32.mxu1 %vm6790_vm2, %v6789_v28 }
0x16ee   :  { %v7389_v36 = vpop.f32.mrb[30].mxu1 }
0x16ef   :  { %v6186_v43 = vpop.f32.mrb[31].mxu1 }
0x16f2   :  { %v3744_v50 = vpop.f32.mrb[32].mxu1 }
0x16f3   :  { %v6191_v51 = vpop.f32.mrb[33].mxu1  ;;  %v3748_v52 = vsel %vm362_vm3, %v3744_v50, -inf }
0x16f4   :  { %3749 = vmax.xlane.f32.xlu1 %v3748_v52 }
0x16f6   :  { %v3835_v54 = vpop.f32.mrb[34].mxu1 }
0x16f7   :  { %v6196_v55 = vpop.f32.mrb[35].mxu1  ;;  %v3839_v56 = vsel %vm362_vm3, %v3835_v54, -inf }
0x16f8   :  { %3840 = vmax.xlane.f32.xlu0 %v3839_v56  ;;  %3932 = vadd.xlane.f32.xlu1 %v3931_v57 }
0x16fc   :  { %3941 = vadd.xlane.f32.xlu0 %v3940_v59  ;;  %3949 = vadd.xlane.f32.xlu1 %v3948_v60 }
0x1700   :  { %3958 = vadd.xlane.f32.xlu0 %v3957_v62 }
0x1781   :  { %v3750_v63 = vpop.xlane.xlu1 %3749 }
0x1782   :  { %v3751_v0 = vsub.f32 %v3744_v50, %v3750_v63 }
0x1784   :  { %v3752_v1 = vmul.f32 1.442695, %v3751_v0 }
0x1785   :  { %v3841_v2 = vpop.xlane.xlu0 %3840  ;;  %v3933_v14 = vpop.xlane.xlu1 %3932 }
0x1786   :  { %6513 = vpow2.f32 %v3752_v1  ;;  %v3842_v11 = vsub.f32 %v3835_v54, %v3841_v2 }
0x1788   :  { %v3843_v13 = vmul.f32 1.442695, %v3842_v11 }
0x1789   :  { %v3942_v3 = vpop.xlane.xlu0 %3941  ;;  %v3950_v23 = vpop.xlane.xlu1 %3949 }
0x178a   :  { %6515 = vrsqrt.f32 %v3942_v3 }
0x178d   :  { %v3959_v8 = vpop.xlane.xlu0 %3958 }
0x178e   :  { %6517 = vrsqrt.f32 %v3959_v8 }
0x178f   :  { %6519 = vpow2.f32 %v3843_v13 }
0x1790   :  { %v6514_v4 = vpop.eup %6513  ;;  %6521 = vrsqrt.f32 %v3933_v14 }
0x1791   :  { %v3754_v5 = vsel %vm362_vm3, %v6514_v4, 0.0  ;;  %6523 = vrsqrt.f32 %v3950_v23 }
0x1792   :  { %3755 = vadd.xlane.f32.xlu0 %v3754_v5 }
0x1794   :  { %v6516_v6 = vpop.eup %6515 }
0x1795   :  { %v3944_v7 = vmul.f32 %v6516_v6, %v6928_v16 }
0x1797   :  { %3966 = vrot.lane.b32.xlu1 %v3944_v7, %s6793_s19 }
0x1798   :  { %v6518_v9 = vpop.eup %6517 }
0x1799   :  { %v3961_v12 = vmul.f32 %v6518_v9, %v6932_v18  ;;  %v6520_v15 = vpop.eup %6519 }
0x179a   :  { %v3845_v24 = vsel %vm362_vm3, %v6520_v15, 0.0  ;;  %v6522_v25 = vpop.eup %6521 }
0x179b   :  { %v3935_v19 = vmul.f32 %v6522_v25, %v6928_v16  ;;  %v6524_v21 = vpop.eup %6523 }
0x179c   :  { %v3952_v27 = vmul.f32 %v6524_v21, %v6932_v18 }
0x179d   :  { %v3936_v26 = vmul.f32 25.0, %v3935_v19 }
0x179e   :  { %v3953_v29 = vmul.f32 25.0, %v3952_v27 }
0x17a8   :  { %3852 = vrot.lane.b32.xlu0 %v6928_v16, %s6795_s22 }
0x17ac   :  { %4057 = vrot.lane.b32.xlu0 %v3961_v12, %s6793_s19 }
0x17b0   :  { %2661 = vrot.lane.b32.xlu0 %v6938_v20, %s6795_s22 }
0x17b4   :  { %2819 = vrot.lane.b32.xlu0 %v6938_v20, %s6798_s25 }
0x17b8   :  { %2987 = vrot.lane.b32.xlu0 %v6938_v20, %s6804_s21 }
0x17bb   :  { %3846 = vadd.xlane.f32.xlu1 %v3845_v24 }
0x17bc   :  { %3155 = vrot.lane.b32.xlu0 %v6938_v20, %s6810_s12 }
0x17cc   :  { %3963 = vrot.lane.b32.xlu1 %v3936_v26, %s6794_s20 }
0x17d0   :  { %4054 = vrot.lane.b32.xlu1 %v3953_v29, %s6794_s20 }
0x17d4   :  { %2653 = vrot.lane.b32.xlu1 %v6938_v20, %s6792_s18 }
0x17d8   :  { %2903 = vrot.lane.b32.xlu1 %v6938_v20, %s6801_s28 }
0x17dc   :  { %3071 = vrot.lane.b32.xlu1 %v6938_v20, %s6807_s9 }
0x17e0   :  { %3239 = vrot.lane.b32.xlu1 %v6938_v20, %s6811_s13 }
0x17e4   :  { %4231 = vrot.lane.b32.xlu1 %v7271_v10, %s6796_s23 }
0x17e8   :  { %4248 = vrot.lane.b32.xlu1 %v7281_v22, %s6796_s23 }
0x1809   :  { %v3967_v20 = vpop.permute.xlu1 %3966 }
0x181f   :  { %v3756_v31 = vpop.xlane.xlu0 %3755 }
0x1820   :  { %6525 = vrcp.f32 %v3756_v31 }
0x1823   :  { %v3853_v37 = vpop.permute.xlu0 %3852 }
0x1824   :  { %6198 = vmatpush3.msra.mxu1 %v3853_v37 }
0x1825   :  { %6202 = vmatprep.subr.mxu1 %v6789_v28 }
0x1827   :  { %v4058_v33 = vpop.permute.xlu0 %4057 }
0x182a   :  { %v6526_v43 = vpop.eup %6525 }
0x182b   :  { %v2662_v38 = vpop.permute.xlu0 %2661  ;;  %v3758_v50 = vmul.f32 %v6526_v43, %v6514_v4 }
0x182c   :  { %v2664_v32 = vsel %vm252_vm1, %v2662_v38, 0.0 }
0x182d   :  { %2665 = vadd.xlane.f32.xlu0 %v2664_v32 }
0x182f   :  { %v2820_v56 = vpop.permute.xlu0 %2819 }
0x1830   :  { %v2822_v57 = vsel %vm252_vm1, %v2820_v56, 0.0 }
0x1833   :  { %v2988_v60 = vpop.permute.xlu0 %2987 }
0x1837   :  { %v3156_v63 = vpop.permute.xlu0 %3155 }
0x1838   :  { %v3158_v0 = vsel %vm252_vm1, %v3156_v63, 0.0 }
0x1843   :  { %4222 = vrot.lane.b32.xlu0 %v7271_v10, %s6797_s24 }
0x1848   :  { %v3847_v35 = vpop.xlane.xlu1 %3846 }
0x1849   :  { %6527 = vrcp.f32 %v3847_v35 }
0x184c   :  { %v3964_v39 = vpop.permute.xlu1 %3963 }
0x1850   :  { %v4055_v40 = vpop.permute.xlu1 %4054 }
0x1853   :  { %v6528_v49 = vpop.eup %6527 }
0x1854   :  { %v3849_v51 = vmul.f32 %v6528_v49, %v6520_v15  ;;  %v2654_v52 = vpop.permute.xlu1 %2653 }
0x1855   :  { %v2656_v53 = vsel %vm252_vm1, %v2654_v52, 0.0 }
0x1856   :  { %2657 = vadd.xlane.f32.xlu1 %v2656_v53  ;;  %v3850_v54 = vadd.f32 %v3849_v51, %v3758_v50 }
0x1858   :  { %v3851_v55 = vmul.f32 0.5, %v3850_v54  ;;  %v2904_v58 = vpop.permute.xlu1 %2903 }
0x1859   :  { %v2906_v62 = vsel %vm252_vm1, %v2904_v58, 0.0 }
0x185a   :  { %6200 = vmatmul.mubr.msk.f32.vlgmr.msra.gmra.mrb[36].mxu1 %vm362_vm3, %v3851_v55 }
0x185b   :  { %6203 = vmatpush3.xpose.msk.msra.mxu1 %vm252_vm1, %v3967_v20  ;;  %6204 = vmatprep.mubr.msk.f32.mxu1 %vm6790_vm2, %v6789_v28  ;;  %v2990_v20 = vsel %vm252_vm1, %v2988_v60, 0.0 }
0x185c   :  { %6207 = vmatprep.subr.mxu1 %v6789_v28  ;;  %v3072_v59 = vpop.permute.xlu1 %3071 }
0x185d   :  { %v3074_v35 = vsel %vm252_vm1, %v3072_v59, 0.0 }
0x185e   :  { %6205 = vmatmul.mubr.msk.f32.vlgmr.msra.gmra.mrb[38].mxu1 %vm252_vm1, %v3964_v39 }
0x185f   :  { %6208 = vmatpush3.xpose.msk.msra.mxu1 %vm252_vm1, %v4058_v33  ;;  %6209 = vmatprep.mubr.msk.f32.mxu1 %vm6790_vm2, %v6789_v28 }
0x1860   :  { %6217 = vmatprep.subr.mxu1 %v6789_v28  ;;  %v3240_v61 = vpop.permute.xlu1 %3239 }
0x1861   :  { %v3242_v39 = vsel %vm252_vm1, %v3240_v61, 0.0 }
0x1862   :  { %2823 = vadd.xlane.f32.xlu0 %v2822_v57  ;;  %6210 = vmatmul.mubr.msk.f32.vlgmr.msra.gmra.mrb[40].mxu1 %vm252_vm1, %v4055_v40 }
0x1863   :  { %6219 = vmatprep.mubr.msk.f32.mxu1 %vm6790_vm2, %v6789_v28 }
0x1864   :  { %v4232_v1 = vpop.permute.xlu1 %4231 }
0x1865   :  { %v4234_v2 = vsel %vm252_vm1, %v4232_v1, 0.0 }
0x1867   :  { %4239 = vrot.lane.b32.xlu1 %v7281_v22, %s6797_s24 }
0x1868   :  { %v4249_v12 = vpop.permute.xlu1 %4248 }
0x1869   :  { %v4251_v40 = vsel %vm252_vm1, %v4249_v12, 0.0 }
0x188b   :  { %2907 = vadd.xlane.f32.xlu1 %v2906_v62 }
0x188f   :  { %3159 = vadd.xlane.f32.xlu1 %v3158_v0 }
0x1893   :  { %4235 = vadd.xlane.f32.xlu1 %v4234_v2 }
0x18ba   :  { %v2666_v3 = vpop.xlane.xlu0 %2665 }
0x18bb   :  { %6529 = vrsqrt.f32 %v2666_v3 }
0x18be   :  { %v4223_v4 = vpop.permute.xlu0 %4222 }
0x18bf   :  { %v4225_v5 = vsel %vm252_vm1, %v4223_v4, 0.0 }
0x18c0   :  { %4226 = vadd.xlane.f32.xlu1 %v4225_v5 }
0x18c5   :  { %v6530_v6 = vpop.eup %6529 }
0x18c6   :  { %v2668_v7 = vmul.f32 %v6530_v6, %v6930_v17 }
0x18d1   :  { %2670 = vrot.lane.b32.xlu1 %v2668_v7, %s6795_s22 }
0x18e3   :  { %v2658_v13 = vpop.xlane.xlu1 %2657 }
0x18e7   :  { %v4240_v14 = vpop.permute.xlu1 %4239 }
0x18e8   :  { %v4242_v49 = vsel %vm252_vm1, %v4240_v14, 0.0 }
0x18ef   :  { %v2824_v8 = vpop.xlane.xlu0 %2823 }
0x18f0   :  { %6531 = vrsqrt.f32 %v2824_v8 }
0x18fa   :  { %v6532_v9 = vpop.eup %6531 }
0x18fb   :  { %v2826_v11 = vmul.f32 %v6532_v9, %v6930_v17 }
0x18fd   :  { %2828 = vrot.lane.b32.xlu1 %v2826_v11, %s6798_s25 }
0x1918   :  { %v2908_v15 = vpop.xlane.xlu1 %2907 }
0x1919   :  { %6533 = vrsqrt.f32 %v2908_v15 }
0x191c   :  { %v3160_v23 = vpop.xlane.xlu1 %3159 }
0x191d   :  { %6535 = vrsqrt.f32 %v3160_v23 }
0x191e   :  { %6537 = vrsqrt.f32 %v2658_v13 }
0x1920   :  { %v4236_v43 = vpop.xlane.xlu1 %4235 }
0x1923   :  { %v6534_v24 = vpop.eup %6533 }
0x1924   :  { %v2910_v25 = vmul.f32 %v6534_v24, %v6930_v17 }
0x1926   :  { %2912 = vrot.lane.b32.xlu1 %v2910_v25, %s6801_s28 }
0x1927   :  { %v6536_v19 = vpop.eup %6535 }
0x1928   :  { %v3162_v21 = vmul.f32 %v6536_v19, %v6930_v17  ;;  %v6538_v52 = vpop.eup %6537 }
0x1929   :  { %v2660_v53 = vmul.f32 %v6538_v52, %v6930_v17 }
0x192a   :  { %3164 = vrot.lane.b32.xlu1 %v3162_v21, %s6810_s12 }
0x192d   :  { %v7462_v26 = vpop.f32.mrb[36].mxu1 }
0x192e   :  { %v6201_v27 = vpop.f32.mrb[37].mxu1 }
0x1931   :  { %v7464_v29 = vpop.f32.mrb[38].mxu1 }
0x1932   :  { %v6206_v31 = vpop.f32.mrb[39].mxu1  ;;  %v4042_v37 = vsel %vm362_vm3, %v7464_v29, -inf }
0x1933   :  { %4043 = vmax.xlane.f32.xlu0 %v4042_v37 }
0x1935   :  { %v7468_v33 = vpop.f32.mrb[40].mxu1 }
0x1936   :  { %v6211_v38 = vpop.f32.mrb[41].mxu1  ;;  %v4133_v32 = vsel %vm362_vm3, %v7468_v33, -inf }
0x1937   :  { %4134 = vmax.xlane.f32.xlu0 %v4133_v32 }
0x193b   :  { %2991 = vadd.xlane.f32.xlu0 %v2990_v20 }
0x193f   :  { %3075 = vadd.xlane.f32.xlu0 %v3074_v35 }
0x1943   :  { %3243 = vadd.xlane.f32.xlu0 %v3242_v39 }
0x1947   :  { %4252 = vadd.xlane.f32.xlu0 %v4251_v40 }
0x194b   :  { %4243 = vadd.xlane.f32.xlu0 %v4242_v49 }
0x194d   :  { %v4227_v50 = vpop.xlane.xlu1 %4226 }
0x1951   :  { %v2671_v51 = vpop.permute.xlu1 %2670 }
0x1952   :  { %6133 = vmatpush3.xpose.msk.msra.mxu0 %vm252_vm1, %v2671_v51 }
0x1953   :  { %6137 = vmatprep.subr.mxu0 %v6789_v28 }
0x1955   :  { %6135 = vmatmul.mubr.msk.f32.vlgmr.msra.gmra.mrb[26].mxu0 %vm252_vm1, %v2671_v51 }
0x1956   :  { %6139 = vmatprep.mubr.msk.f32.mxu0 %vm6790_vm2, %v6789_v28 }
0x1961   :  { %2745 = vrot.lane.b32.xlu0 %v2660_v53, %s6792_s18 }
0x196f   :  { %v2829_v5 = vpop.permute.xlu1 %2828 }
0x1998   :  { %v2913_v7 = vpop.permute.xlu1 %2912 }
0x19c0   :  { %v4044_v54 = vpop.xlane.xlu0 %4043 }
0x19c1   :  { %v4045_v11 = vsub.f32 %v7464_v29, %v4044_v54 }
0x19c3   :  { %v4046_v12 = vmul.f32 1.442695, %v4045_v11 }
0x19c4   :  { %v4135_v55 = vpop.xlane.xlu0 %4134 }
0x19c5   :  { %v4136_v8 = vsub.f32 %v7468_v33, %v4135_v55 }
0x19c7   :  { %v4137_v9 = vmul.f32 1.442695, %v4136_v8 }
0x19c8   :  { %v2992_v56 = vpop.xlane.xlu0 %2991 }
0x19c9   :  { %6539 = vrsqrt.f32 %v2992_v56 }
0x19cc   :  { %v3076_v57 = vpop.xlane.xlu0 %3075 }
0x19cd   :  { %6541 = vrsqrt.f32 %v3076_v57 }
0x19d0   :  { %v3244_v58 = vpop.xlane.xlu0 %3243 }
0x19d1   :  { %6543 = vrsqrt.f32 %v3244_v58 }
0x19d2   :  { %6545 = vrsqrt.f32 %v4236_v43 }
0x19d3   :  { %v6540_v59 = vpop.eup %6539  ;;  %6547 = vpow2.f32 %v4137_v9 }
0x19d4   :  { %v4253_v60 = vpop.xlane.xlu0 %4252  ;;  %v2994_v61 = vmul.f32 %v6540_v59, %v6930_v17  ;;  %6549 = vpow2.f32 %v4046_v12 }
0x19d5   :  { %6551 = vrsqrt.f32 %v4227_v50 }
0x19d6   :  { %2996 = vrot.lane.b32.xlu0 %v2994_v61, %s6804_s21  ;;  %6553 = vrsqrt.f32 %v4253_v60 }
0x19d7   :  { %v6542_v62 = vpop.eup %6541 }
0x19d8   :  { %v4244_v63 = vpop.xlane.xlu0 %4243  ;;  %v3078_v0 = vmul.f32 %v6542_v62, %v6930_v17 }
0x19d9   :  { %6555 = vrsqrt.f32 %v4244_v63 }
0x19da   :  { %3080 = vrot.lane.b32.xlu0 %v3078_v0, %s6807_s9 }
0x19db   :  { %v6544_v1 = vpop.eup %6543 }
0x19dc   :  { %v2746_v2 = vpop.permute.xlu0 %2745  ;;  %v3246_v3 = vmul.f32 %v6544_v1, %v6930_v17  ;;  %v6546_v4 = vpop.eup %6545 }
0x19dd   :  { %6138 = vmatpush3.xpose.msk.msra.mxu0 %vm252_vm1, %v2746_v2  ;;  %v4238_v6 = vmul.f32 %v6546_v4, %v6928_v16  ;;  %v7511_v13 = vpop.eup %6547 }
0x19de   :  { %3248 = vrot.lane.b32.xlu1 %v3246_v3, %s6811_s13  ;;  %6142 = vmatprep.subr.mxu0 %v6789_v28  ;;  %v4139_v14 = vsel %vm362_vm3, %v7511_v13, 0.0  ;;  %v7515_v15 = vpop.eup %6549 }
0x19df   :  { %4146 = vrot.lane.b32.xlu0 %v6928_v16, %s6798_s25  ;;  %v4048_v23 = vsel %vm362_vm3, %v7515_v15, 0.0  ;;  %v6552_v24 = vpop.eup %6551 }
0x19e0   :  { %6140 = vmatmul.mubr.msk.f32.vlgmr.msra.gmra.mrb[26].mxu0 %vm252_vm1, %v2746_v2  ;;  %v6554_v25 = vpop.eup %6553  ;;  %v4229_v21 = vmul.f32 %v6552_v24, %v6928_v16 }
0x19e1   :  { %6143 = vmatpush3.xpose.msk.msra.mxu0 %vm252_vm1, %v2829_v5  ;;  %6144 = vmatprep.mubr.msk.f32.mxu0 %vm6790_vm2, %v6789_v28  ;;  %v4255_v27 = vmul.f32 %v6554_v25, %v6932_v18 }
0x19e2   :  { %4260 = vrot.lane.b32.xlu1 %v4238_v6, %s6796_s23  ;;  %6147 = vmatprep.subr.mxu0 %v6789_v28  ;;  %v4230_v31 = vmul.f32 25.0, %v4229_v21 }
0x19e3   :  { %v6556_v19 = vpop.eup %6555 }
0x19e4   :  { %v4246_v29 = vmul.f32 %v6556_v19, %v6932_v18 }
0x19e6   :  { %v4247_v37 = vmul.f32 25.0, %v4246_v29 }
0x19e8   :  { %6145 = vmatmul.mubr.msk.f32.vlgmr.msra.gmra.mrb[26].mxu0 %vm252_vm1, %v2829_v5 }
0x19e9   :  { %6148 = vmatpush3.xpose.msk.msra.mxu0 %vm252_vm1, %v2913_v7  ;;  %6149 = vmatprep.mubr.msk.f32.mxu0 %vm6790_vm2, %v6789_v28 }
0x19ea   :  { %6152 = vmatprep.subr.mxu0 %v6789_v28 }
0x19f0   :  { %6150 = vmatmul.mubr.msk.f32.vlgmr.msra.gmra.mrb[26].mxu0 %vm252_vm1, %v2913_v7 }
0x19f1   :  { %6154 = vmatprep.mubr.msk.f32.mxu0 %vm6790_vm2, %v6789_v28 }
0x19fe   :  { %4140 = vadd.xlane.f32.xlu0 %v4139_v14 }
0x1a06   :  { %4049 = vadd.xlane.f32.xlu1 %v4048_v23 }
0x1a14   :  { %4351 = vrot.lane.b32.xlu0 %v4255_v27, %s6796_s23 }
0x1a17   :  { %4257 = vrot.lane.b32.xlu1 %v4230_v31, %s6797_s24 }
0x1a18   :  { %4348 = vrot.lane.b32.xlu0 %v4247_v37, %s6797_s24 }
0x1a1b   :  { %2608 = vrot.lane.b32.xlu1 %v7076_v45, %s6812_s14  ;;  %v7542_v45 = vmul.f32 0.125, %v7332_v30 }
0x1a1c   :  { %2612 = vrot.lane.b32.xlu0 %v7121_v42, %s6784_s6 }
0x1a1f   :  { %2616 = vrot.lane.b32.xlu1 %v7167_v44, %s6813_s15  ;;  %v3327_v44 = vsel %vm362_vm3, %v7542_v45, -inf }
0x1a20   :  { %2620 = vrot.lane.b32.xlu0 %v7211_v41, %s6814_s2  ;;  %v3165_v41 = vpop.permute.xlu1 %3164 }
0x1a23   :  { %2624 = vrot.lane.b32.xlu1 %v7257_v48, %s6815_s16 }
0x1a24   :  { %2628 = vrot.lane.b32.xlu0 %v7306_v47, %s6816_s1 }
0x1a27   :  { %2632 = vrot.lane.b32.xlu1 %v7347_v34, %s6817_s17 }
0x1a28   :  { %2647 = vrot.lane.b32.xlu0 %v6930_v17, %s6787_s3 }
0x1a48   :  { %v2997_v42 = vpop.permute.xlu0 %2996 }
0x1a49   :  { %6153 = vmatpush3.xpose.msk.msra.mxu0 %vm252_vm1, %v2997_v42 }
0x1a4a   :  { %6157 = vmatprep.subr.mxu0 %v6789_v28 }
0x1a4b   :  { %3328 = vmax.xlane.f32.xlu1 %v3327_v44 }
0x1a4c   :  { %6155 = vmatmul.mubr.msk.f32.vlgmr.msra.gmra.mrb[26].mxu0 %vm252_vm1, %v2997_v42  ;;  %v3081_v48 = vpop.permute.xlu0 %3080 }
0x1a4d   :  { %6158 = vmatpush3.xpose.msk.msra.mxu0 %vm252_vm1, %v3081_v48  ;;  %6159 = vmatprep.mubr.msk.f32.mxu0 %vm6790_vm2, %v6789_v28 }
0x1a4e   :  { %6162 = vmatprep.subr.mxu0 %v6789_v28 }
0x1a50   :  { %v3249_v17 = vpop.permute.xlu1 %3248 }
0x1a51   :  { %v4147_v30 = vpop.permute.xlu0 %4146 }
0x1a54   :  { %v4261_v47 = vpop.permute.xlu1 %4260  ;;  %6160 = vmatmul.mubr.msk.f32.vlgmr.msra.gmra.mrb[26].mxu0 %vm252_vm1, %v3081_v48 }
0x1a55   :  { %6218 = vmatpush3.xpose.msk.msra.mxu1 %vm252_vm1, %v4261_v47  ;;  %6163 = vmatpush3.xpose.msk.msra.mxu0 %vm252_vm1, %v3165_v41 }
0x1a56   :  { %6164 = vmatprep.mubr.msk.f32.mxu0 %vm6790_vm2, %v6789_v28  ;;  %6167 = vmatprep.subr.mxu0 %v6789_v28 }
0x1a57   :  { %6227 = vmatprep.subr.mxu1 %v6789_v28 }
0x1a5c   :  { %6165 = vmatmul.mubr.msk.f32.vlgmr.msra.gmra.mrb[26].mxu0 %vm252_vm1, %v3165_v41 }
0x1a5d   :  { %6168 = vmatpush3.xpose.msk.msra.mxu0 %vm252_vm1, %v3249_v17  ;;  %6169 = vmatprep.mubr.msk.f32.mxu0 %vm6790_vm2, %v6789_v28 }
0x1a5e   :  { %6212 = vmatprep.subr.mxu0 %v6789_v28 }
0x1a64   :  { %6170 = vmatmul.mubr.msk.f32.vlgmr.msra.gmra.mrb[26].mxu0 %vm252_vm1, %v3249_v17 }
0x1a65   :  { %6213 = vmatpush3.msra.mxu0 %v4147_v30  ;;  %6214 = vmatprep.mubr.msk.f32.mxu0 %vm6790_vm2, %v6789_v28 }
0x1a66   :  { %6222 = vmatprep.subr.mxu0 %v6789_v28 }
0x1a8b   :  { %v4141_v34 = vpop.xlane.xlu0 %4140 }
0x1a8c   :  { %6557 = vrcp.f32 %v4141_v34 }
0x1a8f   :  { %v4352_v33 = vpop.permute.xlu0 %4351 }
0x1a93   :  { %v4349_v38 = vpop.permute.xlu0 %4348  ;;  %v4050_v32 = vpop.xlane.xlu1 %4049 }
0x1a94   :  { %6559 = vrcp.f32 %v4050_v32 }
0x1a96   :  { %v6558_v40 = vpop.eup %6557 }
0x1a97   :  { %v2613_v20 = vpop.permute.xlu0 %2612  ;;  %v4258_v35 = vpop.permute.xlu1 %4257  ;;  %v4143_v51 = vmul.f32 %v6558_v40, %v7511_v13 }
0x1a98   :  { %6220 = vmatmul.mubr.msk.f32.vlgmr.msra.gmra.mrb[42].mxu1 %vm252_vm1, %v4258_v35 }
0x1a99   :  { %6229 = vmatprep.mubr.msk.f32.mxu1 %vm6790_vm2, %v6789_v28 }
0x1a9b   :  { %v2609_v39 = vpop.permute.xlu1 %2608  ;;  %v2621_v43 = vpop.permute.xlu0 %2620 }
0x1a9c   :  { %v2635_v49 = vsel %vm252_vm1, %v7030_v46, %v2609_v39 }
0x1a9d   :  { %v2636_v54 = vsel %vm362_vm3, %v2635_v49, %v2613_v20 }
0x1a9e   :  { %v6560_v50 = vpop.eup %6559 }
0x1a9f   :  { %v4052_v52 = vmul.f32 %v6560_v50, %v7515_v15  ;;  %v2617_v53 = vpop.permute.xlu1 %2616  ;;  %v2629_v57 = vpop.permute.xlu0 %2628 }
0x1aa0   :  { %v2638_v55 = vsel %vm2637_vm4, %v2636_v54, %v2617_v53 }
0x1aa1   :  { %v4144_v56 = vadd.f32 %v4143_v51, %v4052_v52  ;;  %v2640_v59 = vsel %vm2639_vm5, %v2638_v55, %v2621_v43 }
0x1aa3   :  { %v2625_v58 = vpop.permute.xlu1 %2624  ;;  %v4145_v60 = vmul.f32 0.5, %v4144_v56  ;;  %v2648_v63 = vpop.permute.xlu0 %2647 }
0x1aa4   :  { %v2642_v46 = vsel %vm2641_vm6, %v2640_v59, %v2625_v58 }
0x1aa5   :  { %6215 = vmatmul.mubr.msk.f32.vlgmr.msra.gmra.mrb[28].mxu0 %vm362_vm3, %v4145_v60  ;;  %v2644_v62 = vsel %vm2643_vm7, %v2642_v46, %v2629_v57 }
0x1aa6   :  { %6223 = vmatpush3.xpose.msk.msra.mxu0 %vm252_vm1, %v4352_v33  ;;  %6224 = vmatprep.mubr.msk.f32.mxu0 %vm6790_vm2, %v6789_v28 }
0x1aa7   :  { %v2633_v61 = vpop.permute.xlu1 %2632  ;;  %6232 = vmatprep.subr.mxu0 %v6789_v28 }
0x1aa8   :  { %v2646_v0 = vsel %vm2645_vm8, %v2644_v62, %v2633_v61 }
0x1aa9   :  { %v2650_v1 = vsel %vm88_vm0, %v2646_v0, %v2648_v63  ;;  %6225 = vmatmul.mubr.msk.f32.vlgmr.msra.gmra.mrb[30].mxu0 %vm252_vm1, %v4349_v38 }
0x1aaa   :  { %6234 = vmatprep.mubr.msk.f32.mxu0 %vm6790_vm2, %v6789_v28  ;;  %2652 = vst.msk [vmem:[#allocation10] sm:$0xff] %vm2651_vm9, %v2650_v1 }
0x1ad8   :  { %v3329_v2 = vpop.xlane.xlu1 %3328 }
0x1ad9   :  { %v3330_v3 = vsub.f32 %v7542_v45, %v3329_v2 }
0x1adb   :  { %v3331_v4 = vmul.f32 1.442695, %v3330_v3 }
0x1add   :  { %6561 = vpow2.f32 %v3331_v4 }
0x1ae7   :  { %v6562_v5 = vpop.eup %6561 }
0x1ae8   :  { %v3333_v6 = vsel %vm362_vm3, %v6562_v5, 0.0 }
0x1ae9   :  { %3334 = vadd.xlane.f32.xlu0 %v3333_v6 }
0x1b37   :  { %v3318_v7 = vpop.f32.mrb[26].mxu0 }
0x1b38   :  { %v6171_v8 = vpop.f32.mrb[27].mxu0  ;;  %v3323_v23 = vmul.f32 0.125, %v3318_v7 }
0x1b3a   :  { %vm3324_vm10 = vcmp.gt.f32.partialorder %v3323_v23, 0.75 }
0x1b3b   :  { %v3325_v27 = vsel %vm3324_vm10, 1.0, %v6789_v28 }
0x1b6b   :  { %v4332_v9 = vpop.f32.mrb[42].mxu1 }
0x1b6c   :  { %v6221_v11 = vpop.f32.mrb[43].mxu1  ;;  %v4336_v12 = vsel %vm362_vm3, %v4332_v9, -inf }
0x1b6d   :  { %4337 = vmax.xlane.f32.xlu1 %v4336_v12 }
0x1b76   :  { %v3335_v13 = vpop.xlane.xlu0 %3334 }
0x1b77   :  { %6563 = vrcp.f32 %v3335_v13 }
0x1b78   :  { %v7595_v14 = vpop.f32.mrb[28].mxu0 }
0x1b79   :  { %v6216_v15 = vpop.f32.mrb[29].mxu0 }
0x1b7c   :  { %v4423_v24 = vpop.f32.mrb[30].mxu0 }
0x1b7d   :  { %v6226_v25 = vpop.f32.mrb[31].mxu0  ;;  %v4427_v34 = vsel %vm362_vm3, %v4423_v24, -inf }
0x1b7e   :  { %4440 = vrot.lane.b32.xlu1 %v6928_v16, %s6801_s28 }
0x1b81   :  { %v6564_v19 = vpop.eup %6563 }
0x1b82   :  { %v3337_v21 = vmul.f32 %v6564_v19, %v6562_v5 }
0x1b84   :  { %v3338_v29 = vmul.f32 %v3337_v21, %v3325_v27 }
0x1b86   :  { %v3339_v31 = vsel %vm362_vm3, %v3338_v29, 0.0 }
0x1b87   :  { %3340 = vadd.xlane.f32.xlu0 %v3339_v31 }
0x1b9d   :  { %4516 = vrot.lane.b32.xlu0 %v7271_v10, %s6800_s27 }
0x1ba1   :  { %4525 = vrot.lane.b32.xlu0 %v7271_v10, %s6799_s26 }
0x1bfa   :  { %v4338_v37 = vpop.xlane.xlu1 %4337 }
0x1bfb   :  { %v4339_v42 = vsub.f32 %v4332_v9, %v4338_v37 }
0x1bfd   :  { %v4340_v44 = vmul.f32 1.442695, %v4339_v42 }
0x1bfe   :  { %v4441_v45 = vpop.permute.xlu1 %4440 }
0x1bff   :  { %6228 = vmatpush3.msra.mxu1 %v4441_v45  ;;  %6565 = vpow2.f32 %v4340_v44 }
0x1c00   :  { %6237 = vmatprep.subr.mxu1 %v6789_v28 }
0x1c09   :  { %v6566_v33 = vpop.eup %6565 }
0x1c0a   :  { %v4342_v20 = vsel %vm362_vm3, %v6566_v33, 0.0 }
0x1c14   :  { %v3341_v41 = vpop.xlane.xlu0 %3340 }
0x1c15   :  { %6567 = vrcp.f32 %v3341_v41 }
0x1c18   :  { %v4517_v48 = vpop.permute.xlu0 %4516 }
0x1c19   :  { %v4519_v17 = vsel %vm252_vm1, %v4517_v48, 0.0 }
0x1c1a   :  { %4520 = vadd.xlane.f32.xlu1 %v4519_v17 }
0x1c1c   :  { %v4526_v47 = vpop.permute.xlu0 %4525 }
0x1c1d   :  { %v4528_v30 = vsel %vm252_vm1, %v4526_v47, 0.0 }
0x1c1e   :  { %4428 = vmax.xlane.f32.xlu1 %v4427_v34  ;;  %4529 = vadd.xlane.f32.xlu0 %v4528_v30 }
0x1c1f   :  { %v6568_v38 = vpop.eup %6567 }
0x1c20   :  { %v3343_v32 = vmul.f32 %v6568_v38, %v3338_v29 }
0x1c22   :  { %4343 = vadd.xlane.f32.xlu0 %v4342_v20  ;;  %3344 = vst.msk [vmem:[#allocation11] sm:$0xff] %vm362_vm3, %v3343_v32 }
0x1c2f   :  { %4533 = vrot.lane.b32.xlu1 %v7281_v22, %s6800_s27 }
0x1ca7   :  { %v4521_v35 = vpop.xlane.xlu1 %4520 }
0x1ca8   :  { %6569 = vrsqrt.f32 %v4521_v35 }
0x1cab   :  { %v4429_v39 = vpop.xlane.xlu1 %4428  ;;  %v4530_v49 = vpop.xlane.xlu0 %4529 }
0x1cac   :  { %6571 = vrsqrt.f32 %v4530_v49  ;;  %v4430_v55 = vsub.f32 %v4423_v24, %v4429_v39 }
0x1cae   :  { %v4431_v56 = vmul.f32 1.442695, %v4430_v55 }
0x1caf   :  { %v4534_v40 = vpop.permute.xlu1 %4533  ;;  %v4344_v59 = vpop.xlane.xlu0 %4343 }
0x1cb0   :  { %v4536_v43 = vsel %vm252_vm1, %v4534_v40, 0.0  ;;  %6573 = vpow2.f32 %v4431_v56 }
0x1cb1   :  { %4537 = vadd.xlane.f32.xlu0 %v4536_v43 }
0x1cb2   :  { %v6570_v50 = vpop.eup %6569 }
0x1cb3   :  { %v4523_v51 = vmul.f32 %v6570_v50, %v6928_v16 }
0x1cb5   :  { %v4524_v52 = vmul.f32 25.0, %v4523_v51 }
0x1cb6   :  { %v6572_v53 = vpop.eup %6571 }
0x1cb7   :  { %v4532_v54 = vmul.f32 %v6572_v53, %v6928_v16 }
0x1cba   :  { %v6574_v57 = vpop.eup %6573 }
0x1cbb   :  { %v4433_v58 = vsel %vm362_vm3, %v6574_v57, 0.0 }
0x1cc7   :  { %4542 = vrot.lane.b32.xlu0 %v7281_v22, %s6799_s26 }
0x1ccb   :  { %4551 = vrot.lane.b32.xlu0 %v4524_v52, %s6800_s27 }
0x1ccf   :  { %4554 = vrot.lane.b32.xlu0 %v4532_v54, %s6799_s26 }
0x1cee   :  { %4434 = vadd.xlane.f32.xlu0 %v4433_v58 }
0x1d3e   :  { %v4538_v60 = vpop.xlane.xlu0 %4537 }
0x1d3f   :  { %6575 = vrsqrt.f32 %v4538_v60 }
0x1d40   :  { %6577 = vrcp.f32 %v4344_v59 }
0x1d42   :  { %v4543_v46 = vpop.permute.xlu0 %4542 }
0x1d43   :  { %v4545_v61 = vsel %vm252_vm1, %v4543_v46, 0.0 }
0x1d44   :  { %4546 = vadd.xlane.f32.xlu1 %v4545_v61 }
0x1d46   :  { %v4552_v62 = vpop.permute.xlu0 %4551 }
0x1d49   :  { %v6576_v0 = vpop.eup %6575 }
0x1d4a   :  { %v4555_v63 = vpop.permute.xlu0 %4554  ;;  %v4540_v1 = vmul.f32 %v6576_v0, %v6932_v18  ;;  %v6578_v4 = vpop.eup %6577 }
0x1d4b   :  { %6233 = vmatpush3.xpose.msk.msra.mxu0 %vm252_vm1, %v4555_v63  ;;  %v4346_v6 = vmul.f32 %v6578_v4, %v6566_v33 }
0x1d4c   :  { %6242 = vmatprep.subr.mxu0 %v6789_v28  ;;  %v4541_v2 = vmul.f32 25.0, %v4540_v1 }
0x1d4e   :  { %6235 = vmatmul.mubr.msk.f32.vlgmr.msra.gmra.mrb[32].mxu0 %vm252_vm1, %v4552_v62 }
0x1d4f   :  { %6244 = vmatprep.mubr.msk.f32.mxu0 %vm6790_vm2, %v6789_v28 }
0x1d55   :  { %4642 = vrot.lane.b32.xlu1 %v4541_v2, %s6800_s27 }
0x1d59   :  { %4734 = vrot.lane.b32.xlu1 %v6928_v16, %s6804_s21 }
0x1d7b   :  { %v4435_v3 = vpop.xlane.xlu0 %4434 }
0x1d7c   :  { %6579 = vrcp.f32 %v4435_v3 }
0x1d86   :  { %v6580_v5 = vpop.eup %6579 }
0x1d87   :  { %v4437_v7 = vmul.f32 %v6580_v5, %v6574_v57 }
0x1d89   :  { %v4438_v8 = vadd.f32 %v4437_v7, %v4346_v6 }
0x1d8b   :  { %v4439_v9 = vmul.f32 0.5, %v4438_v8 }
0x1d8d   :  { %6230 = vmatmul.mubr.msk.f32.vlgmr.msra.gmra.mrb[44].mxu1 %vm362_vm3, %v4439_v9 }
0x1d8e   :  { %6239 = vmatprep.mubr.msk.f32.mxu1 %vm6790_vm2, %v6789_v28 }
0x1dd1   :  { %v4547_v11 = vpop.xlane.xlu1 %4546 }
0x1dd2   :  { %6581 = vrsqrt.f32 %v4547_v11 }
0x1dd5   :  { %v4643_v12 = vpop.permute.xlu1 %4642 }
0x1dd9   :  { %v4735_v13 = vpop.permute.xlu1 %4734 }
0x1dda   :  { %6243 = vmatpush3.msra.mxu0 %v4735_v13 }
0x1ddb   :  { %6252 = vmatprep.subr.mxu0 %v6789_v28 }
0x1ddc   :  { %v6582_v15 = vpop.eup %6581 }
0x1ddd   :  { %v4549_v23 = vmul.f32 %v6582_v15, %v6932_v18 }
0x1e21   :  { %v4626_v24 = vpop.f32.mrb[32].mxu0 }
0x1e22   :  { %v6236_v25 = vpop.f32.mrb[33].mxu0  ;;  %v4630_v19 = vsel %vm362_vm3, %v4626_v24, -inf }
0x1e23   :  { %4631 = vmax.xlane.f32.xlu0 %v4630_v19 }
0x1e39   :  { %4645 = vrot.lane.b32.xlu0 %v4549_v23, %s6799_s26 }
0x1e3d   :  { %4810 = vrot.lane.b32.xlu0 %v7271_v10, %s6803_s0 }
0x1e41   :  { %4819 = vrot.lane.b32.xlu0 %v7271_v10, %s6802_s29 }
0x1e60   :  { %v7642_v21 = vpop.f32.mrb[44].mxu1 }
0x1e61   :  { %v6231_v27 = vpop.f32.mrb[45].mxu1 }
0x1eb0   :  { %v4632_v29 = vpop.xlane.xlu0 %4631 }
0x1eb1   :  { %v4633_v31 = vsub.f32 %v4626_v24, %v4632_v29 }
0x1eb3   :  { %v4634_v37 = vmul.f32 1.442695, %v4633_v31 }
0x1eb4   :  { %v4646_v45 = vpop.permute.xlu0 %4645 }
0x1eb5   :  { %6583 = vpow2.f32 %v4634_v37  ;;  %6238 = vmatpush3.xpose.msk.msra.mxu1 %vm252_vm1, %v4646_v45 }
0x1eb6   :  { %6247 = vmatprep.subr.mxu1 %v6789_v28 }
0x1eb8   :  { %6240 = vmatmul.mubr.msk.f32.vlgmr.msra.gmra.mrb[46].mxu1 %vm252_vm1, %v4643_v12  ;;  %v4811_v42 = vpop.permute.xlu0 %4810 }
0x1eb9   :  { %v4813_v44 = vsel %vm252_vm1, %v4811_v42, 0.0  ;;  %6249 = vmatprep.mubr.msk.f32.mxu1 %vm6790_vm2, %v6789_v28 }
0x1eba   :  { %4814 = vadd.xlane.f32.xlu1 %v4813_v44 }
0x1ebc   :  { %v4820_v41 = vpop.permute.xlu0 %4819 }
0x1ebd   :  { %v4822_v48 = vsel %vm252_vm1, %v4820_v41, 0.0 }
0x1ebe   :  { %4823 = vadd.xlane.f32.xlu0 %v4822_v48 }
0x1ebf   :  { %v7651_v17 = vpop.eup %6583 }
0x1ec0   :  { %v4636_v47 = vsel %vm362_vm3, %v7651_v17, 0.0 }
0x1ec1   :  { %4637 = vadd.xlane.f32.xlu1 %v4636_v47 }
0x1ed4   :  { %4836 = vrot.lane.b32.xlu0 %v7281_v22, %s6802_s29 }
0x1f47   :  { %v4815_v40 = vpop.xlane.xlu1 %4814 }
0x1f4b   :  { %v4824_v30 = vpop.xlane.xlu0 %4823 }
0x1f4c   :  { %6585 = vrsqrt.f32 %v4824_v30 }
0x1f4d   :  { %6587 = vrsqrt.f32 %v4815_v40 }
0x1f4e   :  { %v4638_v43 = vpop.xlane.xlu1 %4637 }
0x1f4f   :  { %v4837_v34 = vpop.permute.xlu0 %4836 }
0x1f50   :  { %v4839_v33 = vsel %vm252_vm1, %v4837_v34, 0.0 }
0x1f51   :  { %4840 = vadd.xlane.f32.xlu0 %v4839_v33 }
0x1f56   :  { %v6586_v38 = vpop.eup %6585 }
0x1f57   :  { %v4826_v32 = vmul.f32 %v6586_v38, %v6928_v16  ;;  %v6588_v53 = vpop.eup %6587 }
0x1f58   :  { %v4817_v54 = vmul.f32 %v6588_v53, %v6928_v16 }
0x1f5a   :  { %v4818_v55 = vmul.f32 25.0, %v4817_v54 }
0x1f8b   :  { %v4717_v20 = vpop.f32.mrb[46].mxu1 }
0x1f8c   :  { %v6241_v35 = vpop.f32.mrb[47].mxu1  ;;  %v4721_v39 = vsel %vm362_vm3, %v4717_v20, -inf }
0x1f8d   :  { %4722 = vmax.xlane.f32.xlu1 %v4721_v39 }
0x1f9e   :  { %4827 = vrot.lane.b32.xlu1 %v7281_v22, %s6803_s0 }
0x1fde   :  { %v4841_v2 = vpop.xlane.xlu0 %4840 }
0x201a   :  { %v4723_v49 = vpop.xlane.xlu1 %4722 }
0x201b   :  { %v4724_v50 = vsub.f32 %v4717_v20, %v4723_v49 }
0x201d   :  { %v4725_v46 = vmul.f32 1.442695, %v4724_v50 }
0x201e   :  { %v4828_v51 = vpop.permute.xlu1 %4827 }
0x201f   :  { %v4830_v52 = vsel %vm252_vm1, %v4828_v51, 0.0 }
0x2020   :  { %4831 = vadd.xlane.f32.xlu1 %v4830_v52 }
0x2031   :  { %4845 = vrot.lane.b32.xlu1 %v4818_v55, %s6803_s0 }
0x2035   :  { %4848 = vrot.lane.b32.xlu1 %v4826_v32, %s6802_s29 }
0x20ad   :  { %v4832_v56 = vpop.xlane.xlu1 %4831 }
0x20ae   :  { %6589 = vrsqrt.f32 %v4832_v56 }
0x20af   :  { %6591 = vpow2.f32 %v4725_v46 }
0x20b0   :  { %6593 = vrsqrt.f32 %v4841_v2 }
0x20b1   :  { %v4846_v57 = vpop.permute.xlu1 %4845  ;;  %6595 = vrcp.f32 %v4638_v43 }
0x20b5   :  { %v4849_v58 = vpop.permute.xlu1 %4848 }
0x20b6   :  { %6248 = vmatpush3.xpose.msk.msra.mxu1 %vm252_vm1, %v4849_v58 }
0x20b7   :  { %6257 = vmatprep.subr.mxu1 %v6789_v28 }
0x20b8   :  { %v6590_v59 = vpop.eup %6589 }
0x20b9   :  { %6250 = vmatmul.mubr.msk.f32.vlgmr.msra.gmra.mrb[48].mxu1 %vm252_vm1, %v4846_v57  ;;  %v4834_v60 = vmul.f32 %v6590_v59, %v6932_v18  ;;  %v6592_v0 = vpop.eup %6591 }
0x20ba   :  { %6259 = vmatprep.mubr.msk.f32.mxu1 %vm6790_vm2, %v6789_v28  ;;  %v4727_v1 = vsel %vm362_vm3, %v6592_v0, 0.0  ;;  %v6594_v4 = vpop.eup %6593 }
0x20bb   :  { %v4835_v3 = vmul.f32 25.0, %v4834_v60  ;;  %v4843_v5 = vmul.f32 %v6594_v4, %v6932_v18  ;;  %v6596_v11 = vpop.eup %6595 }
0x20bc   :  { %v4640_v23 = vmul.f32 %v6596_v11, %v7651_v17 }
0x218c   :  { %v4920_v61 = vpop.f32.mrb[48].mxu1 }
0x218d   :  { %v6251_v62 = vpop.f32.mrb[49].mxu1  ;;  %v4924_v63 = vsel %vm362_vm3, %v4920_v61, -inf }
0x218e   :  { %4925 = vmax.xlane.f32.xlu0 %v4924_v63 }
0x2192   :  { %4728 = vadd.xlane.f32.xlu0 %v4727_v1 }
0x21a8   :  { %4936 = vrot.lane.b32.xlu0 %v4835_v3, %s6803_s0 }
0x21ac   :  { %4939 = vrot.lane.b32.xlu0 %v4843_v5, %s6802_s29 }
0x221b   :  { %v4926_v6 = vpop.xlane.xlu0 %4925 }
0x221c   :  { %v4927_v7 = vsub.f32 %v4920_v61, %v4926_v6 }
0x221e   :  { %v4928_v8 = vmul.f32 1.442695, %v4927_v7 }
0x221f   :  { %v4729_v9 = vpop.xlane.xlu0 %4728 }
0x2220   :  { %6597 = vpow2.f32 %v4928_v8 }
0x2221   :  { %6599 = vrcp.f32 %v4729_v9 }
0x2223   :  { %v4937_v25 = vpop.permute.xlu0 %4936 }
0x2227   :  { %v4940_v29 = vpop.permute.xlu0 %4939 }
0x222a   :  { %v7677_v12 = vpop.eup %6597 }
0x222b   :  { %v6600_v13 = vpop.eup %6599  ;;  %v4930_v15 = vsel %vm362_vm3, %v7677_v12, 0.0 }
0x222c   :  { %v4731_v24 = vmul.f32 %v6600_v13, %v6592_v0  ;;  %4931 = vadd.xlane.f32.xlu1 %v4930_v15 }
0x222e   :  { %v4732_v19 = vadd.f32 %v4731_v24, %v4640_v23 }
0x2230   :  { %v4733_v27 = vmul.f32 0.5, %v4732_v19 }
0x2232   :  { %6245 = vmatmul.mubr.msk.f32.vlgmr.msra.gmra.mrb[34].mxu0 %vm362_vm3, %v4733_v27 }
0x2233   :  { %6253 = vmatpush3.xpose.msk.msra.mxu0 %vm252_vm1, %v4940_v29  ;;  %6254 = vmatprep.mubr.msk.f32.mxu0 %vm6790_vm2, %v6789_v28 }
0x2234   :  { %6262 = vmatprep.subr.mxu0 %v6789_v28 }
0x2236   :  { %6255 = vmatmul.mubr.msk.f32.vlgmr.msra.gmra.mrb[36].mxu0 %vm252_vm1, %v4937_v25 }
0x2237   :  { %6264 = vmatprep.mubr.msk.f32.mxu0 %vm6790_vm2, %v6789_v28 }
0x223d   :  { %5028 = vrot.lane.b32.xlu1 %v6928_v16, %s6807_s9 }
0x2241   :  { %5104 = vrot.lane.b32.xlu1 %v7271_v10, %s6806_s8 }
0x2245   :  { %5113 = vrot.lane.b32.xlu1 %v7271_v10, %s6805_s7 }
0x2249   :  { %5121 = vrot.lane.b32.xlu1 %v7281_v22, %s6806_s8 }
0x224d   :  { %5130 = vrot.lane.b32.xlu1 %v7281_v22, %s6805_s7 }
0x22b9   :  { %v7700_v31 = vpop.xlane.xlu1 %4931 }
0x22bd   :  { %v5029_v37 = vpop.permute.xlu1 %5028 }
0x22be   :  { %6258 = vmatpush3.msra.mxu1 %v5029_v37 }
0x22bf   :  { %6267 = vmatprep.subr.mxu1 %v6789_v28 }
0x22c1   :  { %v5105_v45 = vpop.permute.xlu1 %5104 }
0x22c2   :  { %v5107_v30 = vsel %vm252_vm1, %v5105_v45, 0.0 }
0x22c5   :  { %v5114_v47 = vpop.permute.xlu1 %5113 }
0x22c6   :  { %v5116_v33 = vsel %vm252_vm1, %v5114_v47, 0.0 }
0x22c9   :  { %v5122_v34 = vpop.permute.xlu1 %5121 }
0x22ca   :  { %v5124_v38 = vsel %vm252_vm1, %v5122_v34, 0.0 }
0x22cd   :  { %v5131_v32 = vpop.permute.xlu1 %5130 }
0x22ce   :  { %v5133_v20 = vsel %vm252_vm1, %v5131_v32, 0.0 }
0x2305   :  { %v7703_v42 = vpop.f32.mrb[34].mxu0 }
0x2306   :  { %v6246_v44 = vpop.f32.mrb[35].mxu0 }
0x2309   :  { %v5011_v41 = vpop.f32.mrb[36].mxu0 }
0x230a   :  { %v6256_v48 = vpop.f32.mrb[37].mxu0  ;;  %v5015_v17 = vsel %vm362_vm3, %v5011_v41, -inf }
0x230b   :  { %5016 = vmax.xlane.f32.xlu0 %v5015_v17 }
0x230f   :  { %5108 = vadd.xlane.f32.xlu0 %v5107_v30 }
0x2313   :  { %5117 = vadd.xlane.f32.xlu0 %v5116_v33 }
0x2317   :  { %5125 = vadd.xlane.f32.xlu0 %v5124_v38 }
0x231b   :  { %5134 = vadd.xlane.f32.xlu0 %v5133_v20 }
0x2398   :  { %v5017_v35 = vpop.xlane.xlu0 %5016 }
0x2399   :  { %v5018_v39 = vsub.f32 %v5011_v41, %v5017_v35 }
0x239b   :  { %v5019_v1 = vmul.f32 1.442695, %v5018_v39 }
0x239c   :  { %v5109_v40 = vpop.xlane.xlu0 %5108 }
0x239d   :  { %6601 = vrsqrt.f32 %v5109_v40 }
0x23a0   :  { %v5118_v43 = vpop.xlane.xlu0 %5117 }
0x23a1   :  { %6603 = vrsqrt.f32 %v5118_v43 }
0x23a4   :  { %v5126_v49 = vpop.xlane.xlu0 %5125 }
0x23a5   :  { %6605 = vrsqrt.f32 %v5126_v49 }
0x23a7   :  { %v6602_v50 = vpop.eup %6601 }
0x23a8   :  { %v5135_v51 = vpop.xlane.xlu0 %5134  ;;  %v5111_v52 = vmul.f32 %v6602_v50, %v6928_v16 }
0x23a9   :  { %6607 = vrsqrt.f32 %v5135_v51 }
0x23aa   :  { %v5112_v54 = vmul.f32 25.0, %v5111_v52  ;;  %6609 = vpow2.f32 %v5019_v1 }
0x23ab   :  { %v6604_v53 = vpop.eup %6603  ;;  %6611 = vrcp.f32 %v7700_v31 }
0x23ac   :  { %v5120_v55 = vmul.f32 %v6604_v53, %v6928_v16  ;;  %5139 = vrot.lane.b32.xlu1 %v5112_v54, %s6806_s8 }
0x23ae   :  { %5142 = vrot.lane.b32.xlu0 %v5120_v55, %s6805_s7 }
0x23af   :  { %v6606_v56 = vpop.eup %6605 }
0x23b0   :  { %v5128_v57 = vmul.f32 %v6606_v56, %v6932_v18 }
0x23b2   :  { %v5129_v6 = vmul.f32 25.0, %v5128_v57 }
0x23b3   :  { %v6608_v58 = vpop.eup %6607 }
0x23b4   :  { %v5137_v59 = vmul.f32 %v6608_v58, %v6932_v18  ;;  %v6610_v4 = vpop.eup %6609 }
0x23b5   :  { %v5021_v5 = vsel %vm362_vm3, %v6610_v4, 0.0  ;;  %v6612_v24 = vpop.eup %6611 }
0x23b6   :  { %5233 = vrot.lane.b32.xlu0 %v5137_v59, %s6805_s7  ;;  %v4934_v29 = vmul.f32 %v6612_v24, %v7677_v12 }
0x23ba   :  { %5398 = vrot.lane.b32.xlu0 %v7271_v10, %s6809_s11 }
0x23be   :  { %5407 = vrot.lane.b32.xlu0 %v7271_v10, %s6808_s10 }
0x241e   :  { %v5140_v46 = vpop.permute.xlu1 %5139 }
0x2420   :  { %v5143_v60 = vpop.permute.xlu0 %5142 }
0x2421   :  { %6263 = vmatpush3.xpose.msk.msra.mxu0 %vm252_vm1, %v5143_v60 }
0x2422   :  { %6272 = vmatprep.subr.mxu0 %v6789_v28 }
0x2424   :  { %6265 = vmatmul.mubr.msk.f32.vlgmr.msra.gmra.mrb[38].mxu0 %vm252_vm1, %v5140_v46 }
0x2425   :  { %6274 = vmatprep.mubr.msk.f32.mxu0 %vm6790_vm2, %v6789_v28 }
0x2428   :  { %v5234_v61 = vpop.permute.xlu0 %5233 }
0x242c   :  { %v5399_v62 = vpop.permute.xlu0 %5398 }
0x242d   :  { %v5401_v7 = vsel %vm252_vm1, %v5399_v62, 0.0 }
0x2430   :  { %v5408_v63 = vpop.permute.xlu0 %5407 }
0x2431   :  { %v5410_v0 = vsel %vm252_vm1, %v5408_v63, 0.0 }
0x2432   :  { %5411 = vadd.xlane.f32.xlu0 %v5410_v0 }
0x24bf   :  { %v5412_v12 = vpop.xlane.xlu0 %5411 }
0x24f7   :  { %v5214_v10 = vpop.f32.mrb[38].mxu0 }
0x24f8   :  { %v6266_v2 = vpop.f32.mrb[39].mxu0  ;;  %v5218_v3 = vsel %vm362_vm3, %v5214_v10, -inf }
0x24f9   :  { %5219 = vmax.xlane.f32.xlu1 %v5218_v3 }
0x24fd   :  { %5022 = vadd.xlane.f32.xlu1 %v5021_v5 }
0x250e   :  { %5230 = vrot.lane.b32.xlu1 %v5129_v6, %s6806_s8 }
0x2512   :  { %5322 = vrot.lane.b32.xlu1 %v6928_v16, %s6810_s12 }
0x2536   :  { %5402 = vadd.xlane.f32.xlu1 %v5401_v7 }
0x2586   :  { %v5220_v8 = vpop.xlane.xlu1 %5219 }
0x2587   :  { %v5221_v9 = vsub.f32 %v5214_v10, %v5220_v8 }
0x2589   :  { %v5222_v11 = vmul.f32 1.442695, %v5221_v9 }
0x258a   :  { %v5023_v13 = vpop.xlane.xlu1 %5022 }
0x258b   :  { %6613 = vpow2.f32 %v5222_v11 }
0x258c   :  { %6615 = vrcp.f32 %v5023_v13 }
0x258e   :  { %v5231_v15 = vpop.permute.xlu1 %5230 }
0x2592   :  { %v5323_v23 = vpop.permute.xlu1 %5322 }
0x2593   :  { %6273 = vmatpush3.msra.mxu0 %v5323_v23 }
0x2594   :  { %6282 = vmatprep.subr.mxu0 %v6789_v28 }
0x2595   :  { %v7735_v25 = vpop.eup %6613 }
0x2596   :  { %v6616_v19 = vpop.eup %6615  ;;  %v5224_v27 = vsel %vm362_vm3, %v7735_v25, 0.0 }
0x2597   :  { %v5025_v37 = vmul.f32 %v6616_v19, %v6610_v4  ;;  %5225 = vadd.xlane.f32.xlu0 %v5224_v27 }
0x2599   :  { %v5026_v31 = vadd.f32 %v5025_v37, %v4934_v29 }
0x259b   :  { %v5027_v45 = vmul.f32 0.5, %v5026_v31 }
0x259d   :  { %6260 = vmatmul.mubr.msk.f32.vlgmr.msra.gmra.mrb[50].mxu1 %vm362_vm3, %v5027_v45 }
0x259e   :  { %6268 = vmatpush3.xpose.msk.msra.mxu1 %vm252_vm1, %v5234_v61  ;;  %6269 = vmatprep.mubr.msk.f32.mxu1 %vm6790_vm2, %v6789_v28 }
0x259f   :  { %6277 = vmatprep.subr.mxu1 %v6789_v28 }
0x25a1   :  { %6270 = vmatmul.mubr.msk.f32.vlgmr.msra.gmra.mrb[52].mxu1 %vm252_vm1, %v5231_v15 }
0x25a2   :  { %6279 = vmatprep.mubr.msk.f32.mxu1 %vm6790_vm2, %v6789_v28 }
0x25ad   :  { %5424 = vrot.lane.b32.xlu0 %v7281_v22, %s6808_s10 }
0x25c3   :  { %v5403_v38 = vpop.xlane.xlu1 %5402 }
0x25c4   :  { %6617 = vrsqrt.f32 %v5403_v38 }
0x25c5   :  { %6619 = vrsqrt.f32 %v5412_v12 }
0x25ce   :  { %v6618_v40 = vpop.eup %6617 }
0x25cf   :  { %v5405_v43 = vmul.f32 %v6618_v40, %v6928_v16  ;;  %v6620_v50 = vpop.eup %6619 }
0x25d0   :  { %v5414_v51 = vmul.f32 %v6620_v50, %v6928_v16 }
0x25d1   :  { %v5406_v49 = vmul.f32 25.0, %v5405_v43 }
0x2624   :  { %v5226_v44 = vpop.xlane.xlu0 %5225 }
0x2628   :  { %v5425_v41 = vpop.permute.xlu0 %5424 }
0x2629   :  { %v5427_v48 = vsel %vm252_vm1, %v5425_v41, 0.0 }
0x262a   :  { %5428 = vadd.xlane.f32.xlu0 %v5427_v48 }
0x2670   :  { %v7751_v17 = vpop.f32.mrb[50].mxu1 }
0x2671   :  { %v6261_v47 = vpop.f32.mrb[51].mxu1 }
0x2674   :  { %v5305_v30 = vpop.f32.mrb[52].mxu1 }
0x2675   :  { %v6271_v34 = vpop.f32.mrb[53].mxu1  ;;  %v5309_v33 = vsel %vm362_vm3, %v5305_v30, -inf }
0x2676   :  { %5310 = vmax.xlane.f32.xlu1 %v5309_v33 }
0x2687   :  { %5415 = vrot.lane.b32.xlu1 %v7281_v22, %s6809_s11 }
0x26b7   :  { %v5429_v61 = vpop.xlane.xlu0 %5428 }
0x2703   :  { %v5311_v32 = vpop.xlane.xlu1 %5310 }
0x2704   :  { %v5312_v20 = vsub.f32 %v5305_v30, %v5311_v32 }
0x2706   :  { %v5313_v56 = vmul.f32 1.442695, %v5312_v20 }
0x2707   :  { %v5416_v35 = vpop.permute.xlu1 %5415 }
0x2708   :  { %v5418_v39 = vsel %vm252_vm1, %v5416_v35, 0.0 }
0x2709   :  { %5419 = vadd.xlane.f32.xlu1 %v5418_v39 }
0x271a   :  { %5433 = vrot.lane.b32.xlu1 %v5406_v49, %s6809_s11 }
0x271e   :  { %5436 = vrot.lane.b32.xlu1 %v5414_v51, %s6808_s10 }
0x2796   :  { %v5420_v22 = vpop.xlane.xlu1 %5419 }
0x2797   :  { %6621 = vrsqrt.f32 %v5420_v22 }
0x2798   :  { %6623 = vpow2.f32 %v5313_v56 }
0x2799   :  { %6625 = vrsqrt.f32 %v5429_v61 }
0x279a   :  { %v5434_v52 = vpop.permute.xlu1 %5433  ;;  %6627 = vrcp.f32 %v5226_v44 }
0x279e   :  { %v5437_v53 = vpop.permute.xlu1 %5436 }
0x279f   :  { %6278 = vmatpush3.xpose.msk.msra.mxu1 %vm252_vm1, %v5437_v53 }
0x27a0   :  { %6287 = vmatprep.subr.mxu1 %v6789_v28 }
0x27a1   :  { %v6622_v54 = vpop.eup %6621 }
0x27a2   :  { %6280 = vmatmul.mubr.msk.f32.vlgmr.msra.gmra.mrb[54].mxu1 %vm252_vm1, %v5434_v52  ;;  %v5422_v55 = vmul.f32 %v6622_v54, %v6932_v18  ;;  %v6624_v60 = vpop.eup %6623 }
0x27a3   :  { %6289 = vmatprep.mubr.msk.f32.mxu1 %vm6790_vm2, %v6789_v28  ;;  %v5315_v46 = vsel %vm362_vm3, %v6624_v60, 0.0  ;;  %v6626_v63 = vpop.eup %6625 }
0x27a4   :  { %v5423_v62 = vmul.f32 25.0, %v5422_v55  ;;  %v5431_v0 = vmul.f32 %v6626_v63, %v6932_v18  ;;  %v6628_v4 = vpop.eup %6627 }
0x27a5   :  { %v5228_v8 = vmul.f32 %v6628_v4, %v7735_v25 }
0x2875   :  { %v5508_v57 = vpop.f32.mrb[54].mxu1 }
0x2876   :  { %v6281_v58 = vpop.f32.mrb[55].mxu1  ;;  %v5512_v59 = vsel %vm362_vm3, %v5508_v57, -inf }
0x2877   :  { %5513 = vmax.xlane.f32.xlu0 %v5512_v59 }
0x287b   :  { %5316 = vadd.xlane.f32.xlu0 %v5315_v46 }
0x2891   :  { %5524 = vrot.lane.b32.xlu0 %v5423_v62, %s6809_s11 }
0x2895   :  { %5527 = vrot.lane.b32.xlu0 %v5431_v0, %s6808_s10 }
0x2904   :  { %v5514_v1 = vpop.xlane.xlu0 %5513 }
0x2905   :  { %v5515_v10 = vsub.f32 %v5508_v57, %v5514_v1 }
0x2907   :  { %v5516_v2 = vmul.f32 1.442695, %v5515_v10 }
0x2908   :  { %v5317_v3 = vpop.xlane.xlu0 %5316 }
0x2909   :  { %6629 = vpow2.f32 %v5516_v2 }
0x290a   :  { %6631 = vrcp.f32 %v5317_v3 }
0x290c   :  { %v5525_v11 = vpop.permute.xlu0 %5524 }
0x2910   :  { %v5528_v15 = vpop.permute.xlu0 %5527 }
0x2913   :  { %v6630_v5 = vpop.eup %6629 }
0x2914   :  { %v6632_v6 = vpop.eup %6631  ;;  %v5518_v7 = vsel %vm362_vm3, %v6630_v5, 0.0 }
0x2915   :  { %v5319_v9 = vmul.f32 %v6632_v6, %v6624_v60  ;;  %5519 = vadd.xlane.f32.xlu1 %v5518_v7 }
0x2917   :  { %v5320_v18 = vadd.f32 %v5319_v9, %v5228_v8 }
0x2919   :  { %v5321_v13 = vmul.f32 0.5, %v5320_v18 }
0x291b   :  { %6275 = vmatmul.mubr.msk.f32.vlgmr.msra.gmra.mrb[40].mxu0 %vm362_vm3, %v5321_v13 }
0x291c   :  { %6283 = vmatpush3.xpose.msk.msra.mxu0 %vm252_vm1, %v5528_v15  ;;  %6284 = vmatprep.mubr.msk.f32.mxu0 %vm6790_vm2, %v6789_v28 }
0x291f   :  { %6285 = vmatmul.mubr.msk.f32.vlgmr.msra.gmra.mrb[42].mxu0 %vm252_vm1, %v5525_v11 }
0x29ee   :  { %v5394_v23 = vpop.f32.mrb[40].mxu0 }
0x29ef   :  { %v6276_v24 = vpop.f32.mrb[41].mxu0 }
0x29f2   :  { %v5599_v19 = vpop.f32.mrb[42].mxu0 }
0x29f3   :  { %v6286_v27 = vpop.f32.mrb[43].mxu0  ;;  %v5603_v25 = vsel %vm362_vm3, %v5599_v19, -inf }
0x29f4   :  { %5604 = vmax.xlane.f32.xlu0 %v5603_v25 }
0x2a0a   :  { %5697 = vrot.lane.b32.xlu0 %v7595_v14, %s6784_s6  ;;  %v5520_v14 = vpop.xlane.xlu1 %5519 }
0x2a0e   :  { %5727 = vrot.lane.b32.xlu0 %v6928_v16, %s6787_s3  ;;  %s6818_s3 = smov [#allocation11]  }
0x2a0f   :  { %s5751_s18 = sshll.u32 %s6818_s3, 4  ;;  %s5752_s18 = int_to_ptr.vmem [resolvable:$true] %s5751_s18 }
0x2a10   :  { %s6727_s19 = scalar_lea.vmem %s5752_s18, 128  ;;  %p6732_p5 = scmp.lt.s32.totalorder %s5752_s18, %s5752_s18 }
0x2a11   :  { %p6728_p4 = scmp.ne.s32.totalorder %s5752_s18, %s6727_s19  ;;  %p6733_p6 = scmp.lt.s32.totalorder %s6727_s19, %s6727_s19 }
0x2a13   :  { %p6734_p7 = por %p6733_p6, %p6732_p5 }
0x2a15   :  { %p6735_p8 = pnand %p6734_p7, %p6728_p4 }
0x2a81   :  { %v5605_v29 = vpop.xlane.xlu0 %5604 }
0x2a82   :  { %v5606_v37 = vsub.f32 %v5599_v19, %v5605_v29 }
0x2a84   :  { %v5607_v31 = vmul.f32 1.442695, %v5606_v37 }
0x2a86   :  { %6633 = vpow2.f32 %v5607_v31 }
0x2a87   :  { %6635 = vrcp.f32 %v5520_v14 }
0x2a90   :  { %v6634_v28 = vpop.eup %6633 }
0x2a91   :  { %v5609_v45 = vsel %vm362_vm3, %v6634_v28, 0.0 }
0x2a92   :  { %5610 = vadd.xlane.f32.xlu1 %v5609_v45 }
0x2aa3   :  { %5616 = vrot.lane.b32.xlu1 %v6928_v16, %s6811_s13  ;;  %v6636_v16 = vpop.eup %6635 }
0x2aa7   :  { %5693 = vrot.lane.b32.xlu1 %v7462_v26, %s6812_s14  ;;  %v5522_v26 = vmul.f32 %v6636_v16, %v6630_v5 }
0x2aab   :  { %5701 = vrot.lane.b32.xlu1 %v7642_v21, %s6813_s15 }
0x2aaf   :  { %5705 = vrot.lane.b32.xlu1 %v7703_v42, %s6814_s2 }
0x2ab3   :  { %5709 = vrot.lane.b32.xlu1 %v7751_v17, %s6815_s16 }
0x2ab7   :  { %5713 = vrot.lane.b32.xlu1 %v5394_v23, %s6816_s1 }
0x2b1f   :  { %v5611_v12 = vpop.xlane.xlu1 %5610 }
0x2b20   :  { %6637 = vrcp.f32 %v5611_v12 }
0x2b23   :  { %v5617_v44 = vpop.permute.xlu1 %5616 }
0x2b24   :  { %6288 = vmatpush3.msra.mxu1 %v5617_v44 }
0x2b2a   :  { %v6638_v41 = vpop.eup %6637 }
0x2b2b   :  { %v5613_v48 = vmul.f32 %v6638_v41, %v6634_v28 }
0x2b2d   :  { %v5614_v47 = vadd.f32 %v5613_v48, %v5522_v26 }
0x2b2f   :  { %v5615_v21 = vmul.f32 0.5, %v5614_v47 }
0x2b31   :  { %6290 = vmatmul.mubr.msk.f32.vlgmr.msra.gmra.mrb[56].mxu1 %vm362_vm3, %v5615_v21 }
0x2b32   :  { %6738 = shalt.err (!%p6735_p8)
}
0x2b33   :  { %s6739_s23 = scalar_lea.hbm %s7840_s5, 128 }
0x2b34   :  { %p6740_p9 = scmp.ne.s32.totalorder %s7840_s5, %s6739_s23  ;;  %p6743_p10 = scmp.lt.u32.totalorder %s6739_s23, %s7840_s5 }
0x2b36   :  { %p6745_p11 = pnand %p6743_p10, %p6740_p9 }
0x2b38   :  { %6748 = shalt.err (!%p6745_p11)
}
0x2b39   :  { %5754 = dma.vmem_to_hbm [thread:$0]  %s5752_s18, 128, %s7840_s5, [#allocation12]   ;;  %v5694_v30 = vpop.permute.xlu1 %5693  ;;  %v5698_v20 = vpop.permute.xlu0 %5697 }
0x2b3a   :  { %v5720_v32 = vsel %vm252_vm1, %v7389_v36, %v5694_v30  ;;  %s6819_s5 = smov [#allocation10]  }
0x2b3b   :  { %v5721_v35 = vsel %vm362_vm3, %v5720_v32, %v5698_v20  ;;  %s5738_s0 = sshll.u32 %s6819_s5, 4  ;;  %s5739_s0 = int_to_ptr.vmem [resolvable:$true] %s5738_s0 }
0x2b3c   :  { %s6749_s21 = scalar_lea.vmem %s5739_s0, 256  ;;  %p6754_p13 = scmp.lt.s32.totalorder %s5739_s0, %s5739_s0 }
0x2b3d   :  { %v5702_v34 = vpop.permute.xlu1 %5701  ;;  %v5728_v22 = vpop.permute.xlu0 %5727  ;;  %p6750_p12 = scmp.ne.s32.totalorder %s5739_s0, %s6749_s21  ;;  %p6755_p0 = scmp.lt.s32.totalorder %s6749_s21, %s6749_s21 }
0x2b3e   :  { %v5722_v40 = vsel %vm2637_vm4, %v5721_v35, %v5702_v34 }
0x2b3f   :  { %p6756_p1 = por %p6755_p0, %p6754_p13 }
0x2b41   :  { %v5706_v33 = vpop.permute.xlu1 %5705  ;;  %p6757_p2 = pnand %p6756_p1, %p6750_p12 }
0x2b42   :  { %v5723_v43 = vsel %vm2639_vm5, %v5722_v40, %v5706_v33 }
0x2b45   :  { %v5710_v38 = vpop.permute.xlu1 %5709 }
0x2b46   :  { %v5724_v49 = vsel %vm2641_vm6, %v5723_v43, %v5710_v38 }
0x2b49   :  { %v5714_v39 = vpop.permute.xlu1 %5713 }
0x2b4a   :  { %v5725_v50 = vsel %vm2643_vm7, %v5724_v49, %v5714_v39 }
0x2c04   :  { %v5688_v42 = vpop.f32.mrb[56].mxu1 }
0x2c05   :  { %5717 = vrot.lane.b32.xlu1 %v5688_v42, %s6817_s17  ;;  %v6291_v17 = vpop.f32.mrb[57].mxu1 }
0x2c77   :  { %v5718_v51 = vpop.permute.xlu1 %5717 }
0x2c78   :  { %v5726_v52 = vsel %vm2645_vm8, %v5725_v50, %v5718_v51 }
0x2c79   :  { %v5730_v36 = vsel %vm88_vm0, %v5726_v52, %v5728_v22 }
0x2c7a   :  { %5732 = vst.msk [vmem:[#allocation10 + $0x8] sm:$0xff] %vm2651_vm9, %v5730_v36 }
0x2c7b   :  { %6760 = shalt.err (!%p6757_p2)
}
0x2c7c   :  { %s6761_s9 = scalar_lea.hbm %s7839_s4, 256 }
0x2c7d   :  { %p6762_p3 = scmp.ne.s32.totalorder %s7839_s4, %s6761_s9  ;;  %p6765_p4 = scmp.lt.u32.totalorder %s6761_s9, %s7839_s4 }
0x2c7f   :  { %p6767_p5 = pnand %p6765_p4, %p6762_p3 }
0x2c81   :  { %6770 = shalt.err (!%p6767_p5)
}
0x2c82   :  { %5744 = dma.vmem_to_hbm [thread:$0]  %s5739_s0, 256, %s7839_s4, [#allocation4], %s6783_s30, %s6783_s30, %s6784_s6  }
0x2c83   :  { %6777 = dma.done.wait [#allocation4], 256  }
0x2c84   :  { %6778 = vsyncadd [#allocation4], 4294967040 }
0x2c85   :  { %6779 = dma.done.wait [#allocation12], 128  }
0x2c86   :  { %6780 = vsyncadd [#allocation12], 4294967168 }
0x2c87   :  { %5761 = vsyncpa [#allocation3], 1 }
0x2c88   :  { %5762 = vsyncpa [#allocation6], 1 }
0x2c89   :  { %5763 = vsyncpa [#allocation9], 1 }
0x2c8a   :  { %5764 = vsyncpa [#allocation4], 1 }
0x2c8b   :  { %5765 = vsyncpa [#allocation12], 1 }

</bundles_post_ra>
